<compile_context>
chip_gen: v6e
topology: v6e:2x2x1
jax: 0.10.0
libtpu: 0.0.40
codegen_flags: <defaults>
</compile_context>

<pallas_src>
import numpy as np
import jax
import jax.numpy as jnp
from jax import lax
from jax.experimental import pallas as pl
from jax.experimental.pallas import tpu as pltpu

SHRINK = 0.5        # Softshrink lambda = 1 / n with n = 2
NUM_ITERS = 5       # outer refinement loop in SRModel.forward
MAX_TB = 16         # cap on images per grid step


# ----------------------------------------------------------------------------
# Wavelet analysis matrices (glue; built once on host)
# ----------------------------------------------------------------------------
def _analysis_matrix(n, dec_lo):
    """Orthogonal single-level periodic DWT analysis matrix A (n x n).

    Rows [0, n/2) hold the stride-2 circular low-pass taps, rows [n/2, n) the
    quadrature-mirror high-pass taps.  A @ A.T = I, so IDWT == multiply by A.T.
    """
    h = np.asarray(dec_lo, dtype=np.float64)
    L = len(h)
    g = np.array([(-1.0) ** m * h[L - 1 - m] for m in range(L)])
    A = np.zeros((n, n), dtype=np.float64)
    half = n // 2
    for k in range(half):
        for m in range(L):
            A[k, (2 * k + m) % n] += h[m]
            A[half + k, (2 * k + m) % n] += g[m]
    return jnp.asarray(A, dtype=jnp.float32)


_DB1 = [1.0 / np.sqrt(2.0), 1.0 / np.sqrt(2.0)]
_S3 = np.sqrt(3.0)
_DB2 = [(1.0 + _S3) / (4.0 * np.sqrt(2.0)),
        (3.0 + _S3) / (4.0 * np.sqrt(2.0)),
        (3.0 - _S3) / (4.0 * np.sqrt(2.0)),
        (1.0 - _S3) / (4.0 * np.sqrt(2.0))]


# ----------------------------------------------------------------------------
# Pallas kernel: 5-iteration SuperResolve refinement for a (tb, H, W) slab
# ----------------------------------------------------------------------------
def _sr_kernel(coef_ref, x_ref, s1t_ref, s2t_ref,
               awt_cat_ref, aw_cat_ref,
               a1ht_ref, a2ht_ref, a1h_ref, a2h_ref,
               o_ref):
    tb, H, W = x_ref.shape
    x0 = x_ref[...].reshape(tb * H, W)                 # f32, lanes = W

    awt_cat = awt_cat_ref[...]                         # (W, 2W) bf16 [Aw1^T|Aw2^T]
    aw_cat = aw_cat_ref[...]                           # (2W, W) bf16 [Aw1 ; Aw2]
    a1ht, a2ht = a1ht_ref[...], a2ht_ref[...]          # (H, H)  bf16  Ah^T
    a1h, a2h = a1h_ref[...], a2h_ref[...]              # (H, H)  bf16  Ah
    s1t, s2t = s1t_ref[...], s2t_ref[...]              # (W, H)  f32   scale^T

    def mm(a, b):
        return jnp.dot(a, b, preferred_element_type=jnp.float32)

    def scale_shrink(y, st, c):
        # y: (tb*W, H) f32 DWT coefficients in the transposed domain (lanes=H)
        z = y.reshape(tb, W, H) * st[None]             # per-subband scale
        z = z - jnp.clip(z, -SHRINK, SHRINK)           # Softshrink(lambda)
        z = c * z                                      # pre-scale by factor*w_b
        return z.reshape(tb * W, H).astype(jnp.bfloat16)

    def body(it, x):
        c0 = coef_ref[it, 0]                           # factor * w0 (SMEM)
        c1 = coef_ref[it, 1]                           # factor * w1
        xb16 = x.astype(jnp.bfloat16)

        # DWT, W direction, fused over both blocks: [X Aw1^T | X Aw2^T]
        m1 = mm(xb16, awt_cat)                         # (tb*H, 2W) f32
        m1t = jnp.swapaxes(                            # bf16 BEFORE transpose
            m1.astype(jnp.bfloat16).reshape(tb, H, 2 * W), 1, 2)  # (tb, 2W, H)

        # DWT, H direction, per block -> transposed subbands Y_b^T
        y1 = mm(m1t[:, :W, :].reshape(tb * W, H), a1ht)           # (tb*W, H)
        y2 = mm(m1t[:, W:, :].reshape(tb * W, H), a2ht)

        # scale * Softshrink * mixing coefficient
        z1 = scale_shrink(y1, s1t, c0)
        z2 = scale_shrink(y2, s2t, c1)

        # IDWT, H direction, per block
        m3_1 = mm(z1, a1h).astype(jnp.bfloat16).reshape(tb, W, H)
        m3_2 = mm(z2, a2h).astype(jnp.bfloat16).reshape(tb, W, H)

        # IDWT, W direction, fused: single matmul yields c0*xr1 + c1*xr2
        m3cat = jnp.concatenate([m3_1, m3_2], axis=1)             # (tb, 2W, H)
        m3t = jnp.swapaxes(m3cat, 1, 2).reshape(tb * H, 2 * W)    # (tb*H, 2W)
        xr = mm(m3t, aw_cat)                                      # (tb*H, W)

        # x + c0*(xr1 - x) + c1*(xr2 - x)
        return (1.0 - c0 - c1) * x + xr

    x = lax.fori_loop(0, NUM_ITERS, body, x0)
    o_ref[...] = x.reshape(tb, H, W)


# ----------------------------------------------------------------------------
# Generation-aware sizing
# ----------------------------------------------------------------------------
def _tpu_info():
    vmem_cap = 64 * 1024 * 1024        # conservative fallback (v7x per-TC VMEM)
    n_cores = 1
    try:
        info = pltpu.get_tpu_info()
        vmem_cap = int(getattr(info, "vmem_capacity_bytes", vmem_cap))
        for attr in ("num_cores", "tensorcores_per_chip", "cores_per_chip",
                     "num_tensorcores"):
            val = getattr(info, attr, None)
            if val:
                n_cores = int(val)
                break
    except Exception:
        pass
    return vmem_cap, n_cores


def _choose_tb(B, H, W):
    """Images per grid step + scoped-VMEM limit, derived from the chip."""
    img_bytes = H * W * 4
    vmem_cap, n_cores = _tpu_info()
    # ~16 live (tb,H,W)-sized f32-equivalent slabs per grid step: x, xb16, the
    # 2W-wide fused intermediates (+ bf16 transposed copies), per-block y/z/m3
    # slabs, xr, plus double-buffered input and output blocks.
    live_slabs = 16
    budget = max(vmem_cap // 2, 8 * 1024 * 1024)
    tb = max(1, min(MAX_TB, budget // (live_slabs * img_bytes)))
    if n_cores >= 2 and B >= 2:
        tb = min(tb, -(-B // n_cores))          # keep >= n_cores grid steps
    tb = max(1, min(tb, B))
    vmem_limit = int(min(vmem_cap * 3 // 4, 112 * 1024 * 1024))
    vmem_limit = max(vmem_limit, 32 * 1024 * 1024)
    return tb, vmem_limit


def sr_refine_pallas(xb, mats, scales, coeffs):
    B, H, W = xb.shape
    assert H % 2 == 0 and W % 2 == 0, "even spatial dims required for DWT quadrants"
    tb, vmem_limit = _choose_tb(B, H, W)
    b_pad = -(-B // tb) * tb
    if b_pad != B:
        xb = jnp.pad(xb, ((0, b_pad - B), (0, 0), (0, 0)))

    a1h, a1w, a2h, a2w = mats
    s1, s2 = scales
    bf = lambda m: m.astype(jnp.bfloat16)
    awt_cat = bf(jnp.concatenate([a1w.T, a2w.T], axis=1))   # (W, 2W)
    aw_cat = bf(jnp.concatenate([a1w, a2w], axis=0))        # (2W, W)
    a1ht, a2ht = bf(a1h.T), bf(a2h.T)
    a1h_b, a2h_b = bf(a1h), bf(a2h)

    def const_spec(shp):
        return pl.BlockSpec(shp, lambda i: (0, 0))

    out = pl.pallas_call(
        _sr_kernel,
        out_shape=jax.ShapeDtypeStruct((b_pad, H, W), jnp.float32),
        grid=(b_pad // tb,),
        in_specs=[
            pl.BlockSpec(memory_space=pltpu.MemorySpace.SMEM),   # (5,2) coeffs
            pl.BlockSpec((tb, H, W), lambda i: (i, 0, 0)),       # image slab
            const_spec((W, H)),                                  # scale1^T
            const_spec((W, H)),                                  # scale2^T
            const_spec((W, 2 * W)),                              # [Aw1^T | Aw2^T]
            const_spec((2 * W, W)),                              # [Aw1 ; Aw2]
            const_spec((H, H)), const_spec((H, H)),              # Ah1^T, Ah2^T
            const_spec((H, H)), const_spec((H, H)),              # Ah1, Ah2
        ],
        out_specs=pl.BlockSpec((tb, H, W), lambda i: (i, 0, 0)),
        compiler_params=pltpu.CompilerParams(
            dimension_semantics=("parallel",),
            vmem_limit_bytes=vmem_limit),
    )(coeffs, xb, s1.T, s2.T, awt_cat, aw_cat, a1ht, a2ht, a1h_b, a2h_b)
    return out[:B]


# ----------------------------------------------------------------------------
# JAX glue (F.interpolate nearest + global min/max normalization + params)
# ----------------------------------------------------------------------------
def nearest_resize(s, out_h, out_w):
    _, _, H, W = s.shape
    ridx = (jnp.arange(out_h) * H) // out_h
    cidx = (jnp.arange(out_w) * W) // out_w
    return s[:, :, ridx, :][:, :, :, cidx]


def _quad_scale(p4, H, W):
    h2, w2 = H // 2, W // 2
    top = jnp.concatenate([jnp.broadcast_to(p4[0], (h2, w2)),
                           jnp.broadcast_to(p4[1], (h2, W - w2))], axis=1)
    bot = jnp.concatenate([jnp.broadcast_to(p4[2], (H - h2, w2)),
                           jnp.broadcast_to(p4[3], (H - h2, W - w2))], axis=1)
    return jnp.concatenate([top, bot], axis=0).astype(jnp.float32)


def _mix_coeffs(weight_params):
    factors = 0.5 ** jnp.arange(1, NUM_ITERS + 1, dtype=jnp.float32)
    return (factors[:, None] * weight_params[None, :]).astype(jnp.float32)


def sr_model_forward(s, new_shape, block_params, weight_params, mats):
    H, W = new_shape
    x = nearest_resize(s.astype(jnp.float32), H, W)
    xmax = jnp.max(x)
    xmin = jnp.min(x)
    x = (x - xmin) / (xmax - xmin)   # NOTE: no eps, matches the PyTorch module
    N, C = x.shape[:2]
    s1 = _quad_scale(block_params[0:4], H, W)
    s2 = _quad_scale(block_params[4:8], H, W)
    coeffs = _mix_coeffs(weight_params)
    out = sr_refine_pallas(x.reshape(N * C, H, W), mats, (s1, s2), coeffs)
    return out.reshape(N, C, H, W)


# ----------------------------------------------------------------------------
# Pure-JAX reference (same math; mm_dtype selects the matmul input precision)
# ----------------------------------------------------------------------------
def sr_model_reference(s, new_shape, block_params, weight_params, mats,
                       mm_dtype=jnp.float32):
    a1h, a1w, a2h, a2w = mats
    H, W = new_shape
    x = nearest_resize(s.astype(jnp.float32), H, W)
    xmin = jnp.min(x)
    xmax = jnp.max(x)
    x = (x - xmin) / (xmax - xmin)

    s1 = _quad_scale(block_params[0:4], H, W)
    s2 = _quad_scale(block_params[4:8], H, W)
    coeffs = _mix_coeffs(weight_params)
    c = lambda a: a.astype(mm_dtype)

    def block_xr(x4, ah, aw, sc, cmix):
        t1 = jnp.einsum('nchw,vw->nchv', c(x4), c(aw),
                        preferred_element_type=jnp.float32)   # X Aw^T
        y = jnp.einsum('kh,nchv->nckv', c(ah), c(t1),
                       preferred_element_type=jnp.float32)    # Ah X Aw^T
        z = sc * y
        z = z - jnp.clip(z, -SHRINK, SHRINK)                  # Softshrink
        z = cmix * z                                          # mixing coeff
        t3 = jnp.einsum('kh,nckv->nchv', c(ah), c(z),
                        preferred_element_type=jnp.float32)   # Ah^T (c Z)
        return jnp.einsum('nchv,vw->nchw', c(t3), c(aw),
                          preferred_element_type=jnp.float32) # c * Ah^T Z Aw

    for it in range(NUM_ITERS):
        xr1 = block_xr(x, a1h, a1w, s1, coeffs[it, 0])
        xr2 = block_xr(x, a2h, a2w, s2, coeffs[it, 1])
        x = (1.0 - coeffs[it, 0] - coeffs[it, 1]) * x + xr1 + xr2
    return x


if __name__ == "__main__":
    key = jax.random.PRNGKey(0)
    k_s, k_p1, k_p2, k_w = jax.random.split(key, 4)

    # Small shapes: batch=2, channels=3, input spatial 8x16, upsampled to 32x128
    new_shape = (32, 128)
    s = jax.random.normal(k_s, (2, 3, 8, 16), dtype=jnp.float32)

    # torch.rand -> uniform [0, 1); Block('db1')._param, Block('db2')._param,
    # SuperResolve._weight_params (flattened)
    p_db1 = jax.random.uniform(k_p1, (4,), dtype=jnp.float32)
    p_db2 = jax.random.uniform(k_p2, (4,), dtype=jnp.float32)
    block_params = jnp.concatenate([p_db1, p_db2])               # (8,)
    weight_params = jax.random.uniform(k_w, (2,), dtype=jnp.float32)

    H, W = new_shape
    mats = (_analysis_matrix(H, _DB1), _analysis_matrix(W, _DB1),
            _analysis_matrix(H, _DB2), _analysis_matrix(W, _DB2))

    out = jax.block_until_ready(
        sr_model_forward(s, new_shape, block_params, weight_params, mats))
    assert out.shape == (2, 3, H, W), out.shape

    # Matched-precision check: reference uses the same bf16 matmul inputs and
    # the same cast/scale placement, so this validates the kernel tightly.
    ref_bf16 = jax.block_until_ready(
        sr_model_reference(s, new_shape, block_params, weight_params, mats,
                           mm_dtype=jnp.bfloat16))
    err_m = float(jnp.max(jnp.abs(out - ref_bf16)))
    if err_m > 3e-3:
        raise AssertionError(f"kernel mismatch vs matched-precision ref: {err_m}")

    # Sanity check against an all-f32 reference (bf16 MXU rounding drift only).
    ref_f32 = jax.block_until_ready(
        sr_model_reference(s, new_shape, block_params, weight_params, mats,
                           mm_dtype=jnp.float32))
    err_f = float(jnp.max(jnp.abs(out - ref_f32)))
    if err_f > 5e-2:
        raise AssertionError(f"kernel drift vs f32 reference too large: {err_f}")

    print("KERNEL_OK")
</pallas_src>

<mosaic_0001>
module attributes {stable_mosaic.version = 11 : i64} {
  func.func @_sr_kernel(%arg0: i32, %arg1: memref<5x2xf32, #tpu.memory_space<smem>>, %arg2: memref<6x32x128xf32, #tpu.memory_space<vmem>>, %arg3: memref<128x32xf32, #tpu.memory_space<vmem>>, %arg4: memref<128x32xf32, #tpu.memory_space<vmem>>, %arg5: memref<128x256xbf16, #tpu.memory_space<vmem>>, %arg6: memref<256x128xbf16, #tpu.memory_space<vmem>>, %arg7: memref<32x32xbf16, #tpu.memory_space<vmem>>, %arg8: memref<32x32xbf16, #tpu.memory_space<vmem>>, %arg9: memref<32x32xbf16, #tpu.memory_space<vmem>>, %arg10: memref<32x32xbf16, #tpu.memory_space<vmem>>, %arg11: memref<6x32x128xf32, #tpu.memory_space<vmem>>) attributes {dimension_semantics = [#tpu.dimension_semantics<parallel>], iteration_bounds = array<i64: 1>, scalar_prefetch = 0 : i64, scratch_operands = 0 : i64, tpu.core_type = #tpu.core_type<tc>, window_params = [{transform_indices = @transform_0, window_bounds = array<i64: 5, 2>}, {transform_indices = @transform_1, window_bounds = array<i64: 6, 32, 128>}, {pipeline_mode = #tpu.pipeline_mode<synchronous>, transform_indices = @transform_2, window_bounds = array<i64: 128, 32>}, {pipeline_mode = #tpu.pipeline_mode<synchronous>, transform_indices = @transform_3, window_bounds = array<i64: 128, 32>}, {pipeline_mode = #tpu.pipeline_mode<synchronous>, transform_indices = @transform_4, window_bounds = array<i64: 128, 256>}, {pipeline_mode = #tpu.pipeline_mode<synchronous>, transform_indices = @transform_5, window_bounds = array<i64: 256, 128>}, {pipeline_mode = #tpu.pipeline_mode<synchronous>, transform_indices = @transform_6, window_bounds = array<i64: 32, 32>}, {pipeline_mode = #tpu.pipeline_mode<synchronous>, transform_indices = @transform_7, window_bounds = array<i64: 32, 32>}, {pipeline_mode = #tpu.pipeline_mode<synchronous>, transform_indices = @transform_8, window_bounds = array<i64: 32, 32>}, {pipeline_mode = #tpu.pipeline_mode<synchronous>, transform_indices = @transform_9, window_bounds = array<i64: 32, 32>}, {transform_indices = @transform_10, window_bounds = array<i64: 6, 32, 128>}]} {
    %c0 = arith.constant 0 : index
    %c0_0 = arith.constant 0 : index
    %c0_1 = arith.constant 0 : index
    %0 = vector.load %arg2[%c0, %c0_0, %c0_1] : memref<6x32x128xf32, #tpu.memory_space<vmem>>, vector<6x32x128xf32>
    %1 = vector.shape_cast %0 : vector<6x32x128xf32> to vector<192x128xf32>
    %c0_2 = arith.constant 0 : index
    %c0_3 = arith.constant 0 : index
    %2 = vector.load %arg5[%c0_2, %c0_3] : memref<128x256xbf16, #tpu.memory_space<vmem>>, vector<128x256xbf16>
    %c0_4 = arith.constant 0 : index
    %c0_5 = arith.constant 0 : index
    %3 = vector.load %arg6[%c0_4, %c0_5] : memref<256x128xbf16, #tpu.memory_space<vmem>>, vector<256x128xbf16>
    %c0_6 = arith.constant 0 : index
    %c0_7 = arith.constant 0 : index
    %4 = vector.load %arg7[%c0_6, %c0_7] : memref<32x32xbf16, #tpu.memory_space<vmem>>, vector<32x32xbf16>
    %c0_8 = arith.constant 0 : index
    %c0_9 = arith.constant 0 : index
    %5 = vector.load %arg8[%c0_8, %c0_9] : memref<32x32xbf16, #tpu.memory_space<vmem>>, vector<32x32xbf16>
    %c0_10 = arith.constant 0 : index
    %c0_11 = arith.constant 0 : index
    %6 = vector.load %arg9[%c0_10, %c0_11] : memref<32x32xbf16, #tpu.memory_space<vmem>>, vector<32x32xbf16>
    %c0_12 = arith.constant 0 : index
    %c0_13 = arith.constant 0 : index
    %7 = vector.load %arg10[%c0_12, %c0_13] : memref<32x32xbf16, #tpu.memory_space<vmem>>, vector<32x32xbf16>
    %c0_14 = arith.constant 0 : index
    %c0_15 = arith.constant 0 : index
    %8 = vector.load %arg3[%c0_14, %c0_15] : memref<128x32xf32, #tpu.memory_space<vmem>>, vector<128x32xf32>
    %c0_16 = arith.constant 0 : index
    %c0_17 = arith.constant 0 : index
    %9 = vector.load %arg4[%c0_16, %c0_17] : memref<128x32xf32, #tpu.memory_space<vmem>>, vector<128x32xf32>
    %c0_i32 = arith.constant 0 : i32
    %c5_i32 = arith.constant 5 : i32
    %10 = arith.addi %c0_i32, %c5_i32 : i32
    %c1_i32 = arith.constant 1 : i32
    %11 = scf.for %arg12 = %c0_i32 to %10 step %c1_i32 iter_args(%arg13 = %1) -> (vector<192x128xf32>)  : i32 {
      %14 = arith.index_cast %arg12 : i32 to index
      %c0_22 = arith.constant 0 : index
      %15 = memref.load %arg1[%14, %c0_22] : memref<5x2xf32, #tpu.memory_space<smem>>
      %16 = arith.index_cast %arg12 : i32 to index
      %c1 = arith.constant 1 : index
      %17 = memref.load %arg1[%16, %c1] : memref<5x2xf32, #tpu.memory_space<smem>>
      %18 = arith.truncf %arg13 : vector<192x128xf32> to vector<192x128xbf16>
      %cst = arith.constant dense<0.000000e+00> : vector<192x256xf32>
      %19 = tpu.matmul %18, %2, %cst {dimension_numbers = #tpu.dot_dimension_numbers<[1], [0], [0], [1], [0, 0, 1, 1], [], []>} : vector<192x128xbf16>, vector<128x256xbf16>, vector<192x256xf32> -> vector<192x256xf32>
      %20 = arith.truncf %19 : vector<192x256xf32> to vector<192x256xbf16>
      %21 = vector.shape_cast %20 : vector<192x256xbf16> to vector<6x32x256xbf16>
      %22 = tpu.transpose %21, [0, 2, 1] : vector<6x32x256xbf16> -> vector<6x256x32xbf16>
      %23 = vector.extract_strided_slice %22 {offsets = [0, 0, 0], sizes = [6, 128, 32], strides = [1, 1, 1]} : vector<6x256x32xbf16> to vector<6x128x32xbf16>
      %24 = vector.shape_cast %23 : vector<6x128x32xbf16> to vector<768x32xbf16>
      %cst_23 = arith.constant dense<0.000000e+00> : vector<768x32xf32>
      %25 = tpu.matmul %24, %4, %cst_23 {dimension_numbers = #tpu.dot_dimension_numbers<[1], [0], [0], [1], [0, 0, 1, 1], [], []>} : vector<768x32xbf16>, vector<32x32xbf16>, vector<768x32xf32> -> vector<768x32xf32>
      %26 = vector.extract_strided_slice %22 {offsets = [0, 128, 0], sizes = [6, 128, 32], strides = [1, 1, 1]} : vector<6x256x32xbf16> to vector<6x128x32xbf16>
      %27 = vector.shape_cast %26 : vector<6x128x32xbf16> to vector<768x32xbf16>
      %cst_24 = arith.constant dense<0.000000e+00> : vector<768x32xf32>
      %28 = tpu.matmul %27, %5, %cst_24 {dimension_numbers = #tpu.dot_dimension_numbers<[1], [0], [0], [1], [0, 0, 1, 1], [], []>} : vector<768x32xbf16>, vector<32x32xbf16>, vector<768x32xf32> -> vector<768x32xf32>
      %29 = vector.shape_cast %25 : vector<768x32xf32> to vector<6x128x32xf32>
      %30 = vector.shape_cast %8 : vector<128x32xf32> to vector<1x128x32xf32>
      %31 = vector.broadcast %30 : vector<1x128x32xf32> to vector<6x128x32xf32>
      %32 = arith.mulf %29, %31 : vector<6x128x32xf32>
      %cst_25 = arith.constant -5.000000e-01 : f32
      %cst_26 = arith.constant 5.000000e-01 : f32
      %33 = vector.broadcast %cst_25 : f32 to vector<6x128x32xf32>
      %34 = arith.maximumf %33, %32 : vector<6x128x32xf32>
      %35 = vector.broadcast %cst_26 : f32 to vector<6x128x32xf32>
      %36 = arith.minimumf %35, %34 : vector<6x128x32xf32>
      %37 = arith.subf %32, %36 : vector<6x128x32xf32>
      %38 = vector.broadcast %15 : f32 to vector<6x128x32xf32>
      %39 = arith.mulf %38, %37 : vector<6x128x32xf32>
      %40 = vector.shape_cast %39 : vector<6x128x32xf32> to vector<768x32xf32>
      %41 = arith.truncf %40 : vector<768x32xf32> to vector<768x32xbf16>
      %42 = vector.shape_cast %28 : vector<768x32xf32> to vector<6x128x32xf32>
      %43 = vector.shape_cast %9 : vector<128x32xf32> to vector<1x128x32xf32>
      %44 = vector.broadcast %43 : vector<1x128x32xf32> to vector<6x128x32xf32>
      %45 = arith.mulf %42, %44 : vector<6x128x32xf32>
      %cst_27 = arith.constant -5.000000e-01 : f32
      %cst_28 = arith.constant 5.000000e-01 : f32
      %46 = vector.broadcast %cst_27 : f32 to vector<6x128x32xf32>
      %47 = arith.maximumf %46, %45 : vector<6x128x32xf32>
      %48 = vector.broadcast %cst_28 : f32 to vector<6x128x32xf32>
      %49 = arith.minimumf %48, %47 : vector<6x128x32xf32>
      %50 = arith.subf %45, %49 : vector<6x128x32xf32>
      %51 = vector.broadcast %17 : f32 to vector<6x128x32xf32>
      %52 = arith.mulf %51, %50 : vector<6x128x32xf32>
      %53 = vector.shape_cast %52 : vector<6x128x32xf32> to vector<768x32xf32>
      %54 = arith.truncf %53 : vector<768x32xf32> to vector<768x32xbf16>
      %cst_29 = arith.constant dense<0.000000e+00> : vector<768x32xf32>
      %55 = tpu.matmul %41, %6, %cst_29 {dimension_numbers = #tpu.dot_dimension_numbers<[1], [0], [0], [1], [0, 0, 1, 1], [], []>} : vector<768x32xbf16>, vector<32x32xbf16>, vector<768x32xf32> -> vector<768x32xf32>
      %56 = arith.truncf %55 : vector<768x32xf32> to vector<768x32xbf16>
      %57 = vector.shape_cast %56 : vector<768x32xbf16> to vector<6x128x32xbf16>
      %cst_30 = arith.constant dense<0.000000e+00> : vector<768x32xf32>
      %58 = tpu.matmul %54, %7, %cst_30 {dimension_numbers = #tpu.dot_dimension_numbers<[1], [0], [0], [1], [0, 0, 1, 1], [], []>} : vector<768x32xbf16>, vector<32x32xbf16>, vector<768x32xf32> -> vector<768x32xf32>
      %59 = arith.truncf %58 : vector<768x32xf32> to vector<768x32xbf16>
      %60 = vector.shape_cast %59 : vector<768x32xbf16> to vector<6x128x32xbf16>
      %61 = tpu.concatenate %57, %60 in 1 : vector<6x128x32xbf16>, vector<6x128x32xbf16> -> vector<6x256x32xbf16>
      %62 = tpu.transpose %61, [0, 2, 1] : vector<6x256x32xbf16> -> vector<6x32x256xbf16>
      %63 = vector.shape_cast %62 : vector<6x32x256xbf16> to vector<192x256xbf16>
      %cst_31 = arith.constant dense<0.000000e+00> : vector<192x128xf32>
      %64 = tpu.matmul %63, %3, %cst_31 {dimension_numbers = #tpu.dot_dimension_numbers<[1], [0], [0], [1], [0, 0, 1, 1], [], []>} : vector<192x256xbf16>, vector<256x128xbf16>, vector<192x128xf32> -> vector<192x128xf32>
      %cst_32 = arith.constant 1.000000e+00 : f32
      %65 = arith.subf %cst_32, %15 : f32
      %66 = arith.subf %65, %17 : f32
      %67 = vector.broadcast %66 : f32 to vector<192x128xf32>
      %68 = arith.mulf %67, %arg13 : vector<192x128xf32>
      %69 = arith.addf %68, %64 : vector<192x128xf32>
      scf.yield %69 : vector<192x128xf32>
    }
    %c5_i32_18 = arith.constant 5 : i32
    %12 = vector.shape_cast %11 : vector<192x128xf32> to vector<6x32x128xf32>
    %c0_19 = arith.constant 0 : index
    %c0_20 = arith.constant 0 : index
    %c0_21 = arith.constant 0 : index
    %13 = vector.load %arg11[%c0_19, %c0_20, %c0_21] : memref<6x32x128xf32, #tpu.memory_space<vmem>>, vector<6x32x128xf32>
    tpu.vector_store %arg11[%c0_19, %c0_20, %c0_21], %12 {strides = array<i32>} : memref<6x32x128xf32, #tpu.memory_space<vmem>>, vector<6x32x128xf32>,
    return
  }
  func.func @transform_0(%arg0: i32) -> (i32, i32) {
    %c0_i32 = arith.constant 0 : i32
    %c0_i32_0 = arith.constant 0 : i32
    %c0_i32_1 = arith.constant 0 : i32
    return %c0_i32, %c0_i32_0 : i32, i32
  }
  func.func @transform_1(%arg0: i32) -> (i32, i32, i32) {
    %c0_i32 = arith.constant 0 : i32
    %c0_i32_0 = arith.constant 0 : i32
    %c0_i32_1 = arith.constant 0 : i32
    return %arg0, %c0_i32, %c0_i32_0 : i32, i32, i32
  }
  func.func @transform_2(%arg0: i32) -> (i32, i32) {
    %c0_i32 = arith.constant 0 : i32
    %c0_i32_0 = arith.constant 0 : i32
    %c0_i32_1 = arith.constant 0 : i32
    return %c0_i32, %c0_i32_0 : i32, i32
  }
  func.func @transform_3(%arg0: i32) -> (i32, i32) {
    %c0_i32 = arith.constant 0 : i32
    %c0_i32_0 = arith.constant 0 : i32
    %c0_i32_1 = arith.constant 0 : i32
    return %c0_i32, %c0_i32_0 : i32, i32
  }
  func.func @transform_4(%arg0: i32) -> (i32, i32) {
    %c0_i32 = arith.constant 0 : i32
    %c0_i32_0 = arith.constant 0 : i32
    %c0_i32_1 = arith.constant 0 : i32
    return %c0_i32, %c0_i32_0 : i32, i32
  }
  func.func @transform_5(%arg0: i32) -> (i32, i32) {
    %c0_i32 = arith.constant 0 : i32
    %c0_i32_0 = arith.constant 0 : i32
    %c0_i32_1 = arith.constant 0 : i32
    return %c0_i32, %c0_i32_0 : i32, i32
  }
  func.func @transform_6(%arg0: i32) -> (i32, i32) {
    %c0_i32 = arith.constant 0 : i32
    %c0_i32_0 = arith.constant 0 : i32
    %c0_i32_1 = arith.constant 0 : i32
    return %c0_i32, %c0_i32_0 : i32, i32
  }
  func.func @transform_7(%arg0: i32) -> (i32, i32) {
    %c0_i32 = arith.constant 0 : i32
    %c0_i32_0 = arith.constant 0 : i32
    %c0_i32_1 = arith.constant 0 : i32
    return %c0_i32, %c0_i32_0 : i32, i32
  }
  func.func @transform_8(%arg0: i32) -> (i32, i32) {
    %c0_i32 = arith.constant 0 : i32
    %c0_i32_0 = arith.constant 0 : i32
    %c0_i32_1 = arith.constant 0 : i32
    return %c0_i32, %c0_i32_0 : i32, i32
  }
  func.func @transform_9(%arg0: i32) -> (i32, i32) {
    %c0_i32 = arith.constant 0 : i32
    %c0_i32_0 = arith.constant 0 : i32
    %c0_i32_1 = arith.constant 0 : i32
    return %c0_i32, %c0_i32_0 : i32, i32
  }
  func.func @transform_10(%arg0: i32) -> (i32, i32, i32) {
    %c0_i32 = arith.constant 0 : i32
    %c0_i32_0 = arith.constant 0 : i32
    %c0_i32_1 = arith.constant 0 : i32
    return %arg0, %c0_i32, %c0_i32_0 : i32, i32, i32
  }
}

</mosaic_0001>

<bundles_post_ra>
// kernel: tpu_custom_call.1
= control target key start
LH: loop header
LB: loop body
LE: loop exit
PB: predicated region body
PF: predicated region fallthrough
CT: control target
= control target key end

     0   :  { %15 = vsyncpa [#allocation5], 0  ;;  %s8421_s0 = inlined_call_operand.vmem [shape: f32[5,2], index: 0, kind: input, shape index: {}]   ;;  %s8422_s1 = inlined_call_operand.vmem [shape: f32[6,32,128], index: 1, kind: input, shape index: {}]   ;;  %s8423_s2 = inlined_call_operand.vmem [shape: f32[128,32], index: 2, kind: input, shape index: {}]   ;;  %s8424_s3 = inlined_call_operand.vmem [shape: f32[128,32], index: 3, kind: input, shape index: {}]   ;;  %s8425_s4 = inlined_call_operand.vmem [shape: bf16[128,256], index: 4, kind: input, shape index: {}]   ;;  %s8426_s5 = inlined_call_operand.hbm [shape: bf16[256,128], index: 5, kind: input, shape index: {}]   ;;  %s8427_s6 = inlined_call_operand.vmem [shape: bf16[32,32], index: 6, kind: input, shape index: {}]   ;;  %s8428_s7 = inlined_call_operand.hbm [shape: bf16[32,32], index: 7, kind: input, shape index: {}]   ;;  %s8429_s8 = inlined_call_operand.hbm [shape: bf16[32,32], index: 8, kind: input, shape index: {}]   ;;  %s8430_s9 = inlined_call_operand.hbm [shape: bf16[32,32], index: 9, kind: input, shape index: {}]   ;;  %s8431_s10 = inlined_call_operand.hbm [shape: f32[6,32,128], index: 10, kind: output, shape index: {}]  }
   0x1   :  { %16 = vsyncpa [#allocation3], 0 }
   0x2   :  { %17 = vsyncpa [#allocation8], 0 }
   0x3   :  { %18 = vsyncpa [#allocation11], 0 }
   0x4   :  { %19 = vsyncpa [#allocation4], 0  ;;  %s26_s15 = sshll.u32 %s8421_s0, 4  ;;  %s6406_s16 = smov [#allocation7]   ;;  %s27_s15 = int_to_ptr.vmem [resolvable:$true] %s26_s15 }
   0x5   :  { %s57_s17 = sshll.u32 %s6406_s16, 4  ;;  %s58_s17 = int_to_ptr.vmem [resolvable:$true] %s57_s17 }
   0x6   :  { %s6092_s18 = scalar_lea.vmem %s58_s17, 256  ;;  %p6097_p1 = scmp.lt.s32.totalorder %s58_s17, %s58_s17 }
   0x7   :  { %p6093_p0 = scmp.ne.s32.totalorder %s58_s17, %s6092_s18  ;;  %p6098_p2 = scmp.lt.s32.totalorder %s6092_s18, %s6092_s18 }
   0x9   :  { %p6099_p3 = por %p6098_p2, %p6097_p1 }
   0xb   :  { %p6100_p4 = pnand %p6099_p3, %p6093_p0 }
   0xd   :  { %6103 = shalt.err (!%p6100_p4)
}
   0xe   :  { %s6407_s19 = smov 64   ;;  %s6408_s20 = smov 4  }
   0xf   :  { %63 = dma.hbm_to_vmem [thread:$0]  %s8428_s7, 256, %s58_s17, [#allocation8], %s6407_s19, %s6407_s19, %s6408_s20  }
  0x10   :  { %s6104_s0 = scalar_lea.vmem %s27_s15, 128  ;;  %p6109_p6 = scmp.lt.s32.totalorder %s27_s15, %s27_s15 }
  0x11   :  { %p6105_p5 = scmp.ne.s32.totalorder %s27_s15, %s6104_s0  ;;  %p6110_p7 = scmp.lt.s32.totalorder %s6104_s0, %s6104_s0 }
  0x13   :  { %p6111_p8 = por %p6110_p7, %p6109_p6 }
  0x15   :  { %p6112_p9 = pnand %p6111_p8, %p6105_p5 }
  0x17   :  { %6115 = shalt.err (!%p6112_p9)
}
  0x18   :  { %s6409_s23 = smov [#allocation2]   ;;  %s6410_s24 = smov [#allocation6]  }
  0x19   :  { %29 = dma.vmem_to_smem %s27_s15, 128, %s6409_s23, [#allocation5]  }
  0x1a   :  { %s43_s25 = sshll.u32 %s6410_s24, 4  ;;  %s6411_s26 = smov [#allocation9]   ;;  %s44_s25 = int_to_ptr.vmem [resolvable:$true] %s43_s25 }
  0x1b   :  { %s69_s27 = sshll.u32 %s6411_s26, 4  ;;  %s6124_s28 = scalar_lea.vmem %s44_s25, 2048  ;;  %s70_s27 = int_to_ptr.vmem [resolvable:$true] %s69_s27 }
  0x1c   :  { %p6125_p10 = scmp.ne.s32.totalorder %s44_s25, %s6124_s28  ;;  %p6129_p11 = scmp.lt.s32.totalorder %s44_s25, %s44_s25 }
  0x1d   :  { %p6130_p12 = scmp.lt.s32.totalorder %s6124_s28, %s6124_s28 }
  0x1f   :  { %p6131_p13 = por %p6130_p12, %p6129_p11 }
  0x21   :  { %p6132_p0 = pnand %p6131_p13, %p6125_p10 }
  0x23   :  { %6135 = shalt.err (!%p6132_p0)
}
  0x24   :  { %49 = dma.hbm_to_vmem [thread:$0]  %s8426_s5, 2048, %s44_s25, [#allocation3], %s6407_s19, %s6407_s19, %s6408_s20  }
  0x25   :  { %s6144_s30 = scalar_lea.vmem %s70_s27, 256  ;;  %p6149_p2 = scmp.lt.s32.totalorder %s70_s27, %s70_s27 }
  0x26   :  { %p6145_p1 = scmp.ne.s32.totalorder %s70_s27, %s6144_s30  ;;  %p6150_p3 = scmp.lt.s32.totalorder %s6144_s30, %s6144_s30 }
  0x28   :  { %p6151_p4 = por %p6150_p3, %p6149_p2 }
  0x2a   :  { %p6152_p5 = pnand %p6151_p4, %p6145_p1 }
  0x2c   :  { %6155 = shalt.err (!%p6152_p5)
}
  0x2d   :  { %75 = dma.hbm_to_vmem [thread:$0]  %s8429_s8, 256, %s70_s27, [#allocation8], %s6407_s19, %s6407_s19, %s6408_s20  }
  0x2e   :  { %s6412_s13 = smov [#allocation10]  }
  0x2f   :  { %s81_s14 = sshll.u32 %s6412_s13, 4  ;;  %s82_s14 = int_to_ptr.vmem [resolvable:$true] %s81_s14 }
  0x30   :  { %s6164_s15 = scalar_lea.vmem %s82_s14, 256  ;;  %p6169_p7 = scmp.lt.s32.totalorder %s82_s14, %s82_s14 }
  0x31   :  { %p6165_p6 = scmp.ne.s32.totalorder %s82_s14, %s6164_s15  ;;  %p6170_p8 = scmp.lt.s32.totalorder %s6164_s15, %s6164_s15 }
  0x33   :  { %p6171_p9 = por %p6170_p8, %p6169_p7 }
  0x35   :  { %p6172_p10 = pnand %p6171_p9, %p6165_p6 }
  0x37   :  { %6175 = shalt.err (!%p6172_p10)
}
  0x38   :  { %87 = dma.hbm_to_vmem [thread:$0]  %s8430_s9, 256, %s82_s14, [#allocation11], %s6407_s19, %s6407_s19, %s6408_s20  }
  0x39   :  { %6296 = dma.done.wait [#allocation5], 128  }
  0x3a   :  { %6297 = vsyncadd [#allocation5], 4294967168 }
  0x3b   :  { %6298 = dma.done.wait [#allocation3], 2048  }
  0x3c   :  { %6299 = vsyncadd [#allocation3], 4294965248 }
  0x3d   :  { %6300 = dma.done.wait [#allocation8], 512  }
  0x3e   :  { %6301 = vsyncadd [#allocation8], 4294966784 }
  0x3f   :  { %6302 = dma.done.wait [#allocation11], 256  }
  0x40   :  { %6303 = vsyncadd [#allocation11], 4294967040 }
  0x41   :  { %103 = sfence }
  0x42   :  { %v6502_v0 = vld [vmem:[%s8422_s1] sm:$0xff]   ;;  %v6507_v1 = vld [vmem:[%s8422_s1 + $0x8] sm:$0xff]   ;;  %v6512_v2 = vld [vmem:[%s8422_s1 + $0x10] sm:$0xff]  }
  0x43   :  { %v6517_v3 = vld [vmem:[%s8422_s1 + $0x18] sm:$0xff]   ;;  %v6522_v4 = vld [vmem:[%s8422_s1 + $0x20] sm:$0xff]   ;;  %v6527_v5 = vld [vmem:[%s8422_s1 + $0x28] sm:$0xff]  }
  0x44   :  { %v6532_v6 = vld [vmem:[%s8422_s1 + $0x30] sm:$0xff]   ;;  %v6537_v7 = vld [vmem:[%s8422_s1 + $0x38] sm:$0xff]   ;;  %v6542_v8 = vld [vmem:[%s8422_s1 + $0x40] sm:$0xff]  }
  0x45   :  { %v6547_v9 = vld [vmem:[%s8422_s1 + $0x48] sm:$0xff]   ;;  %v6552_v10 = vld [vmem:[%s8422_s1 + $0x50] sm:$0xff]   ;;  %v6557_v11 = vld [vmem:[%s8422_s1 + $0x58] sm:$0xff]  }
  0x46   :  { %v6562_v12 = vld [vmem:[%s8422_s1 + $0x60] sm:$0xff]   ;;  %v6567_v13 = vld [vmem:[%s8422_s1 + $0x68] sm:$0xff]   ;;  %v6572_v14 = vld [vmem:[%s8422_s1 + $0x70] sm:$0xff]  }
  0x47   :  { %v6577_v15 = vld [vmem:[%s8422_s1 + $0x78] sm:$0xff]   ;;  %v6582_v16 = vld [vmem:[%s8422_s1 + $0x80] sm:$0xff]   ;;  %v6587_v17 = vld [vmem:[%s8422_s1 + $0x88] sm:$0xff]  }
  0x48   :  { %v6592_v18 = vld [vmem:[%s8422_s1 + $0x90] sm:$0xff]   ;;  %v6597_v19 = vld [vmem:[%s8422_s1 + $0x98] sm:$0xff]   ;;  %v6602_v20 = vld [vmem:[%s8422_s1 + $0xa0] sm:$0xff]  }
  0x49   :  { %v6607_v21 = vld [vmem:[%s8422_s1 + $0xa8] sm:$0xff]   ;;  %v6612_v22 = vld [vmem:[%s8422_s1 + $0xb0] sm:$0xff]   ;;  %v6617_v23 = vld [vmem:[%s8422_s1 + $0xb8] sm:$0xff]  }
  0x4a   :  { %v6622_v24 = vld [vmem:[%s8425_s4] sm:$0xff]  ;;  %v6627_v25 = vld [vmem:[%s8425_s4 + $0x8] sm:$0xff]  ;;  %v6632_v26 = vld [vmem:[%s8425_s4 + $0x10] sm:$0xff] }
  0x4b   :  { %8540 = vst [vmem:[#allocation18_spill] sm:$0xff] %v6622_v24  ;;  %8541 = vst [vmem:[#allocation19_spill] sm:$0xff] %v6627_v25  ;;  %v6637_v27 = vld [vmem:[%s8425_s4 + $0x18] sm:$0xff]  ;;  %v6642_v28 = vld [vmem:[%s8425_s4 + $0x20] sm:$0xff] }
  0x4c   :  { %8542 = vst [vmem:[#allocation20_spill] sm:$0xff] %v6632_v26  ;;  %8543 = vst [vmem:[#allocation21_spill] sm:$0xff] %v6637_v27  ;;  %v6647_v29 = vld [vmem:[%s8425_s4 + $0x28] sm:$0xff]  ;;  %v6652_v30 = vld [vmem:[%s8425_s4 + $0x30] sm:$0xff] }
  0x4d   :  { %8544 = vst [vmem:[#allocation22_spill] sm:$0xff] %v6642_v28  ;;  %8545 = vst [vmem:[#allocation23_spill] sm:$0xff] %v6647_v29  ;;  %v6657_v31 = vld [vmem:[%s8425_s4 + $0x38] sm:$0xff]  ;;  %v6662_v32 = vld [vmem:[%s8425_s4 + $0x40] sm:$0xff] }
  0x4e   :  { %8546 = vst [vmem:[#allocation24_spill] sm:$0xff] %v6652_v30  ;;  %8547 = vst [vmem:[#allocation25_spill] sm:$0xff] %v6657_v31  ;;  %v6667_v33 = vld [vmem:[%s8425_s4 + $0x48] sm:$0xff]  ;;  %v6672_v34 = vld [vmem:[%s8425_s4 + $0x50] sm:$0xff] }
  0x4f   :  { %8548 = vst [vmem:[#allocation26_spill] sm:$0xff] %v6662_v32  ;;  %8549 = vst [vmem:[#allocation27_spill] sm:$0xff] %v6667_v33  ;;  %v6677_v35 = vld [vmem:[%s8425_s4 + $0x58] sm:$0xff]  ;;  %v6682_v36 = vld [vmem:[%s8425_s4 + $0x60] sm:$0xff] }
  0x50   :  { %8550 = vst [vmem:[#allocation28_spill] sm:$0xff] %v6672_v34  ;;  %8551 = vst [vmem:[#allocation29_spill] sm:$0xff] %v6677_v35  ;;  %v6687_v37 = vld [vmem:[%s8425_s4 + $0x68] sm:$0xff]  ;;  %v6692_v38 = vld [vmem:[%s8425_s4 + $0x70] sm:$0xff] }
  0x51   :  { %8552 = vst [vmem:[#allocation30_spill] sm:$0xff] %v6682_v36  ;;  %8553 = vst [vmem:[#allocation31_spill] sm:$0xff] %v6687_v37  ;;  %v6697_v39 = vld [vmem:[%s8425_s4 + $0x78] sm:$0xff]  ;;  %v6699_v40 = vld [vmem:[#allocation6] sm:$0xf] }
  0x52   :  { %8554 = vst [vmem:[#allocation32_spill] sm:$0xff] %v6692_v38  ;;  %8555 = vst [vmem:[#allocation33_spill] sm:$0xff] %v6697_v39  ;;  %v6701_v41 = vld [vmem:[#allocation6 + $0x4] sm:$0xf]  ;;  %v6703_v42 = vld [vmem:[#allocation6 + $0x8] sm:$0xf] }
  0x53   :  { %8556 = vst [vmem:[#allocation34_spill] sm:$0xff] %v6699_v40  ;;  %8557 = vst [vmem:[#allocation35_spill] sm:$0xff] %v6701_v41  ;;  %v6705_v43 = vld [vmem:[#allocation6 + $0xc] sm:$0xf]  ;;  %v6707_v44 = vld [vmem:[#allocation6 + $0x10] sm:$0xf] }
  0x54   :  { %8558 = vst [vmem:[#allocation36_spill] sm:$0xff] %v6703_v42  ;;  %8559 = vst [vmem:[#allocation37_spill] sm:$0xff] %v6705_v43  ;;  %v6709_v45 = vld [vmem:[#allocation6 + $0x14] sm:$0xf]  ;;  %v6711_v46 = vld [vmem:[#allocation6 + $0x18] sm:$0xf] }
  0x55   :  { %8560 = vst [vmem:[#allocation38_spill] sm:$0xff] %v6707_v44  ;;  %8561 = vst [vmem:[#allocation39_spill] sm:$0xff] %v6709_v45  ;;  %v6713_v47 = vld [vmem:[#allocation6 + $0x1c] sm:$0xf]  ;;  %v6715_v48 = vld [vmem:[#allocation6 + $0x20] sm:$0xf] }
  0x56   :  { %8562 = vst [vmem:[#allocation40_spill] sm:$0xff] %v6711_v46  ;;  %8563 = vst [vmem:[#allocation41_spill] sm:$0xff] %v6713_v47  ;;  %v6717_v49 = vld [vmem:[#allocation6 + $0x24] sm:$0xf]  ;;  %v6719_v50 = vld [vmem:[#allocation6 + $0x28] sm:$0xf] }
  0x57   :  { %8564 = vst [vmem:[#allocation42_spill] sm:$0xff] %v6715_v48  ;;  %8565 = vst [vmem:[#allocation43_spill] sm:$0xff] %v6717_v49  ;;  %v6721_v51 = vld [vmem:[#allocation6 + $0x2c] sm:$0xf]  ;;  %v6723_v52 = vld [vmem:[#allocation6 + $0x30] sm:$0xf] }
  0x58   :  { %8566 = vst [vmem:[#allocation44_spill] sm:$0xff] %v6719_v50  ;;  %8567 = vst [vmem:[#allocation45_spill] sm:$0xff] %v6721_v51  ;;  %v6725_v53 = vld [vmem:[#allocation6 + $0x34] sm:$0xf]  ;;  %v6727_v54 = vld [vmem:[#allocation6 + $0x38] sm:$0xf] }
  0x59   :  { %8568 = vst [vmem:[#allocation46_spill] sm:$0xff] %v6723_v52  ;;  %8569 = vst [vmem:[#allocation47_spill] sm:$0xff] %v6725_v53  ;;  %v6729_v55 = vld [vmem:[#allocation6 + $0x3c] sm:$0xf]  ;;  %v6731_v56 = vld [vmem:[#allocation6 + $0x40] sm:$0xf] }
  0x5a   :  { %8570 = vst [vmem:[#allocation48_spill] sm:$0xff] %v6727_v54  ;;  %8571 = vst [vmem:[#allocation49_spill] sm:$0xff] %v6729_v55  ;;  %v6733_v57 = vld [vmem:[#allocation6 + $0x44] sm:$0xf]  ;;  %v6735_v58 = vld [vmem:[#allocation6 + $0x48] sm:$0xf] }
  0x5b   :  { %8572 = vst [vmem:[#allocation50_spill] sm:$0xff] %v6731_v56  ;;  %8573 = vst [vmem:[#allocation51_spill] sm:$0xff] %v6733_v57  ;;  %v6737_v59 = vld [vmem:[#allocation6 + $0x4c] sm:$0xf]  ;;  %v6739_v60 = vld [vmem:[#allocation6 + $0x50] sm:$0xf] }
  0x5c   :  { %8574 = vst [vmem:[#allocation52_spill] sm:$0xff] %v6735_v58  ;;  %8575 = vst [vmem:[#allocation53_spill] sm:$0xff] %v6737_v59  ;;  %v6741_v61 = vld [vmem:[#allocation6 + $0x54] sm:$0xf]  ;;  %v6743_v62 = vld [vmem:[#allocation6 + $0x58] sm:$0xf] }
  0x5d   :  { %8576 = vst [vmem:[#allocation54_spill] sm:$0xff] %v6739_v60  ;;  %8577 = vst [vmem:[#allocation55_spill] sm:$0xff] %v6741_v61  ;;  %v6745_v63 = vld [vmem:[#allocation6 + $0x5c] sm:$0xf]  ;;  %v6747_v40 = vld [vmem:[#allocation6 + $0x60] sm:$0xf] }
  0x5e   :  { %8578 = vst [vmem:[#allocation56_spill] sm:$0xff] %v6743_v62  ;;  %8579 = vst [vmem:[#allocation57_spill] sm:$0xff] %v6745_v63  ;;  %v6749_v41 = vld [vmem:[#allocation6 + $0x64] sm:$0xf]  ;;  %v6751_v42 = vld [vmem:[#allocation6 + $0x68] sm:$0xf] }
  0x5f   :  { %8580 = vst [vmem:[#allocation58_spill] sm:$0xff] %v6747_v40  ;;  %8581 = vst [vmem:[#allocation59_spill] sm:$0xff] %v6749_v41  ;;  %v6753_v56 = vld [vmem:[#allocation6 + $0x6c] sm:$0xf]  ;;  %v6755_v57 = vld [vmem:[#allocation6 + $0x70] sm:$0xf] }
  0x60   :  { %8582 = vst [vmem:[#allocation60_spill] sm:$0xff] %v6751_v42  ;;  %8583 = vst [vmem:[#allocation61_spill] sm:$0xff] %v6753_v56  ;;  %v6757_v43 = vld [vmem:[#allocation6 + $0x74] sm:$0xf]  ;;  %v6759_v58 = vld [vmem:[#allocation6 + $0x78] sm:$0xf] }
  0x61   :  { %8584 = vst [vmem:[#allocation62_spill] sm:$0xff] %v6755_v57  ;;  %8585 = vst [vmem:[#allocation63_spill] sm:$0xff] %v6757_v43  ;;  %v6761_v59 = vld [vmem:[#allocation6 + $0x7c] sm:$0xf]  ;;  %v6766_v44 = vld [vmem:[%s8427_s6] sm:$0xf] }
  0x62   :  { %8586 = vst [vmem:[#allocation64_spill] sm:$0xff] %v6759_v58  ;;  %8587 = vst [vmem:[#allocation65_spill] sm:$0xff] %v6761_v59  ;;  %v6771_v45 = vld [vmem:[%s8427_s6 + $0x4] sm:$0xf]  ;;  %v6776_v60 = vld [vmem:[%s8427_s6 + $0x8] sm:$0xf] }
  0x63   :  { %8588 = vst [vmem:[#allocation66_spill] sm:$0xff] %v6766_v44  ;;  %8589 = vst [vmem:[#allocation67_spill] sm:$0xff] %v6771_v45  ;;  %v6781_v61 = vld [vmem:[%s8427_s6 + $0xc] sm:$0xf]  ;;  %v6783_v46 = vld [vmem:[#allocation7] sm:$0xf] }
  0x64   :  { %8590 = vst [vmem:[#allocation68_spill] sm:$0xff] %v6776_v60  ;;  %8591 = vst [vmem:[#allocation69_spill] sm:$0xff] %v6781_v61  ;;  %v6785_v47 = vld [vmem:[#allocation7 + $0x4] sm:$0xf]  ;;  %v6787_v62 = vld [vmem:[#allocation7 + $0x8] sm:$0xf] }
  0x65   :  { %8592 = vst [vmem:[#allocation70_spill] sm:$0xff] %v6783_v46  ;;  %8593 = vst [vmem:[#allocation71_spill] sm:$0xff] %v6785_v47  ;;  %v6789_v63 = vld [vmem:[#allocation7 + $0xc] sm:$0xf]  ;;  %v6791_v48 = vld [vmem:[#allocation9] sm:$0xf] }
  0x66   :  { %8594 = vst [vmem:[#allocation72_spill] sm:$0xff] %v6787_v62  ;;  %8595 = vst [vmem:[#allocation73_spill] sm:$0xff] %v6789_v63  ;;  %v6793_v49 = vld [vmem:[#allocation9 + $0x4] sm:$0xf]  ;;  %v6795_v40 = vld [vmem:[#allocation9 + $0x8] sm:$0xf] }
  0x67   :  { %8596 = vst [vmem:[#allocation74_spill] sm:$0xff] %v6791_v48  ;;  %8597 = vst [vmem:[#allocation75_spill] sm:$0xff] %v6793_v49  ;;  %v6797_v41 = vld [vmem:[#allocation9 + $0xc] sm:$0xf]  ;;  %v6799_v50 = vld [vmem:[#allocation10] sm:$0xf] }
  0x68   :  { %8598 = vst [vmem:[#allocation76_spill] sm:$0xff] %v6795_v40  ;;  %8599 = vst [vmem:[#allocation77_spill] sm:$0xff] %v6797_v41  ;;  %v6801_v51 = vld [vmem:[#allocation10 + $0x4] sm:$0xf]  ;;  %v6803_v42 = vld [vmem:[#allocation10 + $0x8] sm:$0xf] }
  0x69   :  { %8600 = vst [vmem:[#allocation78_spill] sm:$0xff] %v6799_v50  ;;  %8601 = vst [vmem:[#allocation79_spill] sm:$0xff] %v6801_v51  ;;  %v6805_v56 = vld [vmem:[#allocation10 + $0xc] sm:$0xf]  ;;  %v6810_v52 = vld [vmem:[%s8423_s2] sm:$0xff] }
  0x6a   :  { %8602 = vst [vmem:[#allocation80_spill] sm:$0xff] %v6803_v42  ;;  %8603 = vst [vmem:[#allocation81_spill] sm:$0xff] %v6805_v56  ;;  %v6815_v53 = vld [vmem:[%s8423_s2 + $0x8] sm:$0xff]  ;;  %v6820_v57 = vld [vmem:[%s8423_s2 + $0x10] sm:$0xff] }
  0x6b   :  { %8604 = vst [vmem:[#allocation82_spill] sm:$0xff] %v6810_v52  ;;  %8605 = vst [vmem:[#allocation83_spill] sm:$0xff] %v6815_v53  ;;  %v6825_v43 = vld [vmem:[%s8423_s2 + $0x18] sm:$0xff]  ;;  %v6830_v54 = vld [vmem:[%s8423_s2 + $0x20] sm:$0xff] }
  0x6c   :  { %8606 = vst [vmem:[#allocation84_spill] sm:$0xff] %v6820_v57  ;;  %8607 = vst [vmem:[#allocation85_spill] sm:$0xff] %v6825_v43  ;;  %v6835_v55 = vld [vmem:[%s8423_s2 + $0x28] sm:$0xff]  ;;  %v6840_v58 = vld [vmem:[%s8423_s2 + $0x30] sm:$0xff] }
  0x6d   :  { %8608 = vst [vmem:[#allocation86_spill] sm:$0xff] %v6830_v54  ;;  %8609 = vst [vmem:[#allocation87_spill] sm:$0xff] %v6835_v55  ;;  %v6845_v59 = vld [vmem:[%s8423_s2 + $0x38] sm:$0xff]  ;;  %v6850_v53 = vld [vmem:[%s8423_s2 + $0x40] sm:$0xff] }
  0x6e   :  { %8610 = vst [vmem:[#allocation88_spill] sm:$0xff] %v6840_v58  ;;  %8611 = vst [vmem:[#allocation89_spill] sm:$0xff] %v6845_v59  ;;  %v6855_v54 = vld [vmem:[%s8423_s2 + $0x48] sm:$0xff]  ;;  %v6860_v55 = vld [vmem:[%s8423_s2 + $0x50] sm:$0xff] }
  0x6f   :  { %8612 = vst [vmem:[#allocation90_spill] sm:$0xff] %v6850_v53  ;;  %8613 = vst [vmem:[#allocation91_spill] sm:$0xff] %v6855_v54  ;;  %v6865_v58 = vld [vmem:[%s8423_s2 + $0x58] sm:$0xff]  ;;  %v6870_v59 = vld [vmem:[%s8423_s2 + $0x60] sm:$0xff] }
  0x70   :  { %8614 = vst [vmem:[#allocation92_spill] sm:$0xff] %v6860_v55  ;;  %8615 = vst [vmem:[#allocation93_spill] sm:$0xff] %v6865_v58  ;;  %v6875_v53 = vld [vmem:[%s8423_s2 + $0x68] sm:$0xff]  ;;  %v6880_v54 = vld [vmem:[%s8423_s2 + $0x70] sm:$0xff] }
  0x71   :  { %8616 = vst [vmem:[#allocation94_spill] sm:$0xff] %v6870_v59  ;;  %8617 = vst [vmem:[#allocation95_spill] sm:$0xff] %v6875_v53  ;;  %v6885_v55 = vld [vmem:[%s8423_s2 + $0x78] sm:$0xff]  ;;  %v6890_v58 = vld [vmem:[%s8424_s3] sm:$0xff] }
  0x72   :  { %8618 = vst [vmem:[#allocation96_spill] sm:$0xff] %v6880_v54  ;;  %8619 = vst [vmem:[#allocation97_spill] sm:$0xff] %v6885_v55  ;;  %v6895_v59 = vld [vmem:[%s8424_s3 + $0x8] sm:$0xff]  ;;  %v6900_v53 = vld [vmem:[%s8424_s3 + $0x10] sm:$0xff] }
  0x73   :  { %8620 = vst [vmem:[#allocation98_spill] sm:$0xff] %v6890_v58  ;;  %8621 = vst [vmem:[#allocation99_spill] sm:$0xff] %v6895_v59  ;;  %v6905_v54 = vld [vmem:[%s8424_s3 + $0x18] sm:$0xff]  ;;  %v6910_v55 = vld [vmem:[%s8424_s3 + $0x20] sm:$0xff] }
  0x74   :  { %8622 = vst [vmem:[#allocation100_spill] sm:$0xff] %v6900_v53  ;;  %8623 = vst [vmem:[#allocation101_spill] sm:$0xff] %v6905_v54  ;;  %v6915_v58 = vld [vmem:[%s8424_s3 + $0x28] sm:$0xff]  ;;  %v6920_v59 = vld [vmem:[%s8424_s3 + $0x30] sm:$0xff] }
  0x75   :  { %8624 = vst [vmem:[#allocation102_spill] sm:$0xff] %v6910_v55  ;;  %8625 = vst [vmem:[#allocation103_spill] sm:$0xff] %v6915_v58  ;;  %v6925_v43 = vld [vmem:[%s8424_s3 + $0x38] sm:$0xff]  ;;  %v6930_v54 = vld [vmem:[%s8424_s3 + $0x40] sm:$0xff] }
  0x76   :  { %8626 = vst [vmem:[#allocation104_spill] sm:$0xff] %v6920_v59  ;;  %8627 = vst [vmem:[#allocation105_spill] sm:$0xff] %v6925_v43  ;;  %v6935_v55 = vld [vmem:[%s8424_s3 + $0x48] sm:$0xff]  ;;  %v6940_v58 = vld [vmem:[%s8424_s3 + $0x50] sm:$0xff] }
  0x77   :  { %8628 = vst [vmem:[#allocation106_spill] sm:$0xff] %v6930_v54  ;;  %8629 = vst [vmem:[#allocation107_spill] sm:$0xff] %v6935_v55  ;;  %v6945_v59 = vld [vmem:[%s8424_s3 + $0x58] sm:$0xff]  ;;  %v6950_v43 = vld [vmem:[%s8424_s3 + $0x60] sm:$0xff] }
  0x78   :  { %8630 = vst [vmem:[#allocation108_spill] sm:$0xff] %v6940_v58  ;;  %8631 = vst [vmem:[#allocation109_spill] sm:$0xff] %v6945_v59  ;;  %v6955_v54 = vld [vmem:[%s8424_s3 + $0x68] sm:$0xff]  ;;  %v6960_v55 = vld [vmem:[%s8424_s3 + $0x70] sm:$0xff] }
  0x79   :  { %8632 = vst [vmem:[#allocation110_spill] sm:$0xff] %v6950_v43  ;;  %8633 = vst [vmem:[#allocation111_spill] sm:$0xff] %v6955_v54  ;;  %v6965_v58 = vld [vmem:[%s8424_s3 + $0x78] sm:$0xff]  ;;  %s7039_s3 = smov 0  }
  0x7a   :  { %8634 = vst [vmem:[#allocation112_spill] sm:$0xff] %v6960_v55  ;;  %8635 = vst [vmem:[#allocation113_spill] sm:$0xff] %v6965_v58 }
  0x7b LB: > { %v8636_v57 = vld [vmem:[#allocation84_spill] sm:$0xff]  ;;  %v8637_v39 = vld [vmem:[#allocation33_spill] sm:$0xff]  ;;  %v8638_v37 = vld [vmem:[#allocation31_spill] sm:$0xff]  ;;  %8653 = vst [vmem:[#allocation114_spill] sm:$0xff] %v6308_v23  ;;  %v6413_v53 = vmov 0   ;;  %vm732_vm0 = vcmask 261120   ;;  %v6372_v7 = vphi %v6537_v7, %v8912_v7   ;;  %v6368_v8 = vphi %v6542_v8, %v8911_v8   ;;  %v6364_v9 = vphi %v6547_v9, %v8910_v9   ;;  %v6360_v10 = vphi %v6552_v10, %v8909_v10   ;;  %v6356_v11 = vphi %v6557_v11, %v8908_v11   ;;  %v6352_v12 = vphi %v6562_v12, %v8907_v12   ;;  %v6348_v13 = vphi %v6567_v13, %v8906_v13   ;;  %v6344_v14 = vphi %v6572_v14, %v8905_v14   ;;  %v6340_v15 = vphi %v6577_v15, %v8904_v15   ;;  %v6336_v16 = vphi %v6582_v16, %v8903_v16   ;;  %v6332_v17 = vphi %v6587_v17, %v8902_v17   ;;  %v6328_v18 = vphi %v6592_v18, %v8901_v18   ;;  %v6324_v19 = vphi %v6597_v19, %v8900_v19   ;;  %v6320_v20 = vphi %v6602_v20, %v8899_v20   ;;  %v6316_v21 = vphi %v6607_v21, %v8898_v21   ;;  %v6312_v22 = vphi %v6612_v22, %v8897_v22   ;;  %v6308_v23 = vphi %v6617_v23, %v8896_v23   ;;  %s6404_s3 = sphi %s7039_s3, %s230_s3   ;;  %v6400_v0 = vphi %v6502_v0, %v8919_v0   ;;  %v6396_v1 = vphi %v6507_v1, %v8918_v1   ;;  %v6392_v2 = vphi %v6512_v2, %v8917_v2   ;;  %v6388_v3 = vphi %v6517_v3, %v8916_v3   ;;  %v6384_v4 = vphi %v6522_v4, %v8915_v4   ;;  %v6380_v5 = vphi %v6527_v5, %v8914_v5   ;;  %v6376_v6 = vphi %v6532_v6, %v8913_v6  }
  0x7c   : > { %v8639_v36 = vld [vmem:[#allocation30_spill] sm:$0xff]  ;;  %v8640_v35 = vld [vmem:[#allocation29_spill] sm:$0xff]  ;;  %v8641_v34 = vld [vmem:[#allocation28_spill] sm:$0xff]  ;;  %8654 = vst [vmem:[#allocation115_spill] sm:$0xff] %v6312_v22  ;;  %383 = vmatprep.mubr.bf16.mxu0 %v6413_v53  ;;  %s4756_s29 = sshll.u32 %s6404_s3, 7  ;;  %s230_s3 = sadd.s32 1, %s6404_s3  }
  0x7d   : > { %v8642_v33 = vld [vmem:[#allocation27_spill] sm:$0xff]  ;;  %v8643_v32 = vld [vmem:[#allocation26_spill] sm:$0xff]  ;;  %v8644_v31 = vld [vmem:[#allocation25_spill] sm:$0xff]  ;;  %8655 = vst [vmem:[#allocation116_spill] sm:$0xff] %v6316_v21  ;;  %v4770_v43 = vcombine.high %v8639_v36, %v8638_v37  ;;  %v4769_v55 = vcombine.low %v8639_v36, %v8638_v37  ;;  %v4768_v59 = vcombine.high %v8641_v34, %v8640_v35  ;;  %v4767_v52 = vcombine.low %v8641_v34, %v8640_v35  ;;  %s257_s30 = sadd.s32 1, %s4756_s29  ;;  %s7303_s11 = sld [smem:[#allocation2 + %s4756_s29]] }
  0x7e   : > { %v8645_v30 = vld [vmem:[#allocation24_spill] sm:$0xff]  ;;  %v8646_v29 = vld [vmem:[#allocation23_spill] sm:$0xff]  ;;  %v8647_v28 = vld [vmem:[#allocation22_spill] sm:$0xff]  ;;  %8656 = vst [vmem:[#allocation117_spill] sm:$0xff] %v6320_v20  ;;  %s7306_s12 = sld [smem:[#allocation2 + %s257_s30]]  ;;  %p8322_p11 = scmp.ge.s32.totalorder %s230_s3, 5  }
  0x7f   : > { %v8648_v27 = vld [vmem:[#allocation21_spill] sm:$0xff]  ;;  %v8649_v26 = vld [vmem:[#allocation20_spill] sm:$0xff]  ;;  %v8650_v25 = vld [vmem:[#allocation19_spill] sm:$0xff]  ;;  %8657 = vst [vmem:[#allocation118_spill] sm:$0xff] %v6324_v19  ;;  %s6414_s15 = smov (%p8322_p11), [#allocation12]  }
  0x80   : > { %v8651_v24 = vld [vmem:[#allocation18_spill] sm:$0xff]  ;;  %v8652_v38 = vld [vmem:[#allocation32_spill] sm:$0xff]  ;;  %8658 = vst [vmem:[#allocation119_spill] sm:$0xff] %v6328_v18  ;;  %8659 = vst [vmem:[#allocation120_spill] sm:$0xff] %v6332_v17  ;;  %s4664_s5 = sshll.u32 (%p8322_p11), %s6414_s15, 4  ;;  %s4665_s5 = int_to_ptr.vmem [resolvable:$true] %s4664_s5 }
  0x81   : > { %8660 = vst [vmem:[#allocation121_spill] sm:$0xff] %v6336_v16  ;;  %8661 = vst [vmem:[#allocation122_spill] sm:$0xff] %v6340_v15  ;;  %v4772_v54 = vcombine.high %v8652_v38, %v8637_v39  ;;  %v4771_v58 = vcombine.low %v8652_v38, %v8637_v39  ;;  %v4766_v38 = vcombine.high %v8643_v32, %v8642_v33  ;;  %v8677_v63 = vld [vmem:[#allocation73_spill] sm:$0xff]  ;;  %v8678_v62 = vld [vmem:[#allocation72_spill] sm:$0xff]  ;;  %s6176_s16 = scalar_lea.vmem (%p8322_p11), %s4665_s5, 3072  ;;  %p6181_p13 = scmp.lt.s32.totalorder (%p8322_p11), %s4665_s5, %s4665_s5 }
  0x82   : > { %8662 = vst [vmem:[#allocation123_spill] sm:$0xff] %v6344_v14  ;;  %8663 = vst [vmem:[#allocation124_spill] sm:$0xff] %v6348_v13  ;;  %v8679_v47 = vld [vmem:[#allocation71_spill] sm:$0xff]  ;;  %v8680_v46 = vld [vmem:[#allocation70_spill] sm:$0xff]  ;;  %p6177_p12 = scmp.ne.s32.totalorder (%p8322_p11), %s4665_s5, %s6176_s16  ;;  %p6182_p0 = scmp.lt.s32.totalorder (%p8322_p11), %s6176_s16, %s6176_s16 }
  0x83   : > { %8664 = vst [vmem:[#allocation125_spill] sm:$0xff] %v6352_v12  ;;  %8665 = vst [vmem:[#allocation126_spill] sm:$0xff] %v6356_v11  ;;  %351 = vmatprep.subr.bf16.mxu0 %v4772_v54  ;;  %v4765_v54 = vcombine.low %v8643_v32, %v8642_v33  ;;  %v8681_v61 = vld [vmem:[#allocation69_spill] sm:$0xff]  ;;  %v8682_v60 = vld [vmem:[#allocation68_spill] sm:$0xff]  ;;  %s4584_s13 = ssub.f32 1.0, %s7303_s11 }
  0x84   : > { %8666 = vst [vmem:[#allocation127_spill] sm:$0xff] %v6360_v10  ;;  %8667 = vst [vmem:[#allocation128_spill] sm:$0xff] %v6364_v9  ;;  %352 = vmatpush1.bf16.msra.mxu0 %v4771_v58  ;;  %v4763_v58 = vcombine.low %v8645_v30, %v8644_v31  ;;  %v8683_v45 = vld [vmem:[#allocation67_spill] sm:$0xff]  ;;  %v8684_v44 = vld [vmem:[#allocation66_spill] sm:$0xff]  ;;  %p6183_p1 = por (%p8322_p11), %p6182_p0, %p6181_p13 }
  0x85   : > { %8668 = vst [vmem:[#allocation129_spill] sm:$0xff] %v6368_v8  ;;  %8669 = vst [vmem:[#allocation130_spill] sm:$0xff] %v6372_v7  ;;  %353 = vmatprep.subr.bf16.mxu0 %v4770_v43  ;;  %v4764_v43 = vcombine.high %v8645_v30, %v8644_v31  ;;  %v8685_v56 = vld [vmem:[#allocation81_spill] sm:$0xff]  ;;  %v8686_v42 = vld [vmem:[#allocation80_spill] sm:$0xff]  ;;  %s4585_s2 = ssub.f32 %s4584_s13, %s7306_s12 }
  0x86   : > { %8670 = vst [vmem:[#allocation131_spill] sm:$0xff] %v6376_v6  ;;  %8671 = vst [vmem:[#allocation132_spill] sm:$0xff] %v6380_v5  ;;  %v7191_v32 = vcombine.low %v8686_v42, %v8685_v56  ;;  %v8687_v51 = vld [vmem:[#allocation79_spill] sm:$0xff]  ;;  %v8688_v50 = vld [vmem:[#allocation78_spill] sm:$0xff]  ;;  %p6184_p2 = pnand (%p8322_p11), %p6183_p1, %p6177_p12 }
  0x87   : > { %8672 = vst [vmem:[#allocation133_spill] sm:$0xff] %v6384_v4  ;;  %8673 = vst [vmem:[#allocation134_spill] sm:$0xff] %v6388_v3  ;;  %v8689_v41 = vld [vmem:[#allocation77_spill] sm:$0xff]  ;;  %v8690_v40 = vld [vmem:[#allocation76_spill] sm:$0xff] }
  0x88   : > { %8674 = vst [vmem:[#allocation135_spill] sm:$0xff] %v6392_v2  ;;  %8675 = vst [vmem:[#allocation136_spill] sm:$0xff] %v6396_v1  ;;  %354 = vmatpush1.bf16.msra.mxu0 %v4769_v55  ;;  %v4762_v55 = vcombine.high %v8647_v28, %v8646_v29  ;;  %v8691_v49 = vld [vmem:[#allocation75_spill] sm:$0xff]  ;;  %v8692_v48 = vld [vmem:[#allocation74_spill] sm:$0xff] }
  0x89   : > { %8676 = vst [vmem:[#allocation137_spill] sm:$0xff] %v6400_v0  ;;  %355 = vmatprep.subr.bf16.mxu0 %v4768_v59  ;;  %v4761_v59 = vcombine.low %v8647_v28, %v8646_v29 }
  0x8c   : > { %356 = vmatpush1.bf16.msra.mxu0 %v4767_v52  ;;  %v4760_v52 = vcombine.high %v8649_v26, %v8648_v27 }
  0x8d   : > { %357 = vmatprep.subr.bf16.mxu0 %v4766_v38  ;;  %v4759_v38 = vcombine.low %v8649_v26, %v8648_v27 }
  0x90   : > { %358 = vmatpush1.bf16.msra.mxu0 %v4765_v54  ;;  %v4758_v54 = vcombine.high %v8651_v24, %v8650_v25 }
  0x91   : > { %359 = vmatprep.subr.bf16.mxu0 %v4764_v43  ;;  %v4757_v43 = vcombine.low %v8651_v24, %v8650_v25 }
  0x94   : > { %360 = vmatpush1.bf16.msra.mxu0 %v4763_v58  ;;  %v259_v58 = vpack.c.bf16 %v6396_v1, %v6400_v0  ;;  %v8730_v1 = vld [vmem:[#allocation95_spill] sm:$0xff]  ;;  %v8732_v0 = vld [vmem:[#allocation113_spill] sm:$0xff] }
  0x95   : > { %361 = vmatprep.subr.bf16.mxu0 %v4762_v55  ;;  %v260_v55 = vpack.c.bf16 %v6388_v3, %v6392_v2 }
  0x98   : > { %362 = vmatpush1.bf16.msra.mxu0 %v4761_v59  ;;  %v261_v59 = vpack.c.bf16 %v6380_v5, %v6384_v4 }
  0x99   : > { %363 = vmatprep.subr.bf16.mxu0 %v4760_v52  ;;  %v262_v52 = vpack.c.bf16 %v6372_v7, %v6376_v6 }
  0x9c   : > { %364 = vmatpush1.bf16.msra.mxu0 %v4759_v38  ;;  %v263_v38 = vpack.c.bf16 %v6364_v9, %v6368_v8 }
  0x9d   : > { %365 = vmatprep.subr.bf16.mxu0 %v4758_v54  ;;  %v264_v54 = vpack.c.bf16 %v6356_v11, %v6360_v10 }
  0xa0   : > { %366 = vmatpush1.bf16.msra.mxu0 %v4757_v43  ;;  %v265_v43 = vpack.c.bf16 %v6348_v13, %v6352_v12 }
  0xa3   : > { %384 = vmatmul.mubr.bf16.vlgmr.msra.gmra.mxu0 %v259_v58  ;;  %v266_v58 = vpack.c.bf16 %v6340_v15, %v6344_v14  ;;  %v8708_v15 = vld [vmem:[#allocation92_spill] sm:$0xff]  ;;  %v8710_v14 = vld [vmem:[#allocation103_spill] sm:$0xff] }
  0xa4   : > { %393 = vmatprep.mubr.bf16.mxu0 %v6413_v53 }
  0xab   : > { %394 = vmatmul.mubr.bf16.gmra.mxu0 %v260_v55  ;;  %v267_v55 = vpack.c.bf16 %v6332_v17, %v6336_v16  ;;  %v8706_v16 = vld [vmem:[#allocation105_spill] sm:$0xff] }
  0xac   : > { %403 = vmatprep.mubr.bf16.mxu0 %v6413_v53 }
  0xb3   : > { %404 = vmatmul.mubr.bf16.gmra.mxu0 %v261_v59  ;;  %v268_v59 = vpack.c.bf16 %v6324_v19, %v6328_v18 }
  0xb4   : > { %413 = vmatprep.mubr.bf16.mxu0 %v6413_v53 }
  0xbb   : > { %414 = vmatmul.mubr.bf16.gmra.mxu0 %v262_v52  ;;  %v269_v52 = vpack.c.bf16 %v6316_v21, %v6320_v20 }
  0xbc   : > { %423 = vmatprep.mubr.bf16.mxu0 %v6413_v53 }
  0xc3   : > { %424 = vmatmul.mubr.bf16.gmra.mxu0 %v263_v38  ;;  %v7172_v38 = vcombine.low %v8678_v62, %v8677_v63 }
  0xc4   : > { %433 = vmatprep.mubr.bf16.mxu0 %v6413_v53 }
  0xc5   : > { %5569 = vmatprep.subr.bf16.mxu0 %v7172_v38 }
  0xc6   : > { %5570 = vmatpush3.bf16.msra.mxu0 %v7172_v38 }
  0xcb   : > { %434 = vmatmul.mubr.bf16.gmra.mxu0 %v264_v54  ;;  %v270_v54 = vpack.c.bf16 %v6308_v23, %v6312_v22 }
  0xcc   : > { %443 = vmatprep.mubr.bf16.mxu0 %v6413_v53 }
  0xd3   : > { %444 = vmatmul.mubr.bf16.gmra.mxu0 %v265_v43  ;;  %v7180_v43 = vcombine.low %v8680_v46, %v8679_v47 }
  0xd4   : > { %453 = vmatprep.mubr.bf16.mxu0 %v6413_v53 }
  0xd5   : > { %5571 = vmatprep.subr.bf16.mxu0 %v7180_v43 }
  0xd6   : > { %5572 = vmatpush3.bf16.msra.mxu0 %v7180_v43 }
  0xd7   : > { %5769 = vmatprep.subr.bf16.mxu0 %v7191_v32 }
  0xdb   : > { %454 = vmatmul.mubr.bf16.gmra.mxu0 %v266_v58  ;;  %v4773_v58 = vcombine.low %v8684_v44, %v8683_v45 }
  0xdc   : > { %463 = vmatprep.mubr.bf16.mxu0 %v6413_v53 }
  0xe3   : > { %464 = vmatmul.mubr.bf16.gmra.mxu0 %v267_v55 }
  0xe4   : > { %473 = vmatprep.mubr.bf16.mxu0 %v6413_v53 }
  0xeb   : > { %474 = vmatmul.mubr.bf16.gmra.mxu0 %v268_v59 }
  0xec   : > { %483 = vmatprep.mubr.bf16.mxu0 %v6413_v53 }
  0xf3   : > { %484 = vmatmul.mubr.bf16.gmra.mxu0 %v269_v52 }
  0xf4   : > { %493 = vmatprep.mubr.bf16.mxu0 %v6413_v53  ;;  %v4774_v53 = vcombine.low %v8682_v60, %v8681_v61 }
  0xf6   : > { %5469 = vmatprep.subr.bf16.mxu1 %v4774_v53 }
  0xf7   : > { %5470 = vmatpush3.bf16.msra.mxu1 %v4774_v53 }
  0xf8   : > { %5471 = vmatprep.subr.bf16.mxu1 %v4773_v58 }
  0xfb   : > { %494 = vmatmul.mubr.bf16.gmra.mxu0 %v270_v54  ;;  %5472 = vmatpush3.bf16.msra.mxu1 %v4773_v58 }
  0xfc   : > { %5869 = vmatprep.subr.bf16.mxu1 %v7172_v38 }
 0x163   : > { %v385_v55 = vpop.f32.mrf.mxu0 }
 0x165   : > { %v387_v59 = vpop.f32.mrf.mxu0 }
 0x167   : > { %v389_v52 = vpop.f32.mrf.mxu0 }
 0x168   : > { %v504_v54 = vpack.c.bf16 %v389_v52, %v385_v55 }
 0x169   : > { %v391_v24 = vpop.f32.mrf.mxu0 }
 0x16a   : > { %528 = vxpose.xlu0.c.b16.start [1/2] (short) %v504_v54, 128  ;;  %v505_v25 = vpack.c.bf16 %v391_v24, %v387_v59 }
 0x16b   : > { %v395_v26 = vpop.f32.mrf.mxu0 }
 0x16c   : > { %544 = vxpose.xlu1.c.b16.start [1/2] (short) %v505_v25, 128 }
 0x16d   : > { %v397_v27 = vpop.f32.mrf.mxu0 }
 0x16f   : > { %v399_v28 = vpop.f32.mrf.mxu0 }
 0x170   : > { %v506_v29 = vpack.c.bf16 %v399_v28, %v395_v26 }
 0x171   : > { %v401_v53 = vpop.f32.mrf.mxu0 }
 0x172   : > { %529 = vxpose.xlu0.c.b16.end [2/2] (short) %v506_v29, 128  ;;  %v507_v30 = vpack.c.bf16 %v401_v53, %v397_v27 }
 0x173   : > { %v405_v31 = vpop.f32.mrf.mxu0 }
 0x174   : > { %545 = vxpose.xlu1.c.b16.end [2/2] (short) %v507_v30, 128 }
 0x175   : > { %v407_v58 = vpop.f32.mrf.mxu0 }
 0x177   : > { %v409_v33 = vpop.f32.mrf.mxu0 }
 0x178   : > { %v508_v26 = vpack.c.bf16 %v409_v33, %v405_v31 }
 0x179   : > { %v411_v55 = vpop.f32.mrf.mxu0 }
 0x17a   : > { %v509_v27 = vpack.c.bf16 %v411_v55, %v407_v58 }
 0x17b   : > { %v415_v24 = vpop.f32.mrf.mxu0 }
 0x17d   : > { %v417_v59 = vpop.f32.mrf.mxu0 }
 0x17f   : > { %v419_v25 = vpop.f32.mrf.mxu0 }
 0x180   : > { %v510_v28 = vpack.c.bf16 %v419_v25, %v415_v24 }
 0x181   : > { %v421_v52 = vpop.f32.mrf.mxu0 }
 0x182   : > { %v511_v30 = vpack.c.bf16 %v421_v52, %v417_v59 }
 0x183   : > { %v425_v54 = vpop.f32.mrf.mxu0 }
 0x185   : > { %v427_v29 = vpop.f32.mrf.mxu0 }
 0x187   : > { %v429_v53 = vpop.f32.mrf.mxu0 }
 0x188   : > { %v512_v42 = vpack.c.bf16 %v429_v53, %v425_v54 }
 0x189   : > { %v431_v34 = vpop.f32.mrf.mxu0 }
 0x18a   : > { %v513_v46 = vpack.c.bf16 %v431_v34, %v427_v29 }
 0x18b   : > { %560 = vxpose.xlu0.c.b16.start [1/2] (short) %v508_v26, 128  ;;  %v435_v35 = vpop.f32.mrf.mxu0 }
 0x18d   : > { %576 = vxpose.xlu1.c.b16.start [1/2] (short) %v509_v27, 128  ;;  %v437_v36 = vpop.f32.mrf.mxu0 }
 0x18f   : > { %561 = vxpose.xlu0.c.b16.end [2/2] (short) %v510_v28, 128  ;;  %v439_v37 = vpop.f32.mrf.mxu0 }
 0x190   : > { %v514_v45 = vpack.c.bf16 %v439_v37, %v435_v35 }
 0x191   : > { %577 = vxpose.xlu1.c.b16.end [2/2] (short) %v511_v30, 128  ;;  %v441_v39 = vpop.f32.mrf.mxu0 }
 0x192   : > { %v515_v31 = vpack.c.bf16 %v441_v39, %v437_v36 }
 0x193   : > { %v445_v44 = vpop.f32.mrf.mxu0 }
 0x195   : > { %v447_v33 = vpop.f32.mrf.mxu0 }
 0x197   : > { %v449_v58 = vpop.f32.mrf.mxu0 }
 0x198   : > { %v516_v52 = vpack.c.bf16 %v449_v58, %v445_v44 }
 0x199   : > { %v451_v55 = vpop.f32.mrf.mxu0 }
 0x19a   : > { %v517_v28 = vpack.c.bf16 %v451_v55, %v447_v33 }
 0x19b   : > { %v455_v24 = vpop.f32.mrf.mxu0 }
 0x19d   : > { %v457_v59 = vpop.f32.mrf.mxu0 }
 0x19f   : > { %v459_v25 = vpop.f32.mrf.mxu0 }
 0x1a0   : > { %v518_v54 = vpack.c.bf16 %v459_v25, %v455_v24 }
 0x1a1   : > { %v461_v26 = vpop.f32.mrf.mxu0 }
 0x1a3   : > { %v465_v27 = vpop.f32.mrf.mxu0 }
 0x1a5   : > { %v467_v35 = vpop.f32.mrf.mxu0 }
 0x1a7   : > { %v469_v34 = vpop.f32.mrf.mxu0 }
 0x1a8   : > { %592 = vxpose.xlu0.c.b16.start [1/2] (short) %v512_v42, 128  ;;  %v519_v42 = vpack.c.bf16 %v461_v26, %v457_v59  ;;  %v520_v55 = vpack.c.bf16 %v469_v34, %v465_v27 }
 0x1a9   : > { %v471_v37 = vpop.f32.mrf.mxu0 }
 0x1aa   : > { %608 = vxpose.xlu1.c.b16.start [1/2] (short) %v513_v46, 128  ;;  %v5115_v46 = vcombine.low %v8688_v50, %v8687_v51  ;;  %v521_v59 = vpack.c.bf16 %v471_v37, %v467_v35  ;;  %v8700_v50 = vld [vmem:[#allocation99_spill] sm:$0xff] }
 0x1ac   : > { %593 = vxpose.xlu0.c.b16.end [2/2] (short) %v514_v45, 128  ;;  %v475_v45 = vpop.f32.mrf.mxu0 }
 0x1ae   : > { %609 = vxpose.xlu1.c.b16.end [2/2] (short) %v515_v31, 128  ;;  %v477_v53 = vpop.f32.mrf.mxu0 }
 0x1b0   : > { %v479_v58 = vpop.f32.mrf.mxu0 }
 0x1c5   : > { %624 = vxpose.xlu0.c.b16.start [1/2] (short) %v516_v52, 128  ;;  %v522_v52 = vpack.c.bf16 %v479_v58, %v475_v45 }
 0x1c7   : > { %640 = vxpose.xlu1.c.b16.start [1/2] (short) %v517_v28, 128 }
 0x1c9   : > { %625 = vxpose.xlu0.c.b16.end [2/2] (short) %v518_v54, 128 }
 0x1cb   : > { %641 = vxpose.xlu1.c.b16.end [2/2] (short) %v519_v42, 128 }
 0x1d0   : > { %v536_v36 = vpop.trf.xlu0 }
 0x1d1   : > { %5473 = vmatprep.mubr.msk.bf16.mxu1 %vm732_vm0, %v536_v36 }
 0x1d2   : > { %v552_v39 = vpop.trf.xlu1 }
 0x1d3   : > { %5573 = vmatprep.mubr.msk.bf16.mxu0 %vm732_vm0, %v552_v39 }
 0x1d4   : > { %v537_v44 = vpop.trf.xlu0 }
 0x1d5   : > { %5474 = vmatmul.mubr.msk.bf16.vlgmr.msra.gmra.mxu1 %vm732_vm0, %v537_v44 }
 0x1d6   : > { %5871 = vmatpush3.bf16.msra.mxu1 %v7172_v38  ;;  %v553_v29 = vpop.trf.xlu1 }
 0x1d7   : > { %5574 = vmatmul.mubr.msk.bf16.vlgmr.msra.gmra.mxu0 %vm732_vm0, %v553_v29  ;;  %5870 = vmatprep.subr.bf16.mxu1 %v7180_v43 }
 0x1d8   : > { %v538_v30 = vpop.trf.xlu0  ;;  %5770 = vmatpush3.bf16.msra.mxu0 %v7191_v32  ;;  %v481_v32 = vpop.f32.mrf.mxu0 }
 0x1d9   : > { %5477 = vmatprep.mubr.msk.bf16.mxu1 %vm732_vm0, %v538_v30  ;;  %5771 = vmatprep.subr.bf16.mxu0 %v5115_v46  ;;  %v523_v28 = vpack.c.bf16 %v481_v32, %v477_v53 }
 0x1da   : > { %v554_v31 = vpop.trf.xlu1  ;;  %5872 = vmatpush3.bf16.msra.mxu1 %v7180_v43  ;;  %v485_v43 = vpop.f32.mrf.mxu0 }
 0x1db   : > { %5577 = vmatprep.mubr.msk.bf16.mxu0 %vm732_vm0, %v554_v31 }
 0x1dc   : > { %v539_v33 = vpop.trf.xlu0  ;;  %5772 = vmatpush3.bf16.msra.mxu0 %v5115_v46  ;;  %v487_v27 = vpop.f32.mrf.mxu0 }
 0x1dd   : > { %5478 = vmatmul.mubr.msk.bf16.gmra.mxu1 %vm732_vm0, %v539_v33 }
 0x1de   : > { %v555_v38 = vpop.trf.xlu1  ;;  %v489_v34 = vpop.f32.mrf.mxu0 }
 0x1df   : > { %5578 = vmatmul.mubr.msk.bf16.gmra.mxu0 %vm732_vm0, %v555_v38  ;;  %v524_v38 = vpack.c.bf16 %v489_v34, %v485_v43 }
 0x1e0   : > { %v540_v24 = vpop.trf.xlu0  ;;  %v491_v39 = vpop.f32.mrf.mxu0 }
 0x1e1   : > { %5481 = vmatprep.mubr.msk.bf16.mxu1 %vm732_vm0, %v540_v24  ;;  %v525_v24 = vpack.c.bf16 %v491_v39, %v487_v27 }
 0x1e2   : > { %v556_v25 = vpop.trf.xlu1  ;;  %656 = vxpose.xlu0.c.b16.start [1/2] (short) %v520_v55, 128  ;;  %v495_v46 = vpop.f32.mrf.mxu0 }
 0x1e3   : > { %5581 = vmatprep.mubr.msk.bf16.mxu0 %vm732_vm0, %v556_v25 }
 0x1e4   : > { %v541_v26 = vpop.trf.xlu0  ;;  %672 = vxpose.xlu1.c.b16.start [1/2] (short) %v521_v59, 128  ;;  %v497_v53 = vpop.f32.mrf.mxu0 }
 0x1e5   : > { %5482 = vmatmul.mubr.msk.bf16.gmra.mxu1 %vm732_vm0, %v541_v26 }
 0x1e6   : > { %v557_v54 = vpop.trf.xlu1  ;;  %657 = vxpose.xlu0.c.b16.end [2/2] (short) %v522_v52, 128  ;;  %v499_v58 = vpop.f32.mrf.mxu0 }
 0x1e7   : > { %5582 = vmatmul.mubr.msk.bf16.gmra.mxu0 %vm732_vm0, %v557_v54  ;;  %v526_v25 = vpack.c.bf16 %v499_v58, %v495_v46 }
 0x1e8   : > { %v542_v42 = vpop.trf.xlu0  ;;  %673 = vxpose.xlu1.c.b16.end [2/2] (short) %v523_v28, 128  ;;  %v501_v32 = vpop.f32.mrf.mxu0 }
 0x1e9   : > { %5485 = vmatprep.mubr.msk.bf16.mxu1 %vm732_vm0, %v542_v42  ;;  %v527_v26 = vpack.c.bf16 %v501_v32, %v497_v53  ;;  %v7241_v53 = vcombine.low %v8690_v40, %v8689_v41  ;;  %v8699_v41 = vld [vmem:[#allocation88_spill] sm:$0xff] }
 0x1ea   : > { %v558_v35 = vpop.trf.xlu1 }
 0x1eb   : > { %5585 = vmatprep.mubr.msk.bf16.mxu0 %vm732_vm0, %v558_v35  ;;  %5669 = vmatprep.subr.bf16.mxu1 %v7241_v53 }
 0x1ec   : > { %v543_v36 = vpop.trf.xlu0 }
 0x1ed   : > { %5486 = vmatmul.mubr.msk.bf16.gmra.mxu1 %vm732_vm0, %v543_v36 }
 0x1ee   : > { %v559_v37 = vpop.trf.xlu1 }
 0x1ef   : > { %5586 = vmatmul.mubr.msk.bf16.gmra.mxu0 %vm732_vm0, %v559_v37 }
 0x1f0   : > { %v568_v44 = vpop.trf.xlu0 }
 0x1f1   : > { %5489 = vmatprep.mubr.msk.bf16.mxu1 %vm732_vm0, %v568_v44 }
 0x1f2   : > { %v584_v45 = vpop.trf.xlu1 }
 0x1f3   : > { %5589 = vmatprep.mubr.msk.bf16.mxu0 %vm732_vm0, %v584_v45 }
 0x1f4   : > { %v569_v29 = vpop.trf.xlu0 }
 0x1f5   : > { %5490 = vmatmul.mubr.msk.bf16.gmra.mxu1 %vm732_vm0, %v569_v29 }
 0x1f6   : > { %v585_v30 = vpop.trf.xlu1 }
 0x1f7   : > { %5590 = vmatmul.mubr.msk.bf16.gmra.mxu0 %vm732_vm0, %v585_v30 }
 0x1f8   : > { %v570_v31 = vpop.trf.xlu0 }
 0x1f9   : > { %5493 = vmatprep.mubr.msk.bf16.mxu1 %vm732_vm0, %v570_v31 }
 0x1fa   : > { %v586_v33 = vpop.trf.xlu1 }
 0x1fb   : > { %5593 = vmatprep.mubr.msk.bf16.mxu0 %vm732_vm0, %v586_v33 }
 0x1fc   : > { %v571_v55 = vpop.trf.xlu0 }
 0x1fd   : > { %5494 = vmatmul.mubr.msk.bf16.gmra.mxu1 %vm732_vm0, %v571_v55 }
 0x1fe   : > { %v587_v59 = vpop.trf.xlu1 }
 0x1ff   : > { %5594 = vmatmul.mubr.msk.bf16.gmra.mxu0 %vm732_vm0, %v587_v59  ;;  %688 = vxpose.xlu0.c.b16.start [1/2] (short) %v524_v38, 128 }
 0x200   : > { %v572_v52 = vpop.trf.xlu0 }
 0x201   : > { %5497 = vmatprep.mubr.msk.bf16.mxu1 %vm732_vm0, %v572_v52  ;;  %704 = vxpose.xlu1.c.b16.start [1/2] (short) %v525_v24, 128 }
 0x202   : > { %v588_v28 = vpop.trf.xlu1 }
 0x203   : > { %5597 = vmatprep.mubr.msk.bf16.mxu0 %vm732_vm0, %v588_v28  ;;  %689 = vxpose.xlu0.c.b16.end [2/2] (short) %v526_v25, 128 }
 0x204   : > { %v573_v43 = vpop.trf.xlu0 }
 0x205   : > { %5498 = vmatmul.mubr.msk.bf16.gmra.mxu1 %vm732_vm0, %v573_v43  ;;  %705 = vxpose.xlu1.c.b16.end [2/2] (short) %v527_v26, 128 }
 0x206   : > { %v589_v54 = vpop.trf.xlu1 }
 0x207   : > { %5598 = vmatmul.mubr.msk.bf16.gmra.mxu0 %vm732_vm0, %v589_v54 }
 0x208   : > { %v574_v27 = vpop.trf.xlu0 }
 0x209   : > { %5501 = vmatprep.mubr.msk.bf16.mxu1 %vm732_vm0, %v574_v27 }
 0x20a   : > { %v590_v42 = vpop.trf.xlu1 }
 0x20b   : > { %5601 = vmatprep.mubr.msk.bf16.mxu0 %vm732_vm0, %v590_v42 }
 0x20c   : > { %v575_v35 = vpop.trf.xlu0 }
 0x20d   : > { %5502 = vmatmul.mubr.msk.bf16.gmra.mxu1 %vm732_vm0, %v575_v35 }
 0x20e   : > { %v591_v34 = vpop.trf.xlu1 }
 0x20f   : > { %5602 = vmatmul.mubr.msk.bf16.gmra.mxu0 %vm732_vm0, %v591_v34 }
 0x210   : > { %v600_v36 = vpop.trf.xlu0 }
 0x211   : > { %5505 = vmatprep.mubr.msk.bf16.mxu1 %vm732_vm0, %v600_v36 }
 0x212   : > { %v616_v37 = vpop.trf.xlu1 }
 0x213   : > { %5605 = vmatprep.mubr.msk.bf16.mxu0 %vm732_vm0, %v616_v37 }
 0x214   : > { %v601_v39 = vpop.trf.xlu0 }
 0x215   : > { %5506 = vmatmul.mubr.msk.bf16.gmra.mxu1 %vm732_vm0, %v601_v39 }
 0x216   : > { %v617_v44 = vpop.trf.xlu1 }
 0x217   : > { %5606 = vmatmul.mubr.msk.bf16.gmra.mxu0 %vm732_vm0, %v617_v44 }
 0x218   : > { %v602_v45 = vpop.trf.xlu0 }
 0x219   : > { %5509 = vmatprep.mubr.msk.bf16.mxu1 %vm732_vm0, %v602_v45 }
 0x21a   : > { %v618_v46 = vpop.trf.xlu1 }
 0x21b   : > { %5609 = vmatprep.mubr.msk.bf16.mxu0 %vm732_vm0, %v618_v46 }
 0x21c   : > { %v603_v29 = vpop.trf.xlu0 }
 0x21d   : > { %5510 = vmatmul.mubr.msk.bf16.gmra.mxu1 %vm732_vm0, %v603_v29 }
 0x21e   : > { %v619_v30 = vpop.trf.xlu1 }
 0x21f   : > { %5610 = vmatmul.mubr.msk.bf16.gmra.mxu0 %vm732_vm0, %v619_v30 }
 0x220   : > { %v604_v31 = vpop.trf.xlu0 }
 0x221   : > { %5513 = vmatprep.mubr.msk.bf16.mxu1 %vm732_vm0, %v604_v31 }
 0x222   : > { %v620_v33 = vpop.trf.xlu1 }
 0x223   : > { %5613 = vmatprep.mubr.msk.bf16.mxu0 %vm732_vm0, %v620_v33 }
 0x224   : > { %v605_v58 = vpop.trf.xlu0 }
 0x225   : > { %5514 = vmatmul.mubr.msk.bf16.gmra.mxu1 %vm732_vm0, %v605_v58 }
 0x226   : > { %v621_v38 = vpop.trf.xlu1 }
 0x227   : > { %5614 = vmatmul.mubr.msk.bf16.gmra.mxu0 %vm732_vm0, %v621_v38 }
 0x228   : > { %v606_v55 = vpop.trf.xlu0 }
 0x229   : > { %5517 = vmatprep.mubr.msk.bf16.mxu1 %vm732_vm0, %v606_v55 }
 0x22a   : > { %v622_v24 = vpop.trf.xlu1 }
 0x22b   : > { %5617 = vmatprep.mubr.msk.bf16.mxu0 %vm732_vm0, %v622_v24 }
 0x22c   : > { %v607_v59 = vpop.trf.xlu0 }
 0x22d   : > { %5518 = vmatmul.mubr.msk.bf16.gmra.mxu1 %vm732_vm0, %v607_v59 }
 0x22e   : > { %v623_v32 = vpop.trf.xlu1 }
 0x22f   : > { %5618 = vmatmul.mubr.msk.bf16.gmra.mxu0 %vm732_vm0, %v623_v32 }
 0x230   : > { %v632_v25 = vpop.trf.xlu0 }
 0x231   : > { %5521 = vmatprep.mubr.msk.bf16.mxu1 %vm732_vm0, %v632_v25 }
 0x232   : > { %v648_v52 = vpop.trf.xlu1 }
 0x233   : > { %5621 = vmatprep.mubr.msk.bf16.mxu0 %vm732_vm0, %v648_v52 }
 0x234   : > { %v633_v26 = vpop.trf.xlu0 }
 0x235   : > { %5522 = vmatmul.mubr.msk.bf16.gmra.mxu1 %vm732_vm0, %v633_v26 }
 0x236   : > { %v649_v28 = vpop.trf.xlu1 }
 0x237   : > { %5622 = vmatmul.mubr.msk.bf16.gmra.mxu0 %vm732_vm0, %v649_v28 }
 0x238   : > { %v634_v43 = vpop.trf.xlu0 }
 0x239   : > { %5525 = vmatprep.mubr.msk.bf16.mxu1 %vm732_vm0, %v634_v43 }
 0x23a   : > { %v650_v54 = vpop.trf.xlu1 }
 0x23b   : > { %5625 = vmatprep.mubr.msk.bf16.mxu0 %vm732_vm0, %v650_v54 }
 0x23c   : > { %v635_v27 = vpop.trf.xlu0 }
 0x23d   : > { %5526 = vmatmul.mubr.msk.bf16.gmra.mxu1 %vm732_vm0, %v635_v27 }
 0x23e   : > { %v651_v42 = vpop.trf.xlu1 }
 0x23f   : > { %5626 = vmatmul.mubr.msk.bf16.gmra.mxu0 %vm732_vm0, %v651_v42 }
 0x240   : > { %v636_v35 = vpop.trf.xlu0 }
 0x241   : > { %5529 = vmatprep.mubr.msk.bf16.mxu1 %vm732_vm0, %v636_v35 }
 0x242   : > { %v652_v34 = vpop.trf.xlu1 }
 0x243   : > { %5629 = vmatprep.mubr.msk.bf16.mxu0 %vm732_vm0, %v652_v34 }
 0x244   : > { %v637_v36 = vpop.trf.xlu0 }
 0x245   : > { %5530 = vmatmul.mubr.msk.bf16.gmra.mxu1 %vm732_vm0, %v637_v36 }
 0x246   : > { %v653_v37 = vpop.trf.xlu1 }
 0x247   : > { %5630 = vmatmul.mubr.msk.bf16.gmra.mxu0 %vm732_vm0, %v653_v37 }
 0x248   : > { %v638_v39 = vpop.trf.xlu0 }
 0x249   : > { %5533 = vmatprep.mubr.msk.bf16.mxu1 %vm732_vm0, %v638_v39 }
 0x24a   : > { %v654_v44 = vpop.trf.xlu1 }
 0x24b   : > { %5633 = vmatprep.mubr.msk.bf16.mxu0 %vm732_vm0, %v654_v44 }
 0x24c   : > { %v639_v45 = vpop.trf.xlu0 }
 0x24d   : > { %5534 = vmatmul.mubr.msk.bf16.gmra.mxu1 %vm732_vm0, %v639_v45 }
 0x24e   : > { %v655_v46 = vpop.trf.xlu1 }
 0x24f   : > { %5634 = vmatmul.mubr.msk.bf16.gmra.mxu0 %vm732_vm0, %v655_v46 }
 0x250   : > { %v664_v29 = vpop.trf.xlu0 }
 0x251   : > { %5537 = vmatprep.mubr.msk.bf16.mxu1 %vm732_vm0, %v664_v29 }
 0x252   : > { %v680_v30 = vpop.trf.xlu1 }
 0x253   : > { %5637 = vmatprep.mubr.msk.bf16.mxu0 %vm732_vm0, %v680_v30 }
 0x254   : > { %v665_v31 = vpop.trf.xlu0 }
 0x255   : > { %5538 = vmatmul.mubr.msk.bf16.gmra.mxu1 %vm732_vm0, %v665_v31 }
 0x256   : > { %v681_v33 = vpop.trf.xlu1 }
 0x257   : > { %5638 = vmatmul.mubr.msk.bf16.gmra.mxu0 %vm732_vm0, %v681_v33 }
 0x258   : > { %v666_v58 = vpop.trf.xlu0 }
 0x259   : > { %5541 = vmatprep.mubr.msk.bf16.mxu1 %vm732_vm0, %v666_v58 }
 0x25a   : > { %v682_v38 = vpop.trf.xlu1 }
 0x25b   : > { %5641 = vmatprep.mubr.msk.bf16.mxu0 %vm732_vm0, %v682_v38 }
 0x25c   : > { %v667_v55 = vpop.trf.xlu0 }
 0x25d   : > { %5542 = vmatmul.mubr.msk.bf16.gmra.mxu1 %vm732_vm0, %v667_v55  ;;  %v5065_v55 = vcombine.low %v8692_v48, %v8691_v49 }
 0x25e   : > { %v683_v24 = vpop.trf.xlu1 }
 0x25f   : > { %5642 = vmatmul.mubr.msk.bf16.gmra.mxu0 %vm732_vm0, %v683_v24 }
 0x260   : > { %v668_v59 = vpop.trf.xlu0 }
 0x261   : > { %5545 = vmatprep.mubr.msk.bf16.mxu1 %vm732_vm0, %v668_v59 }
 0x262   : > { %v684_v32 = vpop.trf.xlu1 }
 0x263   : > { %5645 = vmatprep.mubr.msk.bf16.mxu0 %vm732_vm0, %v684_v32 }
 0x264   : > { %v669_v25 = vpop.trf.xlu0 }
 0x265   : > { %5546 = vmatmul.mubr.msk.bf16.gmra.mxu1 %vm732_vm0, %v669_v25 }
 0x266   : > { %v685_v52 = vpop.trf.xlu1 }
 0x267   : > { %5646 = vmatmul.mubr.msk.bf16.gmra.mxu0 %vm732_vm0, %v685_v52  ;;  %v8693_v52 = vld [vmem:[#allocation82_spill] sm:$0xff] }
 0x268   : > { %v670_v26 = vpop.trf.xlu0 }
 0x269   : > { %5549 = vmatprep.mubr.msk.bf16.mxu1 %vm732_vm0, %v670_v26 }
 0x26a   : > { %v686_v28 = vpop.trf.xlu1 }
 0x26b   : > { %5649 = vmatprep.mubr.msk.bf16.mxu0 %vm732_vm0, %v686_v28  ;;  %v8694_v28 = vld [vmem:[#allocation100_spill] sm:$0xff] }
 0x26c   : > { %v671_v43 = vpop.trf.xlu0 }
 0x26d   : > { %5550 = vmatmul.mubr.msk.bf16.gmra.mxu1 %vm732_vm0, %v671_v43 }
 0x26e   : > { %v687_v54 = vpop.trf.xlu1 }
 0x26f   : > { %5650 = vmatmul.mubr.msk.bf16.gmra.mxu0 %vm732_vm0, %v687_v54 }
 0x270   : > { %v696_v27 = vpop.trf.xlu0 }
 0x271   : > { %5553 = vmatprep.mubr.msk.bf16.mxu1 %vm732_vm0, %v696_v27 }
 0x272   : > { %v712_v42 = vpop.trf.xlu1 }
 0x273   : > { %5653 = vmatprep.mubr.msk.bf16.mxu0 %vm732_vm0, %v712_v42 }
 0x274   : > { %v697_v35 = vpop.trf.xlu0 }
 0x275   : > { %5554 = vmatmul.mubr.msk.bf16.gmra.mxu1 %vm732_vm0, %v697_v35 }
 0x276   : > { %v713_v34 = vpop.trf.xlu1 }
 0x277   : > { %5654 = vmatmul.mubr.msk.bf16.gmra.mxu0 %vm732_vm0, %v713_v34  ;;  %v8695_v34 = vld [vmem:[#allocation85_spill] sm:$0xff] }
 0x278   : > { %v698_v36 = vpop.trf.xlu0 }
 0x279   : > { %5557 = vmatprep.mubr.msk.bf16.mxu1 %vm732_vm0, %v698_v36 }
 0x27a   : > { %v714_v37 = vpop.trf.xlu1 }
 0x27b   : > { %5657 = vmatprep.mubr.msk.bf16.mxu0 %vm732_vm0, %v714_v37 }
 0x27c   : > { %v699_v39 = vpop.trf.xlu0 }
 0x27d   : > { %5558 = vmatmul.mubr.msk.bf16.gmra.mxu1 %vm732_vm0, %v699_v39  ;;  %v8696_v39 = vld [vmem:[#allocation98_spill] sm:$0xff] }
 0x27e   : > { %v715_v44 = vpop.trf.xlu1 }
 0x27f   : > { %5658 = vmatmul.mubr.msk.bf16.gmra.mxu0 %vm732_vm0, %v715_v44 }
 0x280   : > { %v700_v45 = vpop.trf.xlu0 }
 0x281   : > { %5561 = vmatprep.mubr.msk.bf16.mxu1 %vm732_vm0, %v700_v45 }
 0x282   : > { %v716_v46 = vpop.trf.xlu1 }
 0x283   : > { %5661 = vmatprep.mubr.msk.bf16.mxu0 %vm732_vm0, %v716_v46  ;;  %v7315_v46 = vstv %s7303_s11 }
 0x284   : > { %v701_v29 = vpop.trf.xlu0 }
 0x285   : > { %5562 = vmatmul.mubr.msk.bf16.gmra.mxu1 %vm732_vm0, %v701_v29 }
 0x286   : > { %v717_v30 = vpop.trf.xlu1 }
 0x287   : > { %5662 = vmatmul.mubr.msk.bf16.gmra.mxu0 %vm732_vm0, %v717_v30  ;;  %v7318_v30 = vstv %s7306_s12 }
 0x288   : > { %v702_v31 = vpop.trf.xlu0 }
 0x289   : > { %5565 = vmatprep.mubr.msk.bf16.mxu1 %vm732_vm0, %v702_v31 }
 0x28a   : > { %v718_v33 = vpop.trf.xlu1 }
 0x28c   : > { %v703_v58 = vpop.trf.xlu0 }
 0x28d   : > { %5566 = vmatmul.mubr.msk.bf16.gmra.mxu1 %vm732_vm0, %v703_v58 }
 0x28e   : > { %5665 = vmatprep.mubr.msk.bf16.mxu1 %vm732_vm0, %v718_v33  ;;  %v719_v38 = vpop.trf.xlu1  ;;  %v8697_v33 = vld [vmem:[#allocation83_spill] sm:$0xff] }
 0x295   : > { %v5475_v24 = vpop.f32.mrf.mxu1  ;;  %5666 = vmatmul.mubr.msk.bf16.vlgmr.msra.gmra.mxu1 %vm732_vm0, %v719_v38  ;;  %v8698_v38 = vld [vmem:[#allocation101_spill] sm:$0xff] }
 0x296   : > { %v1869_v59 = vmul.f32 %v5475_v24, %v8636_v57  ;;  %5670 = vmatpush3.bf16.msra.mxu1 %v7241_v53 }
 0x297   : > { %v911_v32 = vpop.f32.mrf.mxu1  ;;  %v5575_v25 = vpop.f32.mrf.mxu0  ;;  %5671 = vmatprep.subr.bf16.mxu1 %v5065_v55 }
 0x298   : > { %v1867_v26 = vmul.f32 %v911_v32, %v8693_v52  ;;  %v2398_v43 = vmul.f32 %v5575_v25, %v8694_v28  ;;  %v4875_v42 = vclamps-f32 %v1869_v59, 0.5 }
 0x299   : > { %v5476_v54 = vpop.f32.mrf.mxu1  ;;  %v1484_v27 = vpop.f32.mrf.mxu0 }
 0x29a   : > { %v4873_v35 = vclamps-f32 %v1867_v26, 0.5  ;;  %v1870_v36 = vmul.f32 %v5476_v54, %v8695_v34  ;;  %5672 = vmatpush3.bf16.msra.mxu1 %v5065_v55  ;;  %v4971_v37 = vclamps-f32 %v2398_v43, 0.5  ;;  %v2396_v44 = vmul.f32 %v1484_v27, %v8696_v39 }
 0x29b   : > { %v914_v53 = vpop.f32.mrf.mxu1  ;;  %v5576_v45 = vpop.f32.mrf.mxu0  ;;  %v2157_v40 = vsub.f32 %v1869_v59, %v4875_v42 }
 0x29c   : > { %v4876_v29 = vclamps-f32 %v1870_v36, 0.5  ;;  %v4969_v31 = vclamps-f32 %v2396_v44, 0.5  ;;  %v1868_v58 = vmul.f32 %v914_v53, %v8697_v33  ;;  %v2399_v24 = vmul.f32 %v5576_v45, %v8698_v38  ;;  %v8701_v53 = vld [vmem:[#allocation86_spill] sm:$0xff]  ;;  %v8702_v45 = vld [vmem:[#allocation104_spill] sm:$0xff] }
 0x29d   : > { %v5479_v32 = vpop.f32.mrf.mxu1  ;;  %v1487_v25 = vpop.f32.mrf.mxu0  ;;  %v2155_v54 = vsub.f32 %v1867_v26, %v4873_v35  ;;  %v2686_v27 = vsub.f32 %v2398_v43, %v4971_v37  ;;  %v2254_v43 = vmul.f32 %v7315_v46, %v2157_v40 }
 0x29e   : > { %v2158_v55 = vsub.f32 %v1870_v36, %v4876_v29  ;;  %v1873_v47 = vmul.f32 %v5479_v32, %v8699_v41  ;;  %v4874_v48 = vclamps-f32 %v1868_v58, 0.5  ;;  %v4972_v49 = vclamps-f32 %v2399_v24, 0.5 }
 0x29f   : > { %v2397_v51 = vmul.f32 %v1487_v25, %v8700_v50  ;;  %v927_v56 = vpop.f32.mrf.mxu1  ;;  %v5579_v60 = vpop.f32.mrf.mxu0  ;;  %v2684_v62 = vsub.f32 %v2396_v44, %v4969_v31  ;;  %v2252_v32 = vmul.f32 %v7315_v46, %v2155_v54  ;;  %v7330_v25 = vmul.f32 %v7318_v30, %v2686_v27  ;;  %v8703_v31 = vld [vmem:[#allocation89_spill] sm:$0xff]  ;;  %v8705_v54 = vld [vmem:[#allocation87_spill] sm:$0xff] }
 0x2a0   : > { %v2255_v61 = vmul.f32 %v7315_v46, %v2158_v55  ;;  %v1871_v63 = vmul.f32 %v927_v56, %v8701_v53  ;;  %v2402_v23 = vmul.f32 %v5579_v60, %v8702_v45  ;;  %v2156_v22 = vsub.f32 %v1868_v58, %v4874_v48 }
 0x2a1   : > { %v2687_v59 = vsub.f32 %v2399_v24, %v4972_v49  ;;  %v4879_v26 = vclamps-f32 %v1873_v47, 0.5  ;;  %v4970_v42 = vclamps-f32 %v2397_v51, 0.5  ;;  %v5480_v35 = vpop.f32.mrf.mxu1  ;;  %v1500_v36 = vpop.f32.mrf.mxu0  ;;  %v2781_v49 = vmul.f32 %v7318_v30, %v2684_v62  ;;  %v8704_v24 = vld [vmem:[#allocation102_spill] sm:$0xff] }
 0x2a2   : > { %v4877_v37 = vclamps-f32 %v1871_v63, 0.5  ;;  %v4975_v29 = vclamps-f32 %v2402_v23, 0.5  ;;  %v1874_v56 = vmul.f32 %v5480_v35, %v8703_v31  ;;  %v2349_v48 = vpack.c.bf16 %v2255_v61, %v2254_v43 }
 0x2a3   : > { %v2685_v44 = vsub.f32 %v2397_v51, %v4970_v42  ;;  %v930_v55 = vpop.f32.mrf.mxu1  ;;  %v5580_v60 = vpop.f32.mrf.mxu0  ;;  %v2253_v58 = vmul.f32 %v7315_v46, %v2156_v22  ;;  %v2400_v21 = vmul.f32 %v1500_v36, %v8704_v24  ;;  %v2784_v40 = vmul.f32 %v7318_v30, %v2687_v59 }
 0x2a4   : > { %v2161_v20 = vsub.f32 %v1873_v47, %v4879_v26  ;;  %v4880_v19 = vclamps-f32 %v1874_v56, 0.5  ;;  %v1872_v18 = vmul.f32 %v930_v55, %v8705_v54  ;;  %v2159_v42 = vsub.f32 %v1871_v63, %v4877_v37  ;;  %v8712_v55 = vld [vmem:[#allocation90_spill] sm:$0xff] }
 0x2a5   : > { %v5483_v27 = vpop.f32.mrf.mxu1  ;;  %v1503_v17 = vpop.f32.mrf.mxu0  ;;  %v2782_v51 = vmul.f32 %v7318_v30, %v2685_v44  ;;  %v2690_v35 = vsub.f32 %v2402_v23, %v4975_v29  ;;  %v8707_v31 = vmov %v8706_v16  ;;  %v2403_v61 = vmul.f32 %v5580_v60, %v8706_v16 }
 0x2a6   : > { %v2162_v43 = vsub.f32 %v1874_v56, %v4880_v19  ;;  %v4878_v62 = vclamps-f32 %v1872_v18, 0.5  ;;  %v8709_v45 = vmov %v8708_v15  ;;  %v1877_v22 = vmul.f32 %v5483_v27, %v8708_v15  ;;  %v8713_v15 = vld [vmem:[#allocation108_spill] sm:$0xff] }
 0x2a7   : > { %v8711_v53 = vmov %v8710_v14  ;;  %v2401_v36 = vmul.f32 %v1503_v17, %v8710_v14  ;;  %v943_v13 = vpop.f32.mrf.mxu1  ;;  %v5583_v59 = vpop.f32.mrf.mxu0  ;;  %v4973_v47 = vclamps-f32 %v2400_v21, 0.5  ;;  %v4976_v26 = vclamps-f32 %v2403_v61, 0.5 }
 0x2a8   : > { %v2348_v12 = vpack.c.bf16 %v2253_v58, %v2252_v32  ;;  %v1875_v11 = vmul.f32 %v943_v13, %v8712_v55  ;;  %v2259_v10 = vmul.f32 %v7315_v46, %v2162_v43  ;;  %v2160_v44 = vsub.f32 %v1872_v18, %v4878_v62 }
 0x2a9   : > { %v4883_v63 = vclamps-f32 %v1877_v22, 0.5  ;;  %v4974_v23 = vclamps-f32 %v2401_v36, 0.5  ;;  %v5484_v37 = vpop.f32.mrf.mxu1  ;;  %v1516_v16 = vpop.f32.mrf.mxu0  ;;  %v2258_v19 = vmul.f32 %v7315_v46, %v2161_v20  ;;  %v2691_v29 = vsub.f32 %v2403_v61, %v4976_v26 }
 0x2aa   : > { %5673 = vmatprep.mubr.msk.bf16.mxu1 %vm732_vm0, %v2348_v12  ;;  %v4881_v14 = vclamps-f32 %v1875_v11, 0.5  ;;  %v8714_v56 = vmov %v8713_v15  ;;  %v2406_v17 = vmul.f32 %v5583_v59, %v8713_v15  ;;  %v2878_v60 = vpack.c.bf16 %v2784_v40, %v7330_v25  ;;  %v8715_v59 = vld [vmem:[#allocation93_spill] sm:$0xff]  ;;  %v8716_v25 = vld [vmem:[#allocation106_spill] sm:$0xff] }
 0x2ab   : > { %v2256_v32 = vmul.f32 %v7315_v46, %v2159_v42  ;;  %v7350_v13 = vmul.f32 %v7318_v30, %v2690_v35  ;;  %v2689_v18 = vsub.f32 %v2401_v36, %v4974_v23  ;;  %5674 = vmatmul.mubr.msk.bf16.vlgmr.msra.gmra.mxu1 %vm732_vm0, %v2349_v48  ;;  %v946_v58 = vpop.f32.mrf.mxu1  ;;  %v5584_v27 = vpop.f32.mrf.mxu0  ;;  %v2688_v43 = vsub.f32 %v2400_v21, %v4973_v47  ;;  %v8717_v21 = vld [vmem:[#allocation91_spill] sm:$0xff] }
 0x2ac   : > { %v2257_v20 = vmul.f32 %v7315_v46, %v2160_v44  ;;  %v4979_v61 = vclamps-f32 %v2406_v17, 0.5  ;;  %v2877_v12 = vpack.c.bf16 %v2782_v51, %v2781_v49  ;;  %v2351_v62 = vpack.c.bf16 %v2259_v10, %v2258_v19  ;;  %v8719_v10 = vld [vmem:[#allocation109_spill] sm:$0xff] }
 0x2ad   : > { %v2165_v26 = vsub.f32 %v1877_v22, %v4883_v63  ;;  %v1878_v15 = vmul.f32 %v5484_v37, %v8715_v59  ;;  %v2404_v40 = vmul.f32 %v1516_v16, %v8716_v25  ;;  %v5487_v42 = vpop.f32.mrf.mxu1  ;;  %v1519_v9 = vpop.f32.mrf.mxu0  ;;  %v2788_v35 = vmul.f32 %v7318_v30, %v2691_v29  ;;  %v8721_v22 = vld [vmem:[#allocation96_spill] sm:$0xff]  ;;  %v8723_v29 = vld [vmem:[#allocation107_spill] sm:$0xff] }
 0x2ae   : > { %v2786_v36 = vmul.f32 %v7318_v30, %v2689_v18  ;;  %v2163_v48 = vsub.f32 %v1875_v11, %v4881_v14  ;;  %5773 = vmatprep.mubr.msk.bf16.mxu0 %vm732_vm0, %v2877_v12  ;;  %v8718_v47 = vmov %v8717_v21  ;;  %v1876_v23 = vmul.f32 %v946_v58, %v8717_v21 }
 0x2af   : > { %v4884_v44 = vclamps-f32 %v1878_v15, 0.5  ;;  %v4977_v8 = vclamps-f32 %v2404_v40, 0.5  ;;  %5774 = vmatmul.mubr.msk.bf16.vlgmr.msra.gmra.mxu0 %vm732_vm0, %v2878_v60  ;;  %v8720_v49 = vmov %v8719_v10  ;;  %v2407_v51 = vmul.f32 %v5584_v27, %v8719_v10  ;;  %v959_v16 = vpop.f32.mrf.mxu1  ;;  %v5587_v19 = vpop.f32.mrf.mxu0  ;;  %v8724_v60 = vld [vmem:[#allocation94_spill] sm:$0xff] }
 0x2b0   : > { %v8722_v63 = vmov %v8721_v22  ;;  %v1881_v37 = vmul.f32 %v5487_v42, %v8721_v22  ;;  %v2694_v7 = vsub.f32 %v2406_v17, %v4979_v61  ;;  %v4882_v6 = vclamps-f32 %v1876_v23, 0.5  ;;  %v8725_v42 = vld [vmem:[#allocation112_spill] sm:$0xff] }
 0x2b1   : > { %v2405_v5 = vmul.f32 %v1519_v9, %v8723_v29  ;;  %v2350_v18 = vpack.c.bf16 %v2257_v20, %v2256_v32  ;;  %v2166_v11 = vsub.f32 %v1878_v15, %v4884_v44  ;;  %v2692_v14 = vsub.f32 %v2404_v40, %v4977_v8  ;;  %v5488_v58 = vpop.f32.mrf.mxu1  ;;  %v1532_v21 = vpop.f32.mrf.mxu0 }
 0x2b2   : > { %v4980_v12 = vclamps-f32 %v2407_v51, 0.5  ;;  %v4887_v4 = vclamps-f32 %v1881_v37, 0.5  ;;  %v2164_v3 = vsub.f32 %v1876_v23, %v4882_v6  ;;  %v1879_v27 = vmul.f32 %v959_v16, %v8724_v60 }
 0x2b3   : > { %v4978_v2 = vclamps-f32 %v2405_v5, 0.5  ;;  %5677 = vmatprep.mubr.msk.bf16.mxu1 %vm732_vm0, %v2350_v18  ;;  %v2410_v10 = vmul.f32 %v5587_v19, %v8725_v42  ;;  %v2785_v17 = vmul.f32 %v7318_v30, %v2688_v43  ;;  %v2262_v61 = vmul.f32 %v7315_v46, %v2165_v26  ;;  %v962_v8 = vpop.f32.mrf.mxu1  ;;  %v5588_v20 = vpop.f32.mrf.mxu0 }
 0x2b4   : > { %v2263_v9 = vmul.f32 %v7315_v46, %v2166_v11  ;;  %v2695_v32 = vsub.f32 %v2407_v51, %v4980_v12  ;;  %5678 = vmatmul.mubr.msk.bf16.gmra.mxu1 %vm732_vm0, %v2351_v62  ;;  %v2880_v6 = vpack.c.bf16 %v2788_v35, %v7350_v13  ;;  %v2260_v15 = vmul.f32 %v7315_v46, %v2163_v48  ;;  %v8726_v11 = vld [vmem:[#allocation97_spill] sm:$0xff] }
 0x2b5   : > { %v4885_v40 = vclamps-f32 %v1879_v27, 0.5  ;;  %v4983_v23 = vclamps-f32 %v2410_v10, 0.5  ;;  %v7374_v44 = vmul.f32 %v7318_v30, %v2694_v7  ;;  %v7377_v43 = vmul.f32 %v7318_v30, %v2692_v14  ;;  %v5491_v16 = vpop.f32.mrf.mxu1  ;;  %v1535_v51 = vpop.f32.mrf.mxu0  ;;  %v8728_v7 = vld [vmem:[#allocation110_spill] sm:$0xff] }
 0x2b6   : > { %v2169_v26 = vsub.f32 %v1881_v37, %v4887_v4  ;;  %v2879_v22 = vpack.c.bf16 %v2786_v36, %v2785_v17  ;;  %v2353_v19 = vpack.c.bf16 %v2263_v9, %v2262_v61  ;;  %v2261_v62 = vmul.f32 %v7315_v46, %v2164_v3 }
 0x2b7   : > { %v2693_v18 = vsub.f32 %v2405_v5, %v4978_v2  ;;  %v8727_v42 = vmov %v8726_v11  ;;  %v1882_v13 = vmul.f32 %v5488_v58, %v8726_v11  ;;  %v7382_v35 = vmul.f32 %v7318_v30, %v2695_v32  ;;  %v975_v36 = vpop.f32.mrf.mxu1  ;;  %v5591_v37 = vpop.f32.mrf.mxu0  ;;  %v8734_v32 = vld [vmem:[#allocation111_spill] sm:$0xff] }
 0x2b8   : > { %5777 = vmatprep.mubr.msk.bf16.mxu0 %vm732_vm0, %v2879_v22  ;;  %v8729_v48 = vmov %v8728_v7  ;;  %v2408_v12 = vmul.f32 %v1532_v21, %v8728_v7  ;;  %v8731_v60 = vmov %v8730_v1  ;;  %v1880_v14 = vmul.f32 %v962_v8, %v8730_v1 }
 0x2b9   : > { %v8733_v29 = vmov %v8732_v0  ;;  %v2411_v4 = vmul.f32 %v5588_v20, %v8732_v0  ;;  %v2167_v17 = vsub.f32 %v1879_v27, %v4885_v40  ;;  %v2698_v61 = vsub.f32 %v2410_v10, %v4983_v23  ;;  %5778 = vmatmul.mubr.msk.bf16.gmra.mxu0 %vm732_vm0, %v2880_v6  ;;  %v5492_v11 = vpop.f32.mrf.mxu1  ;;  %v1548_v21 = vpop.f32.mrf.mxu0 }
 0x2ba   : > { %v4888_v9 = vclamps-f32 %v1882_v13, 0.5  ;;  %v1885_v2 = vmul.f32 %v5491_v16, %v8636_v57  ;;  %v4981_v3 = vclamps-f32 %v2408_v12, 0.5  ;;  %v4886_v5 = vclamps-f32 %v1880_v14, 0.5 }
 0x2bb   : > { %v4984_v58 = vclamps-f32 %v2411_v4, 0.5  ;;  %v2409_v22 = vmul.f32 %v1535_v51, %v8734_v32  ;;  %v2352_v8 = vpack.c.bf16 %v2261_v62, %v2260_v15  ;;  %v1883_v0 = vmul.f32 %v975_v36, %v8693_v52  ;;  %v978_v6 = vpop.f32.mrf.mxu1  ;;  %v5592_v23 = vpop.f32.mrf.mxu0 }
 0x2bc   : > { %v2170_v7 = vsub.f32 %v1882_v13, %v4888_v9  ;;  %v4891_v1 = vclamps-f32 %v1885_v2, 0.5  ;;  %v2790_v27 = vmul.f32 %v7318_v30, %v2693_v18  ;;  %v2168_v10 = vsub.f32 %v1880_v14, %v4886_v5 }
 0x2bd   : > { %v2699_v20 = vsub.f32 %v2411_v4, %v4984_v58  ;;  %v4982_v40 = vclamps-f32 %v2409_v22, 0.5  ;;  %v2266_v16 = vmul.f32 %v7315_v46, %v2169_v26  ;;  %5681 = vmatprep.mubr.msk.bf16.mxu1 %vm732_vm0, %v2352_v8  ;;  %v4889_v51 = vclamps-f32 %v1883_v0, 0.5  ;;  %v5495_v4 = vpop.f32.mrf.mxu1  ;;  %v1551_v26 = vpop.f32.mrf.mxu0 }
 0x2be   : > { %v2267_v57 = vmul.f32 %v7315_v46, %v2170_v7  ;;  %v2414_v13 = vmul.f32 %v5591_v37, %v8694_v28  ;;  %v2882_v15 = vpack.c.bf16 %v7382_v35, %v7374_v44  ;;  %v2264_v62 = vmul.f32 %v7315_v46, %v2167_v17  ;;  %5682 = vmatmul.mubr.msk.bf16.gmra.mxu1 %vm732_vm0, %v2353_v19 }
 0x2bf   : > { %v7401_v18 = vmul.f32 %v7318_v30, %v2698_v61  ;;  %v2697_v14 = vsub.f32 %v2409_v22, %v4982_v40  ;;  %v2696_v36 = vsub.f32 %v2408_v12, %v4981_v3  ;;  %v2265_v9 = vmul.f32 %v7315_v46, %v2168_v10  ;;  %v991_v17 = vpop.f32.mrf.mxu1  ;;  %v5595_v61 = vpop.f32.mrf.mxu0 }
 0x2c0   : > { %v2173_v5 = vsub.f32 %v1885_v2, %v4891_v1  ;;  %v4987_v58 = vclamps-f32 %v2414_v13, 0.5  ;;  %v2355_v7 = vpack.c.bf16 %v2267_v57, %v2266_v16  ;;  %v7406_v37 = vmul.f32 %v7318_v30, %v2699_v20 }
 0x2c1   : > { %v2881_v44 = vpack.c.bf16 %v2790_v27, %v7377_v43  ;;  %v1886_v35 = vmul.f32 %v5492_v11, %v8695_v34  ;;  %v2794_v22 = vmul.f32 %v7318_v30, %v2697_v14  ;;  %v2171_v19 = vsub.f32 %v1883_v0, %v4889_v51  ;;  %v5496_v1 = vpop.f32.mrf.mxu1  ;;  %v1564_v11 = vpop.f32.mrf.mxu0 }
 0x2c2   : > { %v2412_v8 = vmul.f32 %v1548_v21, %v8696_v39  ;;  %v1884_v12 = vmul.f32 %v978_v6, %v8697_v33  ;;  %v2415_v57 = vmul.f32 %v5592_v23, %v8698_v38  ;;  %v1889_v3 = vmul.f32 %v5495_v4, %v8699_v41  ;;  %v8735_v4 = vld [vmem:[#allocation86_spill] sm:$0xff] }
 0x2c3   : > { %5781 = vmatprep.mubr.msk.bf16.mxu0 %vm732_vm0, %v2881_v44  ;;  %v4892_v2 = vclamps-f32 %v1886_v35, 0.5  ;;  %v2413_v43 = vmul.f32 %v1551_v26, %v8700_v50  ;;  %v2702_v27 = vsub.f32 %v2414_v13, %v4987_v58  ;;  %v2354_v20 = vpack.c.bf16 %v2265_v9, %v2264_v62  ;;  %v994_v51 = vpop.f32.mrf.mxu1  ;;  %v5596_v14 = vpop.f32.mrf.mxu0  ;;  %v8737_v50 = vld [vmem:[#allocation104_spill] sm:$0xff] }
 0x2c4   : > { %v4985_v10 = vclamps-f32 %v2412_v8, 0.5  ;;  %5782 = vmatmul.mubr.msk.bf16.gmra.mxu0 %vm732_vm0, %v2882_v15  ;;  %v4890_v0 = vclamps-f32 %v1884_v12, 0.5  ;;  %v4988_v40 = vclamps-f32 %v2415_v57, 0.5  ;;  %v4895_v6 = vclamps-f32 %v1889_v3, 0.5 }
 0x2c5   : > { %v2174_v21 = vsub.f32 %v1886_v35, %v4892_v2  ;;  %v4986_v16 = vclamps-f32 %v2413_v43, 0.5  ;;  %5685 = vmatprep.mubr.msk.bf16.mxu1 %vm732_vm0, %v2354_v20  ;;  %v8736_v41 = vmov %v8735_v4  ;;  %v1887_v26 = vmul.f32 %v991_v17, %v8735_v4  ;;  %v5499_v58 = vpop.f32.mrf.mxu1  ;;  %v1567_v35 = vpop.f32.mrf.mxu0 }
 0x2c6   : > { %v2700_v44 = vsub.f32 %v2412_v8, %v4985_v10  ;;  %v2172_v23 = vsub.f32 %v1884_v12, %v4890_v0  ;;  %v2418_v38 = vmul.f32 %v5595_v61, %v8737_v50  ;;  %v2793_v13 = vmul.f32 %v7318_v30, %v2696_v36  ;;  %5686 = vmatmul.mubr.msk.bf16.gmra.mxu1 %vm732_vm0, %v2355_v7 }
 0x2c7   : > { %v2270_v15 = vmul.f32 %v7315_v46, %v2173_v5  ;;  %v2271_v62 = vmul.f32 %v7315_v46, %v2174_v21  ;;  %v2703_v9 = vsub.f32 %v2415_v57, %v4988_v40  ;;  %v2884_v8 = vpack.c.bf16 %v7406_v37, %v7401_v18  ;;  %v1007_v57 = vpop.f32.mrf.mxu1  ;;  %v5599_v0 = vpop.f32.mrf.mxu0  ;;  %v8738_v40 = vld [vmem:[#allocation89_spill] sm:$0xff] }
 0x2c8   : > { %v2268_v12 = vmul.f32 %v7315_v46, %v2171_v19  ;;  %v4893_v2 = vclamps-f32 %v1887_v26, 0.5  ;;  %v4991_v17 = vclamps-f32 %v2418_v38, 0.5  ;;  %v7429_v61 = vmul.f32 %v7318_v30, %v2702_v27 }
 0x2c9   : > { %v7432_v36 = vmul.f32 %v7318_v30, %v2700_v44  ;;  %v2177_v5 = vsub.f32 %v1889_v3, %v4895_v6  ;;  %v2701_v10 = vsub.f32 %v2413_v43, %v4986_v16  ;;  %v2357_v7 = vpack.c.bf16 %v2271_v62, %v2270_v15  ;;  %v5500_v4 = vpop.f32.mrf.mxu1  ;;  %v1580_v3 = vpop.f32.mrf.mxu0 }
 0x2ca   : > { %v2269_v20 = vmul.f32 %v7315_v46, %v2172_v23  ;;  %v2883_v21 = vpack.c.bf16 %v2794_v22, %v2793_v13  ;;  %v1890_v18 = vmul.f32 %v5496_v1, %v8738_v40  ;;  %v7437_v37 = vmul.f32 %v7318_v30, %v2703_v9 }
 0x2cb   : > { %v2416_v19 = vmul.f32 %v1564_v11, %v8704_v24  ;;  %v1888_v27 = vmul.f32 %v994_v51, %v8705_v54  ;;  %v2419_v44 = vmul.f32 %v5596_v14, %v8707_v31  ;;  %v2175_v43 = vsub.f32 %v1887_v26, %v4893_v2  ;;  %v1010_v15 = vpop.f32.mrf.mxu1  ;;  %v5600_v51 = vpop.f32.mrf.mxu0 }
 0x2cc   : > { %v2706_v6 = vsub.f32 %v2418_v38, %v4991_v17  ;;  %5785 = vmatprep.mubr.msk.bf16.mxu0 %vm732_vm0, %v2883_v21  ;;  %v4896_v16 = vclamps-f32 %v1890_v18, 0.5  ;;  %v1893_v22 = vmul.f32 %v5499_v58, %v8709_v45  ;;  %v2417_v11 = vmul.f32 %v1567_v35, %v8711_v53 }
 0x2cd   : > { %v4989_v23 = vclamps-f32 %v2416_v19, 0.5  ;;  %5786 = vmatmul.mubr.msk.bf16.gmra.mxu0 %vm732_vm0, %v2884_v8  ;;  %v4894_v1 = vclamps-f32 %v1888_v27, 0.5  ;;  %v4992_v13 = vclamps-f32 %v2419_v44, 0.5  ;;  %v2356_v9 = vpack.c.bf16 %v2269_v20, %v2268_v12  ;;  %v5503_v58 = vpop.f32.mrf.mxu1  ;;  %v1583_v45 = vpop.f32.mrf.mxu0 }
 0x2ce   : > { %v2178_v62 = vsub.f32 %v1890_v18, %v4896_v16  ;;  %v4899_v14 = vclamps-f32 %v1893_v22, 0.5  ;;  %v1891_v26 = vmul.f32 %v1007_v57, %v8712_v55  ;;  %v2798_v38 = vmul.f32 %v7318_v30, %v2701_v10 }
 0x2cf   : > { %v2176_v2 = vsub.f32 %v1888_v27, %v4894_v1  ;;  %v2707_v17 = vsub.f32 %v2419_v44, %v4992_v13  ;;  %v4990_v21 = vclamps-f32 %v2417_v11, 0.5  ;;  %v2274_v8 = vmul.f32 %v7315_v46, %v2177_v5  ;;  %5689 = vmatprep.mubr.msk.bf16.mxu1 %vm732_vm0, %v2356_v9  ;;  %v1023_v27 = vpop.f32.mrf.mxu1  ;;  %v5603_v5 = vpop.f32.mrf.mxu0 }
 0x2d0   : > { %v2275_v31 = vmul.f32 %v7315_v46, %v2178_v62  ;;  %v4897_v35 = vclamps-f32 %v1891_v26, 0.5  ;;  %v2422_v18 = vmul.f32 %v5599_v0, %v8714_v56  ;;  %v2886_v12 = vpack.c.bf16 %v7437_v37, %v7429_v61  ;;  %5690 = vmatmul.mubr.msk.bf16.gmra.mxu1 %vm732_vm0, %v2357_v7 }
 0x2d1   : > { %v2272_v57 = vmul.f32 %v7315_v46, %v2175_v43  ;;  %v7456_v10 = vmul.f32 %v7318_v30, %v2706_v6  ;;  %v2705_v20 = vsub.f32 %v2417_v11, %v4990_v21  ;;  %v2704_v44 = vsub.f32 %v2416_v19, %v4989_v23  ;;  %v5504_v43 = vpop.f32.mrf.mxu1  ;;  %v1596_v6 = vpop.f32.mrf.mxu0 }
 0x2d2   : > { %v2273_v16 = vmul.f32 %v7315_v46, %v2176_v2  ;;  %v2181_v1 = vsub.f32 %v1893_v22, %v4899_v14  ;;  %v4995_v13 = vclamps-f32 %v2422_v18, 0.5  ;;  %v2359_v62 = vpack.c.bf16 %v2275_v31, %v2274_v8  ;;  %v8739_v14 = vld [vmem:[#allocation107_spill] sm:$0xff] }
 0x2d3   : > { %v7461_v0 = vmul.f32 %v7318_v30, %v2707_v17  ;;  %v2885_v61 = vpack.c.bf16 %v2798_v38, %v7432_v36  ;;  %v1894_v37 = vmul.f32 %v5500_v4, %v8715_v59  ;;  %v2802_v11 = vmul.f32 %v7318_v30, %v2705_v20  ;;  %v1026_v38 = vpop.f32.mrf.mxu1  ;;  %v5604_v4 = vpop.f32.mrf.mxu0 }
 0x2d4   : > { %v2179_v7 = vsub.f32 %v1891_v26, %v4897_v35  ;;  %v2420_v9 = vmul.f32 %v1580_v3, %v8716_v25  ;;  %v1892_v19 = vmul.f32 %v1010_v15, %v8718_v47  ;;  %v2423_v31 = vmul.f32 %v5600_v51, %v8720_v49 }
 0x2d5   : > { %5789 = vmatprep.mubr.msk.bf16.mxu0 %vm732_vm0, %v2885_v61  ;;  %v4900_v22 = vclamps-f32 %v1894_v37, 0.5  ;;  %v1897_v23 = vmul.f32 %v5503_v58, %v8722_v63  ;;  %v2421_v36 = vmul.f32 %v1583_v45, %v8739_v14  ;;  %v2710_v2 = vsub.f32 %v2422_v18, %v4995_v13  ;;  %v5507_v20 = vpop.f32.mrf.mxu1  ;;  %v1599_v61 = vpop.f32.mrf.mxu0  ;;  %v8740_v58 = vld [vmem:[#allocation94_spill] sm:$0xff]  ;;  %v8741_v14 = vld [vmem:[#allocation112_spill] sm:$0xff] }
 0x2d6   : > { %v4993_v17 = vclamps-f32 %v2420_v9, 0.5  ;;  %5790 = vmatmul.mubr.msk.bf16.gmra.mxu0 %vm732_vm0, %v2886_v12  ;;  %v4898_v26 = vclamps-f32 %v1892_v19, 0.5  ;;  %v2358_v21 = vpack.c.bf16 %v2273_v16, %v2272_v57  ;;  %v4996_v8 = vclamps-f32 %v2423_v31, 0.5 }
 0x2d7   : > { %v2182_v3 = vsub.f32 %v1894_v37, %v4900_v22  ;;  %v4903_v15 = vclamps-f32 %v1897_v23, 0.5  ;;  %v4994_v35 = vclamps-f32 %v2421_v36, 0.5  ;;  %v1895_v45 = vmul.f32 %v1023_v27, %v8740_v58  ;;  %v1039_v13 = vpop.f32.mrf.mxu1  ;;  %v5607_v37 = vpop.f32.mrf.mxu0 }
 0x2d8   : > { %v2708_v47 = vsub.f32 %v2420_v9, %v4993_v17  ;;  %v2180_v51 = vsub.f32 %v1892_v19, %v4898_v26  ;;  %5693 = vmatprep.mubr.msk.bf16.mxu1 %vm732_vm0, %v2358_v21  ;;  %v8742_v56 = vmov %v8741_v14  ;;  %v2426_v63 = vmul.f32 %v5603_v5, %v8741_v14 }
 0x2d9   : > { %v2801_v18 = vmul.f32 %v7318_v30, %v2704_v44  ;;  %v2278_v12 = vmul.f32 %v7315_v46, %v2181_v1  ;;  %v2279_v57 = vmul.f32 %v7315_v46, %v2182_v3  ;;  %v2711_v16 = vsub.f32 %v2423_v31, %v4996_v8  ;;  %5694 = vmatmul.mubr.msk.bf16.gmra.mxu1 %vm732_vm0, %v2359_v62  ;;  %v5508_v31 = vpop.f32.mrf.mxu1  ;;  %v1612_v26 = vpop.f32.mrf.mxu0 }
 0x2da   : > { %v2888_v9 = vpack.c.bf16 %v7461_v0, %v7456_v10  ;;  %v2276_v19 = vmul.f32 %v7315_v46, %v2179_v7  ;;  %v4901_v22 = vclamps-f32 %v1895_v45, 0.5  ;;  %v4999_v27 = vclamps-f32 %v2426_v63, 0.5 }
 0x2db   : > { %v7484_v5 = vmul.f32 %v7318_v30, %v2710_v2  ;;  %v7487_v44 = vmul.f32 %v7318_v30, %v2708_v47  ;;  %v2185_v1 = vsub.f32 %v1897_v23, %v4903_v15  ;;  %v2709_v17 = vsub.f32 %v2421_v36, %v4994_v35  ;;  %v1042_v8 = vpop.f32.mrf.mxu1  ;;  %v5608_v23 = vpop.f32.mrf.mxu0 }
 0x2dc   : > { %v2361_v62 = vpack.c.bf16 %v2279_v57, %v2278_v12  ;;  %v2277_v21 = vmul.f32 %v7315_v46, %v2180_v51  ;;  %v2887_v3 = vpack.c.bf16 %v2802_v11, %v2801_v18  ;;  %v1898_v10 = vmul.f32 %v5504_v43, %v8727_v42  ;;  %v8743_v51 = vld [vmem:[#allocation84_spill] sm:$0xff] }
 0x2dd   : > { %v7492_v0 = vmul.f32 %v7318_v30, %v2711_v16  ;;  %v2424_v7 = vmul.f32 %v1596_v6, %v8729_v48  ;;  %v1896_v2 = vmul.f32 %v1026_v38, %v8731_v60  ;;  %v2427_v47 = vmul.f32 %v5604_v4, %v8733_v29  ;;  %v5511_v12 = vpop.f32.mrf.mxu1  ;;  %v1615_v38 = vpop.f32.mrf.mxu0 }
 0x2de   : > { %v2183_v36 = vsub.f32 %v1895_v45, %v4901_v22  ;;  %v2714_v15 = vsub.f32 %v2426_v63, %v4999_v27  ;;  %5793 = vmatprep.mubr.msk.bf16.mxu0 %vm732_vm0, %v2887_v3  ;;  %v4904_v35 = vclamps-f32 %v1898_v10, 0.5  ;;  %v1901_v11 = vmul.f32 %v5507_v20, %v8743_v51 }
 0x2df   : > { %v4997_v14 = vclamps-f32 %v2424_v7, 0.5  ;;  %5794 = vmatmul.mubr.msk.bf16.gmra.mxu0 %vm732_vm0, %v2888_v9  ;;  %v4902_v43 = vclamps-f32 %v1896_v2, 0.5  ;;  %v5000_v18 = vclamps-f32 %v2427_v47, 0.5  ;;  %v2425_v6 = vmul.f32 %v1599_v61, %v8734_v32  ;;  %v1055_v20 = vpop.f32.mrf.mxu1  ;;  %v5611_v51 = vpop.f32.mrf.mxu0 }
 0x2e0   : > { %v2186_v57 = vsub.f32 %v1898_v10, %v4904_v35  ;;  %v4907_v4 = vclamps-f32 %v1901_v11, 0.5  ;;  %v2360_v16 = vpack.c.bf16 %v2277_v21, %v2276_v19  ;;  %v1899_v45 = vmul.f32 %v1039_v13, %v8693_v52 }
 0x2e1   : > { %v2806_v63 = vmul.f32 %v7318_v30, %v2709_v17  ;;  %v2184_v22 = vsub.f32 %v1896_v2, %v4902_v43  ;;  %v2715_v27 = vsub.f32 %v2427_v47, %v5000_v18  ;;  %v4998_v3 = vclamps-f32 %v2425_v6, 0.5  ;;  %v5512_v2 = vpop.f32.mrf.mxu1 }
 0x2e2   : > { %v2282_v9 = vmul.f32 %v7315_v46, %v2185_v1  ;;  %v2283_v29 = vmul.f32 %v7315_v46, %v2186_v57  ;;  %5697 = vmatprep.mubr.msk.bf16.mxu1 %vm732_vm0, %v2360_v16  ;;  %v4905_v61 = vclamps-f32 %v1899_v45, 0.5  ;;  %v2430_v10 = vmul.f32 %v5607_v37, %v8694_v28  ;;  %v1628_v1 = vpop.f32.mrf.mxu0 }
 0x2e3   : > { %v2890_v19 = vpack.c.bf16 %v7492_v0, %v7484_v5  ;;  %v2280_v13 = vmul.f32 %v7315_v46, %v2183_v36  ;;  %v7511_v17 = vmul.f32 %v7318_v30, %v2714_v15  ;;  %v2713_v21 = vsub.f32 %v2425_v6, %v4998_v3  ;;  %5698 = vmatmul.mubr.msk.bf16.gmra.mxu1 %vm732_vm0, %v2361_v62  ;;  %v1058_v36 = vpop.f32.mrf.mxu1  ;;  %v8747_v3 = vld [vmem:[#allocation99_spill] sm:$0xff] }
 0x2e4   : > { %v2712_v47 = vsub.f32 %v2424_v7, %v4997_v14  ;;  %v2281_v35 = vmul.f32 %v7315_v46, %v2184_v22  ;;  %v2189_v43 = vsub.f32 %v1901_v11, %v4907_v4  ;;  %v5003_v18 = vclamps-f32 %v2430_v10, 0.5  ;;  %v5612_v15 = vpop.f32.mrf.mxu0  ;;  %v8745_v4 = vld [vmem:[#allocation88_spill] sm:$0xff] }
 0x2e5   : > { %v2363_v57 = vpack.c.bf16 %v2283_v29, %v2282_v9  ;;  %v7516_v37 = vmul.f32 %v7318_v30, %v2715_v27  ;;  %v2889_v5 = vpack.c.bf16 %v2806_v63, %v7487_v44  ;;  %v1902_v0 = vmul.f32 %v5508_v31, %v8695_v34  ;;  %v8744_v29 = vld [vmem:[#allocation101_spill] sm:$0xff]  ;;  %v5515_v63 = vpop.f32.mrf.mxu1 }
 0x2e6   : > { %v2810_v6 = vmul.f32 %v7318_v30, %v2713_v21  ;;  %v2187_v62 = vsub.f32 %v1899_v45, %v4905_v61  ;;  %v2428_v16 = vmul.f32 %v1612_v26, %v8696_v39  ;;  %v1900_v7 = vmul.f32 %v1042_v8, %v8697_v33  ;;  %v1631_v31 = vpop.f32.mrf.mxu0 }
 0x2e7   : > { %5797 = vmatprep.mubr.msk.bf16.mxu0 %vm732_vm0, %v2889_v5  ;;  %v4908_v11 = vclamps-f32 %v1902_v0, 0.5  ;;  %v2431_v14 = vmul.f32 %v5608_v23, %v8744_v29  ;;  %v8746_v27 = vmov %v8745_v4  ;;  %v1905_v22 = vmul.f32 %v5511_v12, %v8745_v4  ;;  %v1071_v5 = vpop.f32.mrf.mxu1 }
 0x2e8   : > { %v8748_v28 = vmov %v8747_v3  ;;  %v2429_v44 = vmul.f32 %v1615_v38, %v8747_v3  ;;  %v2718_v9 = vsub.f32 %v2430_v10, %v5003_v18  ;;  %v5001_v34 = vclamps-f32 %v2428_v16, 0.5  ;;  %5798 = vmatmul.mubr.msk.bf16.gmra.mxu0 %vm732_vm0, %v2890_v19  ;;  %v5615_v39 = vpop.f32.mrf.mxu0 }
 0x2e9   : > { %v4906_v45 = vclamps-f32 %v1900_v7, 0.5  ;;  %v2362_v61 = vpack.c.bf16 %v2281_v35, %v2280_v13  ;;  %v2190_v26 = vsub.f32 %v1902_v0, %v4908_v11  ;;  %v5004_v21 = vclamps-f32 %v2431_v14, 0.5  ;;  %v7535_v18 = vpop.f32.mrf.mxu1 }
 0x2ea   : > { %v4911_v8 = vclamps-f32 %v1905_v22, 0.5  ;;  %v5002_v33 = vclamps-f32 %v2429_v44, 0.5  ;;  %v2716_v52 = vsub.f32 %v2428_v16, %v5001_v34  ;;  %v1903_v12 = vmul.f32 %v1055_v20, %v8736_v41  ;;  %v7537_v0 = vpop.f32.mrf.mxu0 }
 0x2eb   : > { %v2188_v23 = vsub.f32 %v1900_v7, %v4906_v45  ;;  %5701 = vmatprep.mubr.msk.bf16.mxu1 %vm732_vm0, %v2362_v61  ;;  %v2434_v38 = vmul.f32 %v5611_v51, %v8737_v50  ;;  %v2809_v10 = vmul.f32 %v7318_v30, %v2712_v47  ;;  %v2286_v19 = vmul.f32 %v7315_v46, %v2189_v43  ;;  %v8749_v61 = vld [vmem:[#allocation105_spill] sm:$0xff] }
 0x2ec   : > { %v2287_v13 = vmul.f32 %v7315_v46, %v2190_v26  ;;  %v2719_v35 = vsub.f32 %v2431_v14, %v5004_v21  ;;  %5702 = vmatmul.mubr.msk.bf16.gmra.mxu1 %vm732_vm0, %v2363_v57  ;;  %v2892_v34 = vpack.c.bf16 %v7516_v37, %v7511_v17  ;;  %v2284_v20 = vmul.f32 %v7315_v46, %v2187_v62  ;;  %v1074_v57 = vpop.f32.mrf.mxu1  ;;  %v5616_v14 = vpop.f32.mrf.mxu0 }
 0x2ed   : > { %v4909_v16 = vclamps-f32 %v1903_v12, 0.5  ;;  %v5007_v51 = vclamps-f32 %v2434_v38, 0.5  ;;  %v7543_v47 = vmul.f32 %v7318_v30, %v2718_v9  ;;  %v7546_v43 = vmul.f32 %v7318_v30, %v2716_v52 }
 0x2ee   : > { %v2193_v7 = vsub.f32 %v1905_v22, %v4911_v8  ;;  %v2717_v11 = vsub.f32 %v2429_v44, %v5002_v33  ;;  %v2365_v4 = vpack.c.bf16 %v2287_v13, %v2286_v19  ;;  %v2285_v3 = vmul.f32 %v7315_v46, %v2188_v23  ;;  %v5519_v26 = vpop.f32.mrf.mxu1  ;;  %v1647_v22 = vpop.f32.mrf.mxu0  ;;  %v8750_v8 = vld [vmem:[#allocation92_spill] sm:$0xff] }
 0x2ef   : > { %v2891_v45 = vpack.c.bf16 %v2810_v6, %v2809_v10  ;;  %v1906_v17 = vmul.f32 %v5512_v2, %v8738_v40  ;;  %v7551_v37 = vmul.f32 %v7318_v30, %v2719_v35  ;;  %v2432_v62 = vmul.f32 %v1628_v1, %v8704_v24 }
 0x2f0   : > { %v1904_v9 = vmul.f32 %v1058_v36, %v8705_v54  ;;  %v2435_v52 = vmul.f32 %v5612_v15, %v8749_v61  ;;  %v2191_v33 = vsub.f32 %v1903_v12, %v4909_v16  ;;  %v2722_v44 = vsub.f32 %v2434_v38, %v5007_v51  ;;  %v1087_v19 = vpop.f32.mrf.mxu1  ;;  %v5619_v36 = vpop.f32.mrf.mxu0 }
 0x2f1   : > { %5801 = vmatprep.mubr.msk.bf16.mxu0 %vm732_vm0, %v2891_v45  ;;  %v4912_v21 = vclamps-f32 %v1906_v17, 0.5  ;;  %v8751_v50 = vmov %v8750_v8  ;;  %v1909_v6 = vmul.f32 %v5515_v63, %v8750_v8  ;;  %v5005_v23 = vclamps-f32 %v2432_v62, 0.5 }
 0x2f2   : > { %5802 = vmatmul.mubr.msk.bf16.gmra.mxu0 %vm732_vm0, %v2892_v34  ;;  %v4910_v2 = vclamps-f32 %v1904_v9, 0.5  ;;  %v5008_v10 = vclamps-f32 %v2435_v52, 0.5  ;;  %v2433_v1 = vmul.f32 %v1631_v31, %v8711_v53  ;;  %v2364_v35 = vpack.c.bf16 %v2285_v3, %v2284_v20  ;;  %v7562_v63 = vpop.f32.mrf.mxu1  ;;  %v7564_v8 = vpop.f32.mrf.mxu0 }
 0x2f3   : > { %v2194_v13 = vsub.f32 %v1906_v17, %v4912_v21  ;;  %v4915_v15 = vclamps-f32 %v1909_v6, 0.5  ;;  %v1907_v12 = vmul.f32 %v1071_v5, %v8712_v55  ;;  %v2814_v38 = vmul.f32 %v7318_v30, %v2717_v11  ;;  %v8752_v21 = vld [vmem:[#allocation108_spill] sm:$0xff] }
 0x2f4   : > { %v2192_v16 = vsub.f32 %v1904_v9, %v4910_v2  ;;  %v2723_v51 = vsub.f32 %v2435_v52, %v5008_v10  ;;  %v5006_v45 = vclamps-f32 %v2433_v1, 0.5  ;;  %v2290_v34 = vmul.f32 %v7315_v46, %v2193_v7  ;;  %5705 = vmatprep.mubr.msk.bf16.mxu1 %vm732_vm0, %v2364_v35  ;;  %v1090_v52 = vpop.f32.mrf.mxu1  ;;  %v5620_v7 = vpop.f32.mrf.mxu0 }
 0x2f5   : > { %v2291_v31 = vmul.f32 %v7315_v46, %v2194_v13  ;;  %v4913_v17 = vclamps-f32 %v1907_v12, 0.5  ;;  %v2438_v20 = vmul.f32 %v5615_v39, %v8752_v21  ;;  %v2894_v5 = vpack.c.bf16 %v7551_v37, %v7543_v47  ;;  %5706 = vmatmul.mubr.msk.bf16.gmra.mxu1 %vm732_vm0, %v2365_v4 }
 0x2f6   : > { %v2288_v11 = vmul.f32 %v7315_v46, %v2191_v33  ;;  %v7574_v3 = vmul.f32 %v7318_v30, %v2722_v44  ;;  %v2721_v9 = vsub.f32 %v2433_v1, %v5006_v45  ;;  %v2720_v2 = vsub.f32 %v2432_v62, %v5005_v23  ;;  %v5523_v33 = vpop.f32.mrf.mxu1  ;;  %v7584_v44 = vpop.f32.mrf.mxu0 }
 0x2f7   : > { %v2289_v10 = vmul.f32 %v7315_v46, %v2192_v16  ;;  %v2197_v13 = vsub.f32 %v1909_v6, %v4915_v15  ;;  %v5011_v35 = vclamps-f32 %v2438_v20, 0.5  ;;  %v2367_v53 = vpack.c.bf16 %v2291_v31, %v2290_v34  ;;  %v8753_v6 = vld [vmem:[#allocation91_spill] sm:$0xff] }
 0x2f8   : > { %v7579_v39 = vmul.f32 %v7318_v30, %v2723_v51  ;;  %v2893_v47 = vpack.c.bf16 %v2814_v38, %v7546_v43  ;;  %v1910_v37 = vmul.f32 %v7535_v18, %v8715_v59  ;;  %v2818_v4 = vmul.f32 %v7318_v30, %v2721_v9  ;;  %v8754_v43 = vld [vmem:[#allocation96_spill] sm:$0xff]  ;;  %v8755_v51 = vld [vmem:[#allocation107_spill] sm:$0xff]  ;;  %v1103_v34 = vpop.f32.mrf.mxu1  ;;  %v7594_v31 = vpop.f32.mrf.mxu0 }
 0x2f9   : > { %v2195_v1 = vsub.f32 %v1907_v12, %v4913_v17  ;;  %v2436_v62 = vmul.f32 %v7537_v0, %v8716_v25  ;;  %v1908_v23 = vmul.f32 %v1074_v57, %v8753_v6  ;;  %v2439_v16 = vmul.f32 %v5616_v14, %v8720_v49 }
 0x2fa   : > { %5805 = vmatprep.mubr.msk.bf16.mxu0 %vm732_vm0, %v2893_v47  ;;  %v4916_v15 = vclamps-f32 %v1910_v37, 0.5  ;;  %v1913_v38 = vmul.f32 %v5519_v26, %v8754_v43  ;;  %v2437_v18 = vmul.f32 %v1647_v22, %v8755_v51  ;;  %v2726_v21 = vsub.f32 %v2438_v20, %v5011_v35  ;;  %v7597_v45 = vpop.f32.mrf.mxu1  ;;  %v7599_v14 = vpop.f32.mrf.mxu0 }
 0x2fb   : > { %v5009_v9 = vclamps-f32 %v2436_v62, 0.5  ;;  %5806 = vmatmul.mubr.msk.bf16.gmra.mxu0 %vm732_vm0, %v2894_v5  ;;  %v4914_v12 = vclamps-f32 %v1908_v23, 0.5  ;;  %v2366_v0 = vpack.c.bf16 %v2289_v10, %v2288_v11  ;;  %v5012_v57 = vclamps-f32 %v2439_v16, 0.5 }
 0x2fc   : > { %v2198_v17 = vsub.f32 %v1910_v37, %v4916_v15  ;;  %v4919_v6 = vclamps-f32 %v1913_v38, 0.5  ;;  %v5010_v47 = vclamps-f32 %v2437_v18, 0.5  ;;  %v1911_v22 = vmul.f32 %v1087_v19, %v8740_v58  ;;  %v7608_v37 = vpop.f32.mrf.mxu1  ;;  %v7610_v15 = vpop.f32.mrf.mxu0 }
 0x2fd   : > { %v2724_v26 = vsub.f32 %v2436_v62, %v5009_v9  ;;  %v2196_v43 = vsub.f32 %v1908_v23, %v4914_v12  ;;  %5709 = vmatprep.mubr.msk.bf16.mxu1 %vm732_vm0, %v2366_v0  ;;  %v2442_v20 = vmul.f32 %v5619_v36, %v8742_v56  ;;  %v2817_v5 = vmul.f32 %v7318_v30, %v2720_v2 }
 0x2fe   : > { %v2294_v11 = vmul.f32 %v7315_v46, %v2197_v13  ;;  %v2295_v10 = vmul.f32 %v7315_v46, %v2198_v17  ;;  %v2727_v35 = vsub.f32 %v2439_v16, %v5012_v57  ;;  %5710 = vmatmul.mubr.msk.bf16.gmra.mxu1 %vm732_vm0, %v2367_v53  ;;  %v2896_v62 = vpack.c.bf16 %v7579_v39, %v7574_v3  ;;  %v7621_v53 = vpop.f32.mrf.mxu1  ;;  %v7623_v12 = vpop.f32.mrf.mxu0 }
 0x2ff   : > { %v2292_v19 = vmul.f32 %v7315_v46, %v2195_v1  ;;  %v4917_v23 = vclamps-f32 %v1911_v22, 0.5  ;;  %v5015_v36 = vclamps-f32 %v2442_v20, 0.5  ;;  %v7616_v2 = vmul.f32 %v7318_v30, %v2726_v21 }
 0x300   : > { %v7619_v13 = vmul.f32 %v7318_v30, %v2724_v26  ;;  %v2201_v16 = vsub.f32 %v1913_v38, %v4919_v6  ;;  %v2725_v9 = vsub.f32 %v2437_v18, %v5010_v47  ;;  %v2369_v0 = vpack.c.bf16 %v2295_v10, %v2294_v11  ;;  %v8756_v18 = vld [vmem:[#allocation113_spill] sm:$0xff]  ;;  %v7635_v47 = vpop.f32.mrf.mxu1  ;;  %v7637_v26 = vpop.f32.mrf.mxu0 }
 0x301   : > { %v2293_v17 = vmul.f32 %v7315_v46, %v2196_v43  ;;  %v2895_v3 = vpack.c.bf16 %v2818_v4, %v2817_v5  ;;  %v1914_v39 = vmul.f32 %v7562_v63, %v8727_v42  ;;  %v7629_v1 = vmul.f32 %v7318_v30, %v2727_v35  ;;  %v8757_v63 = vld [vmem:[#allocation84_spill] sm:$0xff] }
 0x302   : > { %v2440_v21 = vmul.f32 %v7564_v8, %v8729_v48  ;;  %v1912_v38 = vmul.f32 %v1090_v52, %v8731_v60  ;;  %v2443_v6 = vmul.f32 %v5620_v7, %v8756_v18  ;;  %v2199_v11 = vsub.f32 %v1911_v22, %v4917_v23  ;;  %v7644_v7 = vpop.f32.mrf.mxu1  ;;  %v7646_v18 = vpop.f32.mrf.mxu0  ;;  %v8758_v23 = vld [vmem:[#allocation82_spill] sm:$0xff] }
 0x303   : > { %v2730_v43 = vsub.f32 %v2442_v20, %v5015_v36  ;;  %5809 = vmatprep.mubr.msk.bf16.mxu0 %vm732_vm0, %v2895_v3  ;;  %v4920_v4 = vclamps-f32 %v1914_v39, 0.5  ;;  %v1917_v5 = vmul.f32 %v5523_v33, %v8757_v63  ;;  %v2441_v52 = vmul.f32 %v7584_v44, %v8734_v32 }
 0x304   : > { %v5013_v10 = vclamps-f32 %v2440_v21, 0.5  ;;  %5810 = vmatmul.mubr.msk.bf16.gmra.mxu0 %vm732_vm0, %v2896_v62  ;;  %v4918_v35 = vclamps-f32 %v1912_v38, 0.5  ;;  %v5016_v8 = vclamps-f32 %v2443_v6, 0.5  ;;  %v2368_v20 = vpack.c.bf16 %v2293_v17, %v2292_v19  ;;  %v7650_v62 = vpop.f32.mrf.mxu1  ;;  %v7652_v42 = vpop.f32.mrf.mxu0 }
 0x305   : > { %v2202_v57 = vsub.f32 %v1914_v39, %v4920_v4  ;;  %v4923_v22 = vclamps-f32 %v1917_v5, 0.5  ;;  %v8759_v36 = vmov %v8758_v23  ;;  %v1915_v3 = vmul.f32 %v1103_v34, %v8758_v23  ;;  %v8760_v4 = vld [vmem:[#allocation100_spill] sm:$0xff] }
 0x306   : > { %v2822_v60 = vmul.f32 %v7318_v30, %v2725_v9  ;;  %v2200_v33 = vsub.f32 %v1912_v38, %v4918_v35  ;;  %v2731_v63 = vsub.f32 %v2443_v6, %v5016_v8  ;;  %v5014_v48 = vclamps-f32 %v2441_v52, 0.5  ;;  %5713 = vmatprep.mubr.msk.bf16.mxu1 %vm732_vm0, %v2368_v20 }
 0x307   : > { %v2298_v44 = vmul.f32 %v7315_v46, %v2201_v16  ;;  %v2299_v32 = vmul.f32 %v7315_v46, %v2202_v57  ;;  %v4921_v39 = vclamps-f32 %v1915_v3, 0.5  ;;  %v2446_v19 = vmul.f32 %v7594_v31, %v8760_v4  ;;  %5714 = vmatmul.mubr.msk.bf16.gmra.mxu1 %vm732_vm0, %v2369_v0  ;;  %v7666_v16 = vpop.f32.mrf.mxu1  ;;  %v7668_v57 = vpop.f32.mrf.mxu0 }
 0x308   : > { %v2898_v34 = vpack.c.bf16 %v7629_v1, %v7616_v2  ;;  %v2296_v9 = vmul.f32 %v7315_v46, %v2199_v11  ;;  %v7663_v17 = vmul.f32 %v7318_v30, %v2730_v43  ;;  %v2729_v38 = vsub.f32 %v2441_v52, %v5014_v48  ;;  %v8761_v11 = vld [vmem:[#allocation85_spill] sm:$0xff] }
 0x309   : > { %v2728_v6 = vsub.f32 %v2440_v21, %v5013_v10  ;;  %v2297_v35 = vmul.f32 %v7315_v46, %v2200_v33  ;;  %v2205_v8 = vsub.f32 %v1917_v5, %v4923_v22  ;;  %v5019_v31 = vclamps-f32 %v2446_v19, 0.5  ;;  %v7677_v52 = vpop.f32.mrf.mxu1  ;;  %v7679_v0 = vpop.f32.mrf.mxu0  ;;  %v8763_v10 = vld [vmem:[#allocation98_spill] sm:$0xff]  ;;  %v8765_v22 = vld [vmem:[#allocation83_spill] sm:$0xff] }
 0x30a   : > { %v2371_v20 = vpack.c.bf16 %v2299_v32, %v2298_v44  ;;  %v7672_v2 = vmul.f32 %v7318_v30, %v2731_v63  ;;  %v2897_v1 = vpack.c.bf16 %v2822_v60, %v7619_v13  ;;  %v8762_v43 = vmov %v8761_v11 }
 0x30b   : > { %v1918_v48 = vmul.f32 %v7597_v45, %v8761_v11  ;;  %v2826_v23 = vmul.f32 %v7318_v30, %v2729_v38  ;;  %v2203_v21 = vsub.f32 %v1915_v3, %v4921_v39  ;;  %v8764_v56 = vmov %v8763_v10  ;;  %v7693_v44 = vpop.f32.mrf.mxu1  ;;  %v7695_v3 = vpop.f32.mrf.mxu0 }
 0x30c   : > { %v2444_v5 = vmul.f32 %v7599_v14, %v8763_v10  ;;  %v8766_v33 = vmov %v8765_v22  ;;  %v1916_v32 = vmul.f32 %v7608_v37, %v8765_v22  ;;  %5813 = vmatprep.mubr.msk.bf16.mxu0 %vm732_vm0, %v2897_v1  ;;  %v2447_v60 = vmul.f32 %v7610_v15, %v8744_v29 }
 0x30d   : > { %v4924_v63 = vclamps-f32 %v1918_v48, 0.5  ;;  %v1921_v45 = vmul.f32 %v7621_v53, %v8746_v27  ;;  %v2445_v13 = vmul.f32 %v7623_v12, %v8748_v28  ;;  %v2734_v14 = vsub.f32 %v2446_v19, %v5019_v31  ;;  %5814 = vmatmul.mubr.msk.bf16.gmra.mxu0 %vm732_vm0, %v2898_v34  ;;  %v7698_v10 = vpop.f32.mrf.mxu1  ;;  %v7700_v53 = vpop.f32.mrf.mxu0  ;;  %v8767_v31 = vld [vmem:[#allocation104_spill] sm:$0xff] }
 0x30e   : > { %v5017_v39 = vclamps-f32 %v2444_v5, 0.5  ;;  %v4922_v37 = vclamps-f32 %v1916_v32, 0.5  ;;  %v2370_v4 = vpack.c.bf16 %v2297_v35, %v2296_v9  ;;  %v5020_v1 = vclamps-f32 %v2447_v60, 0.5 }
 0x30f   : > { %v2206_v38 = vsub.f32 %v1918_v48, %v4924_v63  ;;  %v4927_v11 = vclamps-f32 %v1921_v45, 0.5  ;;  %v5018_v15 = vclamps-f32 %v2445_v13, 0.5  ;;  %v1919_v19 = vmul.f32 %v7635_v47, %v8736_v41  ;;  %v7711_v28 = vpop.f32.mrf.mxu1 }
 0x310   : > { %v2732_v22 = vsub.f32 %v2444_v5, %v5017_v39  ;;  %v2204_v12 = vsub.f32 %v1916_v32, %v4922_v37  ;;  %5717 = vmatprep.mubr.msk.bf16.mxu1 %vm732_vm0, %v2370_v4  ;;  %v2450_v34 = vmul.f32 %v7637_v26, %v8767_v31  ;;  %v2825_v9 = vmul.f32 %v7318_v30, %v2728_v6  ;;  %v7713_v5 = vpop.f32.mrf.mxu0 }
 0x311   : > { %v2302_v35 = vmul.f32 %v7315_v46, %v2205_v8  ;;  %v2303_v48 = vmul.f32 %v7315_v46, %v2206_v38  ;;  %v2735_v63 = vsub.f32 %v2447_v60, %v5020_v1  ;;  %5718 = vmatmul.mubr.msk.bf16.gmra.mxu1 %vm732_vm0, %v2371_v20  ;;  %v2900_v32 = vpack.c.bf16 %v7672_v2, %v7663_v17  ;;  %v7724_v20 = vpop.f32.mrf.mxu1 }
 0x312   : > { %v2300_v47 = vmul.f32 %v7315_v46, %v2203_v21  ;;  %v4925_v39 = vclamps-f32 %v1919_v19, 0.5  ;;  %v5023_v26 = vclamps-f32 %v2450_v34, 0.5  ;;  %v7719_v6 = vmul.f32 %v7318_v30, %v2734_v14  ;;  %v7726_v4 = vpop.f32.mrf.mxu0 }
 0x313   : > { %v7722_v8 = vmul.f32 %v7318_v30, %v2732_v22  ;;  %v2209_v60 = vsub.f32 %v1921_v45, %v4927_v11  ;;  %v2733_v37 = vsub.f32 %v2445_v13, %v5018_v15  ;;  %v2373_v38 = vpack.c.bf16 %v2303_v48, %v2302_v35  ;;  %v7740_v11 = vpop.f32.mrf.mxu1  ;;  %v8768_v35 = vld [vmem:[#allocation103_spill] sm:$0xff] }
 0x314   : > { %v2301_v1 = vmul.f32 %v7315_v46, %v2204_v12  ;;  %v2899_v17 = vpack.c.bf16 %v2826_v23, %v2825_v9  ;;  %v1922_v2 = vmul.f32 %v7644_v7, %v8738_v40  ;;  %v7732_v21 = vmul.f32 %v7318_v30, %v2735_v63  ;;  %v7742_v15 = vpop.f32.mrf.mxu0 }
 0x315   : > { %v2448_v14 = vmul.f32 %v7646_v18, %v8704_v24  ;;  %v1920_v45 = vmul.f32 %v7650_v62, %v8705_v54  ;;  %v2451_v13 = vmul.f32 %v7652_v42, %v8749_v61  ;;  %v2207_v23 = vsub.f32 %v1919_v19, %v4925_v39  ;;  %v7750_v48 = vpop.f32.mrf.mxu1 }
 0x316   : > { %v2738_v22 = vsub.f32 %v2450_v34, %v5023_v26  ;;  %5817 = vmatprep.mubr.msk.bf16.mxu0 %vm732_vm0, %v2899_v17  ;;  %v4928_v7 = vclamps-f32 %v1922_v2, 0.5  ;;  %v1925_v12 = vmul.f32 %v7666_v16, %v8751_v50  ;;  %v2449_v42 = vmul.f32 %v7668_v57, %v8768_v35  ;;  %v7752_v63 = vpop.f32.mrf.mxu0 }
 0x317   : > { %v5021_v9 = vclamps-f32 %v2448_v14, 0.5  ;;  %5818 = vmatmul.mubr.msk.bf16.gmra.mxu0 %vm732_vm0, %v2900_v32  ;;  %v4926_v18 = vclamps-f32 %v1920_v45, 0.5  ;;  %v5024_v62 = vclamps-f32 %v2451_v13, 0.5  ;;  %v2372_v39 = vpack.c.bf16 %v2301_v1, %v2300_v47  ;;  %v7757_v61 = vpop.f32.mrf.mxu1  ;;  %v8769_v47 = vld [vmem:[#allocation108_spill] sm:$0xff] }
 0x318   : > { %v2210_v19 = vsub.f32 %v1922_v2, %v4928_v7  ;;  %v4931_v34 = vclamps-f32 %v1925_v12, 0.5  ;;  %v1923_v26 = vmul.f32 %v7677_v52, %v8712_v55  ;;  %v2830_v16 = vmul.f32 %v7318_v30, %v2733_v37  ;;  %v7759_v54 = vpop.f32.mrf.mxu0 }
 0x319   : > { %v2208_v17 = vsub.f32 %v1920_v45, %v4926_v18  ;;  %v2739_v50 = vsub.f32 %v2451_v13, %v5024_v62  ;;  %v5022_v32 = vclamps-f32 %v2449_v42, 0.5  ;;  %v2306_v57 = vmul.f32 %v7315_v46, %v2209_v60  ;;  %5721 = vmatprep.mubr.msk.bf16.mxu1 %vm732_vm0, %v2372_v39  ;;  %v7773_v60 = vpop.f32.mrf.mxu1 }
 0x31a   : > { %v2307_v35 = vmul.f32 %v7315_v46, %v2210_v19  ;;  %v4929_v2 = vclamps-f32 %v1923_v26, 0.5  ;;  %v2454_v1 = vmul.f32 %v7679_v0, %v8769_v47  ;;  %v2902_v52 = vpack.c.bf16 %v7732_v21, %v7719_v6  ;;  %5722 = vmatmul.mubr.msk.bf16.gmra.mxu1 %vm732_vm0, %v2373_v38  ;;  %v7775_v7 = vpop.f32.mrf.mxu0 }
 0x31b   : > { %v2304_v37 = vmul.f32 %v7315_v46, %v2207_v23  ;;  %v7770_v45 = vmul.f32 %v7318_v30, %v2738_v22  ;;  %v2737_v13 = vsub.f32 %v2449_v42, %v5022_v32  ;;  %v2736_v18 = vsub.f32 %v2448_v14, %v5021_v9  ;;  %v7784_v22 = vpop.f32.mrf.mxu1  ;;  %v8770_v9 = vld [vmem:[#allocation91_spill] sm:$0xff] }
 0x31c   : > { %v2305_v62 = vmul.f32 %v7315_v46, %v2208_v17  ;;  %v2213_v19 = vsub.f32 %v1925_v12, %v4931_v34  ;;  %v5027_v0 = vclamps-f32 %v2454_v1, 0.5  ;;  %v2375_v39 = vpack.c.bf16 %v2307_v35, %v2306_v57  ;;  %v7786_v38 = vpop.f32.mrf.mxu0 }
 0x31d   : > { %v7779_v6 = vmul.f32 %v7318_v30, %v2739_v50  ;;  %v2901_v21 = vpack.c.bf16 %v2830_v16, %v7722_v8  ;;  %v1926_v23 = vmul.f32 %v7693_v44, %v8715_v59  ;;  %v2834_v42 = vmul.f32 %v7318_v30, %v2737_v13  ;;  %v8771_v44 = vld [vmem:[#allocation96_spill] sm:$0xff]  ;;  %v7800_v32 = vpop.f32.mrf.mxu1 }
 0x31e   : > { %v2211_v14 = vsub.f32 %v1923_v26, %v4929_v2  ;;  %v2452_v12 = vmul.f32 %v7695_v3, %v8716_v25  ;;  %v1924_v35 = vmul.f32 %v7698_v10, %v8770_v9  ;;  %v2455_v8 = vmul.f32 %v7700_v53, %v8720_v49  ;;  %v7802_v26 = vpop.f32.mrf.mxu0  ;;  %v8776_v25 = vld [vmem:[#allocation95_spill] sm:$0xff] }
 0x31f   : > { %5821 = vmatprep.mubr.msk.bf16.mxu0 %vm732_vm0, %v2901_v21  ;;  %v4932_v50 = vclamps-f32 %v1926_v23, 0.5  ;;  %v1929_v16 = vmul.f32 %v7711_v28, %v8771_v44  ;;  %v2453_v17 = vmul.f32 %v7713_v5, %v8755_v51  ;;  %v2742_v3 = vsub.f32 %v2454_v1, %v5027_v0  ;;  %v7805_v49 = vpop.f32.mrf.mxu1  ;;  %v8772_v0 = vld [vmem:[#allocation112_spill] sm:$0xff] }
 0x320   : > { %v5025_v57 = vclamps-f32 %v2452_v12, 0.5  ;;  %5822 = vmatmul.mubr.msk.bf16.gmra.mxu0 %vm732_vm0, %v2902_v52  ;;  %v4930_v10 = vclamps-f32 %v1924_v35, 0.5  ;;  %v2374_v2 = vpack.c.bf16 %v2305_v62, %v2304_v37  ;;  %v5028_v21 = vclamps-f32 %v2455_v8, 0.5  ;;  %v7807_v28 = vpop.f32.mrf.mxu0 }
 0x321   : > { %v2214_v13 = vsub.f32 %v1926_v23, %v4932_v50  ;;  %v4935_v9 = vclamps-f32 %v1929_v16, 0.5  ;;  %v5026_v53 = vclamps-f32 %v2453_v17, 0.5  ;;  %v1927_v1 = vmul.f32 %v7724_v20, %v8740_v58  ;;  %v7818_v34 = vpop.f32.mrf.mxu1 }
 0x322   : > { %v2740_v44 = vsub.f32 %v2452_v12, %v5025_v57  ;;  %v2212_v5 = vsub.f32 %v1924_v35, %v4930_v10  ;;  %5725 = vmatprep.mubr.msk.bf16.mxu1 %vm732_vm0, %v2374_v2  ;;  %v2458_v52 = vmul.f32 %v7726_v4, %v8772_v0  ;;  %v2833_v37 = vmul.f32 %v7318_v30, %v2736_v18  ;;  %v7820_v12 = vpop.f32.mrf.mxu0 }
 0x323   : > { %v2310_v62 = vmul.f32 %v7315_v46, %v2213_v19  ;;  %v2311_v23 = vmul.f32 %v7315_v46, %v2214_v13  ;;  %v2743_v50 = vsub.f32 %v2455_v8, %v5028_v21  ;;  %5726 = vmatmul.mubr.msk.bf16.gmra.mxu1 %vm732_vm0, %v2375_v39  ;;  %v2904_v35 = vpack.c.bf16 %v7779_v6, %v7770_v45  ;;  %v7831_v39 = vpop.f32.mrf.mxu1  ;;  %v8773_v6 = vld [vmem:[#allocation97_spill] sm:$0xff] }
 0x324   : > { %v2308_v20 = vmul.f32 %v7315_v46, %v2211_v14  ;;  %v4933_v57 = vclamps-f32 %v1927_v1, 0.5  ;;  %v5031_v4 = vclamps-f32 %v2458_v52, 0.5  ;;  %v7826_v18 = vmul.f32 %v7318_v30, %v2742_v3  ;;  %v7833_v2 = vpop.f32.mrf.mxu0  ;;  %v8775_v3 = vld [vmem:[#allocation110_spill] sm:$0xff] }
 0x325   : > { %v7829_v19 = vmul.f32 %v7318_v30, %v2740_v44  ;;  %v2217_v8 = vsub.f32 %v1929_v16, %v4935_v9  ;;  %v2741_v10 = vsub.f32 %v2453_v17, %v5026_v53  ;;  %v2377_v13 = vpack.c.bf16 %v2311_v23, %v2310_v62  ;;  %v8777_v17 = vld [vmem:[#allocation113_spill] sm:$0xff]  ;;  %v7847_v59 = vpop.f32.mrf.mxu1 }
 0x326   : > { %v2309_v21 = vmul.f32 %v7315_v46, %v2212_v5  ;;  %v2903_v45 = vpack.c.bf16 %v2834_v42, %v2833_v37  ;;  %v8774_v51 = vmov %v8773_v6  ;;  %v1930_v14 = vmul.f32 %v7740_v11, %v8773_v6  ;;  %v7849_v62 = vpop.f32.mrf.mxu0  ;;  %v8778_v37 = vld [vmem:[#allocation84_spill] sm:$0xff]  ;;  %v8779_v6 = vld [vmem:[#allocation111_spill] sm:$0xff] }
 0x327   : > { %v7839_v0 = vmul.f32 %v7318_v30, %v2743_v50  ;;  %v2456_v44 = vmul.f32 %v7742_v15, %v8775_v3  ;;  %v1928_v16 = vmul.f32 %v7750_v48, %v8776_v25  ;;  %v2459_v9 = vmul.f32 %v7752_v63, %v8777_v17  ;;  %v7857_v3 = vpop.f32.mrf.mxu1 }
 0x328   : > { %v2215_v42 = vsub.f32 %v1927_v1, %v4933_v57  ;;  %v2746_v5 = vsub.f32 %v2458_v52, %v5031_v4  ;;  %5825 = vmatprep.mubr.msk.bf16.mxu0 %vm732_vm0, %v2903_v45  ;;  %v4936_v11 = vclamps-f32 %v1930_v14, 0.5  ;;  %v1933_v23 = vmul.f32 %v7757_v61, %v8778_v37  ;;  %v7859_v17 = vpop.f32.mrf.mxu0 }
 0x329   : > { %v5029_v50 = vclamps-f32 %v2456_v44, 0.5  ;;  %5826 = vmatmul.mubr.msk.bf16.gmra.mxu0 %vm732_vm0, %v2904_v35  ;;  %v4934_v15 = vclamps-f32 %v1928_v16, 0.5  ;;  %v5032_v48 = vclamps-f32 %v2459_v9, 0.5  ;;  %v2457_v63 = vmul.f32 %v7759_v54, %v8779_v6  ;;  %v7864_v25 = vpop.f32.mrf.mxu1 }
 0x32a   : > { %v2218_v1 = vsub.f32 %v1930_v14, %v4936_v11  ;;  %v4939_v52 = vclamps-f32 %v1933_v23, 0.5  ;;  %v2376_v57 = vpack.c.bf16 %v2309_v21, %v2308_v20  ;;  %v1931_v4 = vmul.f32 %v7773_v60, %v8759_v36  ;;  %v7866_v53 = vpop.f32.mrf.mxu0  ;;  %v8780_v20 = vld [vmem:[#allocation100_spill] sm:$0xff] }
 0x32b   : > { %v2838_v61 = vmul.f32 %v7318_v30, %v2741_v10  ;;  %v2216_v45 = vsub.f32 %v1928_v16, %v4934_v15  ;;  %v2747_v37 = vsub.f32 %v2459_v9, %v5032_v48  ;;  %v5030_v35 = vclamps-f32 %v2457_v63, 0.5 }
 0x32c   : > { %v2314_v54 = vmul.f32 %v7315_v46, %v2217_v8  ;;  %v2315_v6 = vmul.f32 %v7315_v46, %v2218_v1  ;;  %5729 = vmatprep.mubr.msk.bf16.mxu1 %vm732_vm0, %v2376_v57  ;;  %v4937_v14 = vclamps-f32 %v1931_v4, 0.5  ;;  %v8781_v58 = vmov %v8780_v20  ;;  %v7880_v8 = vpop.f32.mrf.mxu1  ;;  %v7882_v11 = vpop.f32.mrf.mxu0 }
 0x32d   : > { %v2462_v21 = vmul.f32 %v7775_v7, %v8780_v20  ;;  %v2906_v60 = vpack.c.bf16 %v7839_v0, %v7826_v18  ;;  %v2312_v10 = vmul.f32 %v7315_v46, %v2215_v42  ;;  %v7877_v16 = vmul.f32 %v7318_v30, %v2746_v5  ;;  %5730 = vmatmul.mubr.msk.bf16.gmra.mxu1 %vm732_vm0, %v2377_v13 }
 0x32e   : > { %v2745_v9 = vsub.f32 %v2457_v63, %v5030_v35  ;;  %v2744_v15 = vsub.f32 %v2456_v44, %v5029_v50  ;;  %v2313_v48 = vmul.f32 %v7315_v46, %v2216_v45  ;;  %v2221_v1 = vsub.f32 %v1933_v23, %v4939_v52  ;;  %v7891_v5 = vpop.f32.mrf.mxu1  ;;  %v7893_v13 = vpop.f32.mrf.mxu0  ;;  %v8782_v52 = vld [vmem:[#allocation99_spill] sm:$0xff] }
 0x32f   : > { %v5035_v7 = vclamps-f32 %v2462_v21, 0.5  ;;  %v2379_v57 = vpack.c.bf16 %v2315_v6, %v2314_v54  ;;  %v7886_v18 = vmul.f32 %v7318_v30, %v2747_v37  ;;  %v2905_v0 = vpack.c.bf16 %v2838_v61, %v7829_v19 }
 0x330   : > { %v1934_v42 = vmul.f32 %v7784_v22, %v8762_v43  ;;  %v2842_v63 = vmul.f32 %v7318_v30, %v2745_v9  ;;  %v2219_v44 = vsub.f32 %v1931_v4, %v4937_v14  ;;  %v2460_v23 = vmul.f32 %v7786_v38, %v8764_v56  ;;  %v7907_v45 = vpop.f32.mrf.mxu1  ;;  %v7909_v4 = vpop.f32.mrf.mxu0 }
 0x331   : > { %v1932_v50 = vmul.f32 %v7800_v32, %v8766_v33  ;;  %5829 = vmatprep.mubr.msk.bf16.mxu0 %vm732_vm0, %v2905_v0  ;;  %v2463_v19 = vmul.f32 %v7802_v26, %v8744_v29  ;;  %v1937_v22 = vmul.f32 %v7805_v49, %v8746_v27  ;;  %v2461_v61 = vmul.f32 %v7807_v28, %v8782_v52 }
 0x332   : > { %v4940_v37 = vclamps-f32 %v1934_v42, 0.5  ;;  %v2750_v38 = vsub.f32 %v2462_v21, %v5035_v7  ;;  %v5033_v35 = vclamps-f32 %v2460_v23, 0.5  ;;  %5830 = vmatmul.mubr.msk.bf16.gmra.mxu0 %vm732_vm0, %v2906_v60  ;;  %v2378_v54 = vpack.c.bf16 %v2313_v48, %v2312_v10  ;;  %v7912_v9 = vpop.f32.mrf.mxu1  ;;  %v7914_v49 = vpop.f32.mrf.mxu0 }
 0x333   : > { %v4938_v32 = vclamps-f32 %v1932_v50, 0.5  ;;  %v5036_v14 = vclamps-f32 %v2463_v19, 0.5  ;;  %v4943_v20 = vclamps-f32 %v1937_v22, 0.5  ;;  %v5034_v26 = vclamps-f32 %v2461_v61, 0.5 }
 0x334   : > { %v2222_v6 = vsub.f32 %v1934_v42, %v4940_v37  ;;  %v2748_v0 = vsub.f32 %v2460_v23, %v5033_v35  ;;  %5733 = vmatprep.mubr.msk.bf16.mxu1 %vm732_vm0, %v2378_v54  ;;  %v1935_v21 = vmul.f32 %v7818_v34, %v8736_v41  ;;  %v2466_v60 = vmul.f32 %v7820_v12, %v8767_v31  ;;  %v7925_v37 = vpop.f32.mrf.mxu1  ;;  %v7927_v23 = vpop.f32.mrf.mxu0 }
 0x335   : > { %v2220_v28 = vsub.f32 %v1932_v50, %v4938_v32  ;;  %v2841_v10 = vmul.f32 %v7318_v30, %v2744_v15  ;;  %v2318_v48 = vmul.f32 %v7315_v46, %v2221_v1  ;;  %v2751_v42 = vsub.f32 %v2463_v19, %v5036_v14  ;;  %5734 = vmatmul.mubr.msk.bf16.gmra.mxu1 %vm732_vm0, %v2379_v57 }
 0x336   : > { %v2319_v7 = vmul.f32 %v7315_v46, %v2222_v6  ;;  %v2908_v50 = vpack.c.bf16 %v7886_v18, %v7877_v16  ;;  %v2316_v34 = vmul.f32 %v7315_v46, %v2219_v44  ;;  %v4941_v35 = vclamps-f32 %v1935_v21, 0.5  ;;  %v7938_v57 = vpop.f32.mrf.mxu1  ;;  %v7940_v54 = vpop.f32.mrf.mxu0 }
 0x337   : > { %v5039_v12 = vclamps-f32 %v2466_v60, 0.5  ;;  %v7933_v15 = vmul.f32 %v7318_v30, %v2750_v38  ;;  %v7936_v1 = vmul.f32 %v7318_v30, %v2748_v0  ;;  %v2225_v19 = vsub.f32 %v1937_v22, %v4943_v20  ;;  %v8783_v0 = vld [vmem:[#allocation87_spill] sm:$0xff] }
 0x338   : > { %v2749_v32 = vsub.f32 %v2461_v61, %v5034_v26  ;;  %v2381_v6 = vpack.c.bf16 %v2319_v7, %v2318_v48  ;;  %v2317_v14 = vmul.f32 %v7315_v46, %v2220_v28  ;;  %v2907_v16 = vpack.c.bf16 %v2842_v63, %v2841_v10  ;;  %v8784_v61 = vld [vmem:[#allocation105_spill] sm:$0xff]  ;;  %v7952_v26 = vpop.f32.mrf.mxu1  ;;  %v7954_v48 = vpop.f32.mrf.mxu0  ;;  %v8785_v10 = vld [vmem:[#allocation92_spill] sm:$0xff] }
 0x339   : > { %v1938_v18 = vmul.f32 %v7831_v39, %v8738_v40  ;;  %v2848_v44 = vmul.f32 %v7318_v30, %v2751_v42  ;;  %v2464_v38 = vmul.f32 %v7833_v2, %v8704_v24  ;;  %v1936_v22 = vmul.f32 %v7847_v59, %v8783_v0  ;;  %v8786_v0 = vld [vmem:[#allocation103_spill] sm:$0xff] }
 0x33a   : > { %v2467_v20 = vmul.f32 %v7849_v62, %v8784_v61  ;;  %v2223_v28 = vsub.f32 %v1935_v21, %v4941_v35  ;;  %v2754_v63 = vsub.f32 %v2466_v60, %v5039_v12  ;;  %5833 = vmatprep.mubr.msk.bf16.mxu0 %vm732_vm0, %v2907_v16  ;;  %v1941_v7 = vmul.f32 %v7857_v3, %v8785_v10  ;;  %v7962_v61 = vpop.f32.mrf.mxu1  ;;  %v7964_v24 = vpop.f32.mrf.mxu0 }
 0x33b   : > { %v4944_v39 = vclamps-f32 %v1938_v18, 0.5  ;;  %v5037_v42 = vclamps-f32 %v2464_v38, 0.5  ;;  %5834 = vmatmul.mubr.msk.bf16.gmra.mxu0 %vm732_vm0, %v2908_v50  ;;  %v4942_v2 = vclamps-f32 %v1936_v22, 0.5  ;;  %v2465_v62 = vmul.f32 %v7859_v17, %v8786_v0 }
 0x33c   : > { %v5040_v59 = vclamps-f32 %v2467_v20, 0.5  ;;  %v4947_v60 = vclamps-f32 %v1941_v7, 0.5  ;;  %v2380_v35 = vpack.c.bf16 %v2317_v14, %v2316_v34  ;;  %v1939_v12 = vmul.f32 %v7864_v25, %v8712_v55  ;;  %v7969_v40 = vpop.f32.mrf.mxu1  ;;  %v7976_v14 = vpop.f32.mrf.mxu0 }
 0x33d   : > { %v2226_v21 = vsub.f32 %v1938_v18, %v4944_v39  ;;  %v2846_v3 = vmul.f32 %v7318_v30, %v2749_v32  ;;  %v2224_v16 = vsub.f32 %v1936_v22, %v4942_v2  ;;  %v5038_v50 = vclamps-f32 %v2465_v62, 0.5 }
 0x33e   : > { %v2755_v10 = vsub.f32 %v2467_v20, %v5040_v59  ;;  %v2322_v31 = vmul.f32 %v7315_v46, %v2225_v19  ;;  %5737 = vmatprep.mubr.msk.bf16.mxu1 %vm732_vm0, %v2380_v35  ;;  %v4945_v0 = vclamps-f32 %v1939_v12, 0.5  ;;  %v2470_v34 = vmul.f32 %v7866_v53, %v8769_v47  ;;  %v7984_v19 = vpop.f32.mrf.mxu1  ;;  %v8788_v35 = vld [vmem:[#allocation106_spill] sm:$0xff] }
 0x33f   : > { %v2323_v17 = vmul.f32 %v7315_v46, %v2226_v21  ;;  %v2910_v25 = vpack.c.bf16 %v2848_v44, %v7933_v15  ;;  %v2320_v32 = vmul.f32 %v7315_v46, %v2223_v28  ;;  %v7981_v18 = vmul.f32 %v7318_v30, %v2754_v63  ;;  %5738 = vmatmul.mubr.msk.bf16.gmra.mxu1 %vm732_vm0, %v2381_v6  ;;  %v8787_v44 = vld [vmem:[#allocation93_spill] sm:$0xff] }
 0x340   : > { %v2753_v22 = vsub.f32 %v2465_v62, %v5038_v50  ;;  %v2752_v20 = vsub.f32 %v2464_v38, %v5037_v42  ;;  %v2321_v39 = vmul.f32 %v7315_v46, %v2224_v16  ;;  %v2229_v2 = vsub.f32 %v1941_v7, %v4947_v60  ;;  %v7993_v63 = vpop.f32.mrf.mxu1  ;;  %v8789_v42 = vld [vmem:[#allocation91_spill] sm:$0xff] }
 0x341   : > { %v5043_v59 = vclamps-f32 %v2470_v34, 0.5  ;;  %v2383_v53 = vpack.c.bf16 %v2323_v17, %v2322_v31  ;;  %v7988_v21 = vmul.f32 %v7318_v30, %v2755_v10  ;;  %v2909_v15 = vpack.c.bf16 %v2846_v3, %v7936_v1  ;;  %v8000_v31 = vpop.f32.mrf.mxu0  ;;  %v8790_v1 = vld [vmem:[#allocation109_spill] sm:$0xff]  ;;  %v8793_v10 = vld [vmem:[#allocation107_spill] sm:$0xff] }
 0x342   : > { %v1942_v28 = vmul.f32 %v7880_v8, %v8787_v44  ;;  %v2850_v6 = vmul.f32 %v7318_v30, %v2753_v22  ;;  %v2227_v62 = vsub.f32 %v1939_v12, %v4945_v0  ;;  %v2468_v38 = vmul.f32 %v7882_v11, %v8788_v35  ;;  %v8791_v8 = vld [vmem:[#allocation96_spill] sm:$0xff]  ;;  %v8009_v17 = vpop.f32.mrf.mxu1 }
 0x343   : > { %v1940_v7 = vmul.f32 %v7891_v5, %v8789_v42  ;;  %5837 = vmatprep.mubr.msk.bf16.mxu0 %vm732_vm0, %v2909_v15  ;;  %v2471_v3 = vmul.f32 %v7893_v13, %v8790_v1  ;;  %v8792_v44 = vmov %v8791_v8  ;;  %v1945_v16 = vmul.f32 %v7907_v45, %v8791_v8  ;;  %v8794_v45 = vld [vmem:[#allocation94_spill] sm:$0xff]  ;;  %v8795_v8 = vld [vmem:[#allocation112_spill] sm:$0xff] }
 0x344   : > { %v4948_v60 = vclamps-f32 %v1942_v28, 0.5  ;;  %v2469_v12 = vmul.f32 %v7909_v4, %v8793_v10  ;;  %v2758_v11 = vsub.f32 %v2470_v34, %v5043_v59  ;;  %v5041_v0 = vclamps-f32 %v2468_v38, 0.5  ;;  %5838 = vmatmul.mubr.msk.bf16.gmra.mxu0 %vm732_vm0, %v2910_v25  ;;  %v8012_v55 = vpop.f32.mrf.mxu1  ;;  %v8019_v59 = vpop.f32.mrf.mxu0 }
 0x345   : > { %v4946_v5 = vclamps-f32 %v1940_v7, 0.5  ;;  %v2382_v22 = vpack.c.bf16 %v2321_v39, %v2320_v32  ;;  %v5044_v15 = vclamps-f32 %v2471_v3, 0.5  ;;  %v4951_v35 = vclamps-f32 %v1945_v16, 0.5 }
 0x346   : > { %v2230_v42 = vsub.f32 %v1942_v28, %v4948_v60  ;;  %v5042_v50 = vclamps-f32 %v2469_v12, 0.5  ;;  %v2756_v13 = vsub.f32 %v2468_v38, %v5041_v0  ;;  %v1943_v4 = vmul.f32 %v7912_v9, %v8794_v45  ;;  %v8025_v38 = vpop.f32.mrf.mxu1 }
 0x347   : > { %v2228_v1 = vsub.f32 %v1940_v7, %v4946_v5  ;;  %5741 = vmatprep.mubr.msk.bf16.mxu1 %vm732_vm0, %v2382_v22  ;;  %v2474_v34 = vmul.f32 %v7914_v49, %v8795_v8  ;;  %v2849_v25 = vmul.f32 %v7318_v30, %v2752_v20  ;;  %v2326_v32 = vmul.f32 %v7315_v46, %v2229_v2  ;;  %v8796_v22 = vld [vmem:[#allocation110_spill] sm:$0xff] }
 0x348   : > { %v2327_v39 = vmul.f32 %v7315_v46, %v2230_v42  ;;  %v2759_v28 = vsub.f32 %v2471_v3, %v5044_v15  ;;  %5742 = vmatmul.mubr.msk.bf16.gmra.mxu1 %vm732_vm0, %v2383_v53  ;;  %v2912_v7 = vpack.c.bf16 %v7988_v21, %v7981_v18  ;;  %v2324_v9 = vmul.f32 %v7315_v46, %v2227_v62  ;;  %v8034_v42 = vpop.f32.mrf.mxu1  ;;  %v8039_v21 = vpop.f32.mrf.mxu0  ;;  %v8798_v15 = vld [vmem:[#allocation95_spill] sm:$0xff] }
 0x349   : > { %v4949_v60 = vclamps-f32 %v1943_v4, 0.5  ;;  %v5047_v49 = vclamps-f32 %v2474_v34, 0.5  ;;  %v8031_v10 = vmul.f32 %v7318_v30, %v2758_v11  ;;  %v2853_v20 = vmul.f32 %v7318_v30, %v2756_v13 }
 0x34a   : > { %v2233_v2 = vsub.f32 %v1945_v16, %v4951_v35  ;;  %v2757_v0 = vsub.f32 %v2469_v12, %v5042_v50  ;;  %v2385_v3 = vpack.c.bf16 %v2327_v39, %v2326_v32  ;;  %v2325_v53 = vmul.f32 %v7315_v46, %v2228_v1  ;;  %v8800_v50 = vld [vmem:[#allocation113_spill] sm:$0xff]  ;;  %v8048_v12 = vpop.f32.mrf.mxu1  ;;  %v8801_v1 = vld [vmem:[#allocation84_spill] sm:$0xff]  ;;  %v8802_v39 = vld [vmem:[#allocation111_spill] sm:$0xff] }
 0x34b   : > { %v2911_v5 = vpack.c.bf16 %v2850_v6, %v2849_v25  ;;  %v1946_v18 = vmul.f32 %v7925_v37, %v8774_v51  ;;  %v2856_v62 = vmul.f32 %v7318_v30, %v2759_v28  ;;  %v8797_v47 = vmov %v8796_v22 }
 0x34c   : > { %v2472_v11 = vmul.f32 %v7927_v23, %v8796_v22  ;;  %v8799_v45 = vmov %v8798_v15  ;;  %v1944_v35 = vmul.f32 %v7938_v57, %v8798_v15  ;;  %v2475_v16 = vmul.f32 %v7940_v54, %v8800_v50  ;;  %v8056_v28 = vpop.f32.mrf.mxu1 }
 0x34d   : > { %v2231_v13 = vsub.f32 %v1943_v4, %v4949_v60  ;;  %v2762_v6 = vsub.f32 %v2474_v34, %v5047_v49  ;;  %5841 = vmatprep.mubr.msk.bf16.mxu0 %vm732_vm0, %v2911_v5  ;;  %v4952_v37 = vclamps-f32 %v1946_v18, 0.5  ;;  %v1949_v8 = vmul.f32 %v7952_v26, %v8801_v1  ;;  %v8060_v60 = vpop.f32.mrf.mxu0 }
 0x34e   : > { %v5045_v25 = vclamps-f32 %v2472_v11, 0.5  ;;  %5842 = vmatmul.mubr.msk.bf16.gmra.mxu0 %vm732_vm0, %v2912_v7  ;;  %v4950_v23 = vclamps-f32 %v1944_v35, 0.5  ;;  %v5048_v32 = vclamps-f32 %v2475_v16, 0.5  ;;  %v2473_v57 = vmul.f32 %v7954_v48, %v8802_v39  ;;  %v8063_v15 = vpop.f32.mrf.mxu1 }
 0x34f   : > { %v2234_v54 = vsub.f32 %v1946_v18, %v4952_v37  ;;  %v4955_v22 = vclamps-f32 %v1949_v8, 0.5  ;;  %v2384_v4 = vpack.c.bf16 %v2325_v53, %v2324_v9  ;;  %v1947_v34 = vmul.f32 %v7962_v61, %v8759_v36 }
 0x350   : > { %v2854_v26 = vmul.f32 %v7318_v30, %v2757_v0  ;;  %v2760_v49 = vsub.f32 %v2472_v11, %v5045_v25  ;;  %v2232_v5 = vsub.f32 %v1944_v35, %v4950_v23  ;;  %v5046_v7 = vclamps-f32 %v2473_v57, 0.5  ;;  %v8076_v11 = vpop.f32.mrf.mxu1  ;;  %v5660_v25 = vpop.f32.mrf.mxu0 }
 0x351   : > { %v2330_v1 = vmul.f32 %v7315_v46, %v2233_v2  ;;  %v2331_v48 = vmul.f32 %v7315_v46, %v2234_v54  ;;  %v2763_v39 = vsub.f32 %v2475_v16, %v5048_v32  ;;  %5745 = vmatprep.mubr.msk.bf16.mxu1 %vm732_vm0, %v2384_v4  ;;  %v2478_v9 = vmul.f32 %v7964_v24, %v8781_v58 }
 0x352   : > { %v2914_v61 = vpack.c.bf16 %v2856_v62, %v8031_v10  ;;  %v2328_v53 = vmul.f32 %v7315_v46, %v2231_v13  ;;  %v8073_v0 = vmul.f32 %v7318_v30, %v2762_v6  ;;  %v2761_v18 = vsub.f32 %v2473_v57, %v5046_v7  ;;  %5746 = vmatmul.mubr.msk.bf16.gmra.mxu1 %vm732_vm0, %v2385_v3  ;;  %v1823_v4 = vpop.f32.mrf.mxu0 }
 0x353   : > { %v2857_v2 = vmul.f32 %v7318_v30, %v2760_v49  ;;  %v2329_v35 = vmul.f32 %v7315_v46, %v2232_v5  ;;  %v2237_v16 = vsub.f32 %v1949_v8, %v4955_v22  ;;  %v4953_v37 = vclamps-f32 %v1947_v34, 0.5 }
 0x354   : > { %v2858_v24 = vmul.f32 %v7318_v30, %v2761_v18  ;;  %v5051_v10 = vclamps-f32 %v2478_v9, 0.5  ;;  %v2913_v62 = vpack.c.bf16 %v2854_v26, %v2853_v20  ;;  %v1950_v13 = vmul.f32 %v7969_v40, %v8762_v43  ;;  %v8093_v40 = vpop.f32.mrf.mxu1 }
 0x355   : > { %v2387_v6 = vpack.c.bf16 %v2331_v48, %v2330_v1  ;;  %v2860_v23 = vmul.f32 %v7318_v30, %v2763_v39  ;;  %v2476_v3 = vmul.f32 %v7976_v14, %v8764_v56  ;;  %v1948_v32 = vmul.f32 %v7984_v19, %v8766_v33 }
 0x356   : > { %v2915_v57 = vpack.c.bf16 %v2858_v24, %v2857_v2  ;;  %5845 = vmatprep.mubr.msk.bf16.mxu0 %vm732_vm0, %v2913_v62  ;;  %v4956_v8 = vclamps-f32 %v1950_v13, 0.5  ;;  %v2479_v54 = vmul.f32 %v8000_v31, %v8744_v29  ;;  %v1953_v20 = vmul.f32 %v7993_v63, %v8746_v27  ;;  %v8106_v2 = vpop.f32.mrf.mxu1 }
 0x357   : > { %v2235_v22 = vsub.f32 %v1947_v34, %v4953_v37  ;;  %v5049_v39 = vclamps-f32 %v2476_v3, 0.5  ;;  %5846 = vmatmul.mubr.msk.bf16.gmra.mxu0 %vm732_vm0, %v2914_v61  ;;  %v4954_v14 = vclamps-f32 %v1948_v32, 0.5  ;;  %v2477_v19 = vmul.f32 %v8019_v59, %v8782_v52  ;;  %v8803_v59 = vld [vmem:[#allocation104_spill] sm:$0xff] }
 0x358   : > { %v2766_v26 = vsub.f32 %v2478_v9, %v5051_v10  ;;  %v2238_v49 = vsub.f32 %v1950_v13, %v4956_v8  ;;  %v5052_v5 = vclamps-f32 %v2479_v54, 0.5  ;;  %v2386_v7 = vpack.c.bf16 %v2329_v35, %v2328_v53  ;;  %5849 = vmatprep.mubr.msk.bf16.mxu0 %vm732_vm0, %v2915_v57 }
 0x359   : > { %v2764_v31 = vsub.f32 %v2476_v3, %v5049_v39  ;;  %v2236_v1 = vsub.f32 %v1948_v32, %v4954_v14  ;;  %v5050_v63 = vclamps-f32 %v2477_v19, 0.5  ;;  %v1951_v34 = vmul.f32 %v8009_v17, %v8736_v41  ;;  %v5663_v17 = vpop.f32.mrf.mxu0  ;;  %v8804_v32 = vld [vmem:[#allocation89_spill] sm:$0xff] }
 0x35a   : > { %v2334_v48 = vmul.f32 %v7315_v46, %v2237_v16  ;;  %v2335_v61 = vmul.f32 %v7315_v46, %v2238_v49  ;;  %v4959_v18 = vclamps-f32 %v1953_v20, 0.5  ;;  %5749 = vmatprep.mubr.msk.bf16.mxu1 %vm732_vm0, %v2386_v7  ;;  %v2482_v9 = vmul.f32 %v8039_v21, %v8803_v59  ;;  %v8807_v39 = vld [vmem:[#allocation105_spill] sm:$0xff] }
 0x35b   : > { %v2916_v53 = vpack.c.bf16 %v2860_v23, %v8073_v0  ;;  %v2332_v35 = vmul.f32 %v7315_v46, %v2235_v22  ;;  %v2767_v37 = vsub.f32 %v2479_v54, %v5052_v5  ;;  %v2765_v24 = vsub.f32 %v2477_v19, %v5050_v63  ;;  %5750 = vmatmul.mubr.msk.bf16.gmra.mxu1 %vm732_vm0, %v2387_v6  ;;  %v8805_v23 = vld [vmem:[#allocation102_spill] sm:$0xff]  ;;  %v8806_v6 = vld [vmem:[#allocation87_spill] sm:$0xff]  ;;  %v8122_v19 = vpop.f32.mrf.mxu1  ;;  %v8808_v63 = vld [vmem:[#allocation92_spill] sm:$0xff] }
 0x35c   : > { %v2863_v16 = vmul.f32 %v7318_v30, %v2766_v26  ;;  %v2861_v10 = vmul.f32 %v7318_v30, %v2764_v31  ;;  %v2333_v62 = vmul.f32 %v7315_v46, %v2236_v1  ;;  %v4957_v13 = vclamps-f32 %v1951_v34, 0.5 }
 0x35d   : > { %v2862_v21 = vmul.f32 %v7318_v30, %v2765_v24  ;;  %v5055_v3 = vclamps-f32 %v2482_v9, 0.5  ;;  %v1954_v0 = vmul.f32 %v8012_v55, %v8804_v32  ;;  %v2480_v57 = vmul.f32 %v8060_v60, %v8805_v23  ;;  %v1836_v55 = vpop.f32.mrf.mxu0 }
 0x35e   : > { %v2389_v8 = vpack.c.bf16 %v2335_v61, %v2334_v48  ;;  %v2241_v54 = vsub.f32 %v1953_v20, %v4959_v18  ;;  %v1952_v22 = vmul.f32 %v8025_v38, %v8806_v6  ;;  %v2483_v14 = vmul.f32 %v5660_v25, %v8807_v39  ;;  %v8809_v61 = vld [vmem:[#allocation103_spill] sm:$0xff]  ;;  %v8813_v39 = vld [vmem:[#allocation106_spill] sm:$0xff] }
 0x35f   : > { %v2864_v26 = vmul.f32 %v7318_v30, %v2767_v37  ;;  %v2917_v49 = vpack.c.bf16 %v2862_v21, %v2861_v10  ;;  %v4960_v5 = vclamps-f32 %v1954_v0, 0.5  ;;  %v5053_v7 = vclamps-f32 %v2480_v57, 0.5  ;;  %5850 = vmatmul.mubr.msk.bf16.gmra.mxu0 %vm732_vm0, %v2916_v53  ;;  %v8810_v10 = vld [vmem:[#allocation90_spill] sm:$0xff]  ;;  %v8132_v21 = vpop.f32.mrf.mxu1 }
 0x360   : > { %v2239_v31 = vsub.f32 %v1951_v34, %v4957_v13  ;;  %v4958_v1 = vclamps-f32 %v1952_v22, 0.5  ;;  %v5056_v60 = vclamps-f32 %v2483_v14, 0.5  ;;  %v1957_v20 = vmul.f32 %v8034_v42, %v8808_v63  ;;  %v8811_v42 = vld [vmem:[#allocation108_spill] sm:$0xff] }
 0x361   : > { %v2770_v48 = vsub.f32 %v2482_v9, %v5055_v3  ;;  %v2242_v38 = vsub.f32 %v1954_v0, %v4960_v5  ;;  %v2481_v25 = vmul.f32 %v1823_v4, %v8809_v61  ;;  %v2388_v18 = vpack.c.bf16 %v2333_v62, %v2332_v35  ;;  %5853 = vmatprep.mubr.msk.bf16.mxu0 %vm732_vm0, %v2917_v49  ;;  %v5664_v4 = vpop.f32.mrf.mxu0 }
 0x362   : > { %v2768_v59 = vsub.f32 %v2480_v57, %v5053_v7  ;;  %v2240_v37 = vsub.f32 %v1952_v22, %v4958_v1  ;;  %v2771_v24 = vsub.f32 %v2483_v14, %v5056_v60  ;;  %v1955_v53 = vmul.f32 %v8048_v12, %v8810_v10  ;;  %v8814_v7 = vld [vmem:[#allocation91_spill] sm:$0xff] }
 0x363   : > { %v2338_v34 = vmul.f32 %v7315_v46, %v2241_v54  ;;  %v4963_v13 = vclamps-f32 %v1957_v20, 0.5  ;;  %v5054_v32 = vclamps-f32 %v2481_v25, 0.5  ;;  %5753 = vmatprep.mubr.msk.bf16.mxu1 %vm732_vm0, %v2388_v18  ;;  %v2486_v9 = vmul.f32 %v5663_v17, %v8811_v42  ;;  %v8812_v54 = vld [vmem:[#allocation93_spill] sm:$0xff]  ;;  %v1839_v1 = vpop.f32.mrf.mxu0 }
 0x364   : > { %v2918_v35 = vpack.c.bf16 %v2864_v26, %v2863_v16  ;;  %v2336_v62 = vmul.f32 %v7315_v46, %v2239_v31  ;;  %v2339_v3 = vmul.f32 %v7315_v46, %v2242_v38  ;;  %v4961_v0 = vclamps-f32 %v1955_v53, 0.5  ;;  %5754 = vmatmul.mubr.msk.bf16.gmra.mxu1 %vm732_vm0, %v2389_v8  ;;  %v1852_v26 = vpop.f32.mrf.mxu1 }
 0x365   : > { %v2867_v12 = vmul.f32 %v7318_v30, %v2770_v48  ;;  %v2868_v23 = vmul.f32 %v7318_v30, %v2771_v24  ;;  %v2769_v57 = vsub.f32 %v2481_v25, %v5054_v32  ;;  %v1958_v6 = vmul.f32 %v8056_v28, %v8812_v54  ;;  %v8815_v48 = vld [vmem:[#allocation109_spill] sm:$0xff]  ;;  %v8816_v24 = vld [vmem:[#allocation107_spill] sm:$0xff] }
 0x366   : > { %v2865_v22 = vmul.f32 %v7318_v30, %v2768_v59  ;;  %v2337_v17 = vmul.f32 %v7315_v46, %v2240_v37  ;;  %v5059_v16 = vclamps-f32 %v2486_v9, 0.5  ;;  %v2484_v14 = vmul.f32 %v1836_v55, %v8813_v39 }
 0x367   : > { %v2245_v49 = vsub.f32 %v1957_v20, %v4963_v13  ;;  %v2866_v5 = vmul.f32 %v7318_v30, %v2769_v57  ;;  %v4964_v8 = vclamps-f32 %v1958_v6, 0.5  ;;  %5854 = vmatmul.mubr.msk.bf16.gmra.mxu0 %vm732_vm0, %v2918_v35  ;;  %v1956_v31 = vmul.f32 %v8063_v15, %v8814_v7  ;;  %v5668_v13 = vpop.f32.mrf.mxu1 }
 0x368   : > { %v2391_v60 = vpack.c.bf16 %v2339_v3, %v2338_v34  ;;  %v2243_v28 = vsub.f32 %v1955_v53, %v4961_v0  ;;  %v5057_v63 = vclamps-f32 %v2484_v14, 0.5  ;;  %v2487_v38 = vmul.f32 %v5664_v4, %v8815_v48  ;;  %v8817_v53 = vld [vmem:[#allocation94_spill] sm:$0xff]  ;;  %v8819_v48 = vld [vmem:[#allocation111_spill] sm:$0xff] }
 0x369   : > { %v2920_v61 = vpack.c.bf16 %v2868_v23, %v2867_v12  ;;  %v2919_v25 = vpack.c.bf16 %v2866_v5, %v2865_v22  ;;  %v2246_v18 = vsub.f32 %v1958_v6, %v4964_v8  ;;  %v4962_v55 = vclamps-f32 %v1956_v31, 0.5  ;;  %v1855_v6 = vpop.f32.mrf.mxu1 }
 0x36a   : > { %v2774_v59 = vsub.f32 %v2486_v9, %v5059_v16  ;;  %v5060_v20 = vclamps-f32 %v2487_v38, 0.5  ;;  %v1961_v37 = vmul.f32 %v8076_v11, %v8792_v44  ;;  %v2485_v10 = vmul.f32 %v1839_v1, %v8816_v24  ;;  %v8818_v16 = vld [vmem:[#allocation112_spill] sm:$0xff] }
 0x36b   : > { %v2342_v15 = vmul.f32 %v7315_v46, %v2245_v49  ;;  %v2244_v32 = vsub.f32 %v1956_v31, %v4962_v55  ;;  %v2390_v34 = vpack.c.bf16 %v2337_v17, %v2336_v62  ;;  %v1959_v42 = vmul.f32 %v8093_v40, %v8817_v53  ;;  %5857 = vmatprep.mubr.msk.bf16.mxu0 %vm732_vm0, %v2919_v25  ;;  %v8175_v7 = vpop.f32.mrf.mxu1  ;;  %v8820_v55 = vld [vmem:[#allocation65_spill] sm:$0xff]  ;;  %v8823_v53 = vld [vmem:[#allocation48_spill] sm:$0xff] }
 0x36c   : > { %v2340_v4 = vmul.f32 %v7315_v46, %v2243_v28  ;;  %v2343_v9 = vmul.f32 %v7315_v46, %v2246_v18  ;;  %v2772_v35 = vsub.f32 %v2484_v14, %v5057_v63  ;;  %v5058_v3 = vclamps-f32 %v2485_v10, 0.5 }
 0x36d   : > { %v2341_v11 = vmul.f32 %v7315_v46, %v2244_v32  ;;  %v2775_v0 = vsub.f32 %v2487_v38, %v5060_v20  ;;  %5757 = vmatprep.mubr.msk.bf16.mxu1 %vm732_vm0, %v2390_v34  ;;  %v4965_v12 = vclamps-f32 %v1959_v42, 0.5  ;;  %v1962_v62 = vmul.f32 %v8106_v2, %v8774_v51  ;;  %v8822_v34 = vld [vmem:[#allocation49_spill] sm:$0xff] }
 0x36e   : > { %v2871_v23 = vmul.f32 %v7318_v30, %v2774_v59  ;;  %v4967_v40 = vclamps-f32 %v1961_v37, 0.5  ;;  %v2773_v57 = vsub.f32 %v2485_v10, %v5058_v3  ;;  %5758 = vmatmul.mubr.msk.bf16.gmra.mxu1 %vm732_vm0, %v2391_v60  ;;  %v1960_v54 = vmul.f32 %v8122_v19, %v8799_v45  ;;  %v8821_v59 = vld [vmem:[#allocation64_spill] sm:$0xff] }
 0x36f   : > { %v2247_v22 = vsub.f32 %v1959_v42, %v4965_v12  ;;  %v4968_v17 = vclamps-f32 %v1962_v62, 0.5  ;;  %5858 = vmatmul.mubr.msk.bf16.gmra.mxu0 %vm732_vm0, %v2920_v61  ;;  %v2490_v39 = vmul.f32 %v8132_v21, %v8818_v16  ;;  %v2392_v14 = vpack.c.bf16 %v2341_v11, %v2340_v4  ;;  %v3115_v61 = vpop.f32.mrf.mxu1 }
 0x370   : > { %v2869_v2 = vmul.f32 %v7318_v30, %v2772_v35  ;;  %v2870_v49 = vmul.f32 %v7318_v30, %v2773_v57  ;;  %v4966_v5 = vclamps-f32 %v1960_v54, 0.5  ;;  %v2488_v8 = vmul.f32 %v1852_v26, %v8797_v47  ;;  %v8824_v57 = vld [vmem:[#allocation63_spill] sm:$0xff] }
 0x371   : > { %v2393_v31 = vpack.c.bf16 %v2343_v9, %v2342_v15  ;;  %v2872_v19 = vmul.f32 %v7318_v30, %v2775_v0  ;;  %v2250_v1 = vsub.f32 %v1962_v62, %v4968_v17  ;;  %5761 = vmatprep.mubr.msk.bf16.mxu1 %vm732_vm0, %v2392_v14  ;;  %v2491_v60 = vmul.f32 %v5668_v13, %v8800_v50  ;;  %v5775_v13 = vpop.f32.mrf.mxu0  ;;  %v5676_v32 = vpop.f32.mrf.mxu1 }
 0x372   : > { %v2921_v28 = vpack.c.bf16 %v2870_v49, %v2869_v2  ;;  %v2248_v21 = vsub.f32 %v1960_v54, %v4966_v5  ;;  %v5061_v63 = vclamps-f32 %v2488_v8, 0.5  ;;  %v2489_v38 = vmul.f32 %v1855_v6, %v8819_v48  ;;  %v8825_v54 = vld [vmem:[#allocation62_spill] sm:$0xff]  ;;  %v8828_v5 = vld [vmem:[#allocation61_spill] sm:$0xff] }
 0x373   : > { %v2344_v25 = vmul.f32 %v7315_v46, %v2247_v22  ;;  %v5063_v18 = vclamps-f32 %v2490_v39, 0.5  ;;  %v5064_v26 = vclamps-f32 %v2491_v60, 0.5  ;;  %v5180_v20 = vcombine.low %v8821_v59, %v8820_v55  ;;  %v3736_v12 = vpop.f32.mrf.mxu0  ;;  %v3118_v62 = vpop.f32.mrf.mxu1  ;;  %v8832_v55 = vld [vmem:[#allocation59_spill] sm:$0xff]  ;;  %v8833_v59 = vld [vmem:[#allocation58_spill] sm:$0xff] }
 0x374   : > { %v2345_v24 = vmul.f32 %v7315_v46, %v2248_v21  ;;  %v2776_v10 = vsub.f32 %v2488_v8, %v5061_v63  ;;  %5861 = vmatprep.mubr.msk.bf16.mxu0 %vm732_vm0, %v2921_v28  ;;  %v5062_v15 = vclamps-f32 %v2489_v38, 0.5  ;;  %v5172_v42 = vcombine.low %v8823_v53, %v8822_v34  ;;  %v8829_v8 = vld [vmem:[#allocation60_spill] sm:$0xff]  ;;  %v8835_v34 = vld [vmem:[#allocation42_spill] sm:$0xff] }
 0x375   : > { %v2922_v4 = vpack.c.bf16 %v2872_v19, %v2871_v23  ;;  %v2249_v9 = vsub.f32 %v1961_v37, %v4967_v40  ;;  %v2779_v35 = vsub.f32 %v2491_v60, %v5064_v26  ;;  %5381 = vmatprep.subr.bf16.mxu1 %v5180_v20  ;;  %v2347_v3 = vmul.f32 %v7315_v46, %v2250_v1  ;;  %v8826_v23 = vld [vmem:[#allocation47_spill] sm:$0xff]  ;;  %v8827_v37 = vld [vmem:[#allocation46_spill] sm:$0xff]  ;;  %v5776_v2 = vpop.f32.mrf.mxu0  ;;  %v5679_v49 = vpop.f32.mrf.mxu1 }
 0x376   : > { %5762 = vmatmul.mubr.msk.bf16.gmra.mxu1 %vm732_vm0, %v2393_v31  ;;  %v2777_v11 = vsub.f32 %v2489_v38, %v5062_v15  ;;  %v2394_v0 = vpack.c.bf16 %v2345_v24, %v2344_v25  ;;  %v5179_v6 = vcombine.low %v8825_v54, %v8824_v57  ;;  %v2778_v22 = vsub.f32 %v2490_v39, %v5063_v18  ;;  %v8830_v38 = vld [vmem:[#allocation45_spill] sm:$0xff] }
 0x377   : > { %5862 = vmatmul.mubr.msk.bf16.gmra.mxu0 %vm732_vm0, %v2922_v4  ;;  %5382 = vmatpush3.bf16.msra.mxu1 %v5172_v42  ;;  %v3498_v17 = vpack.c.bf16 %v3118_v62, %v3115_v61  ;;  %v5171_v40 = vcombine.low %v8827_v37, %v8826_v23  ;;  %v2873_v16 = vmul.f32 %v7318_v30, %v2776_v10  ;;  %v3739_v60 = vpop.f32.mrf.mxu0  ;;  %v3131_v28 = vpop.f32.mrf.mxu1  ;;  %v8831_v61 = vld [vmem:[#allocation44_spill] sm:$0xff]  ;;  %v8836_v42 = vld [vmem:[#allocation57_spill] sm:$0xff] }
 0x378   : > { %v2874_v14 = vmul.f32 %v7318_v30, %v2777_v11  ;;  %5765 = vmatprep.mubr.msk.bf16.mxu1 %vm732_vm0, %v2394_v0  ;;  %5383 = vmatprep.subr.bf16.mxu1 %v5179_v6  ;;  %v5178_v31 = vcombine.low %v8829_v8, %v8828_v5  ;;  %v2876_v39 = vmul.f32 %v7318_v30, %v2779_v35  ;;  %v8837_v4 = vld [vmem:[#allocation56_spill] sm:$0xff]  ;;  %v8840_v6 = vld [vmem:[#allocation55_spill] sm:$0xff] }
 0x379   : > { %4167 = vxpose.xlu1.c.b16.start [1/8] (narrow) %v3498_v17, 32  ;;  %v2346_v19 = vmul.f32 %v7315_v46, %v2249_v9  ;;  %v2875_v21 = vmul.f32 %v7318_v30, %v2778_v22  ;;  %v3499_v63 = vpack.c.bf16 %v5676_v32, %v8175_v7  ;;  %v4119_v48 = vpack.c.bf16 %v3739_v60, %v3736_v12  ;;  %v5680_v26 = vpop.f32.mrf.mxu1  ;;  %v5779_v24 = vpop.f32.mrf.mxu0  ;;  %v8834_v32 = vld [vmem:[#allocation43_spill] sm:$0xff]  ;;  %v8838_v12 = vld [vmem:[#allocation41_spill] sm:$0xff]  ;;  %v8839_v62 = vld [vmem:[#allocation40_spill] sm:$0xff] }
 0x37a   : > { %v2923_v1 = vpack.c.bf16 %v2874_v14, %v2873_v16  ;;  %v5170_v25 = vcombine.low %v8831_v61, %v8830_v38  ;;  %v5177_v46 = vcombine.low %v8833_v59, %v8832_v55  ;;  %v4120_v7 = vpack.c.bf16 %v5776_v2, %v5775_v13  ;;  %v8841_v22 = vld [vmem:[#allocation54_spill] sm:$0xff] }
 0x37b   : > { %5384 = vmatpush3.bf16.msra.mxu1 %v5171_v40  ;;  %v2395_v18 = vpack.c.bf16 %v2347_v3, %v2346_v19  ;;  %v2924_v20 = vpack.c.bf16 %v2876_v39, %v2875_v21  ;;  %4183 = vxpose.xlu0.c.b16.start [1/8] (narrow) %v4119_v48, 32  ;;  %v3134_v30 = vpop.f32.mrf.mxu1  ;;  %v3752_v10 = vpop.f32.mrf.mxu0  ;;  %v5169_v53 = vcombine.low %v8835_v34, %v8834_v32  ;;  %v8842_v40 = vld [vmem:[#allocation39_spill] sm:$0xff]  ;;  %v8843_v16 = vld [vmem:[#allocation38_spill] sm:$0xff]  ;;  %v8846_v32 = vld [vmem:[#allocation37_spill] sm:$0xff] }
 0x37c   : > { %5865 = vmatprep.mubr.msk.bf16.mxu0 %vm732_vm0, %v2923_v1  ;;  %5385 = vmatprep.subr.bf16.mxu1 %v5178_v31  ;;  %v3500_v15 = vpack.c.bf16 %v3134_v30, %v3131_v28  ;;  %v5176_v9 = vcombine.low %v8837_v4, %v8836_v42  ;;  %v3501_v11 = vpack.c.bf16 %v5680_v26, %v5679_v49  ;;  %v8847_v34 = vld [vmem:[#allocation36_spill] sm:$0xff] }
 0x37d   : > { %4168 = vxpose.xlu1.c.b16.cont [2/8] (narrow) %v3499_v63, 32  ;;  %v5780_v35 = vpop.f32.mrf.mxu0  ;;  %v5168_v13 = vcombine.low %v8839_v62, %v8838_v12  ;;  %v5175_v17 = vcombine.low %v8841_v22, %v8840_v6  ;;  %v5167_v14 = vcombine.low %v8843_v16, %v8842_v40 }
 0x37e   : > { %5766 = vmatmul.mubr.msk.bf16.gmra.mxu1 %vm732_vm0, %v2395_v18  ;;  %v5683_v3 = vpop.f32.mrf.mxu1  ;;  %v4122_v2 = vpack.c.bf16 %v5780_v35, %v5779_v24 }
 0x37f   : > { %5866 = vmatmul.mubr.msk.bf16.gmra.mxu0 %vm732_vm0, %v2924_v20  ;;  %5386 = vmatpush3.bf16.msra.mxu1 %v5170_v25  ;;  %v3755_v0 = vpop.f32.mrf.mxu0 }
 0x380   : > { %5387 = vmatprep.subr.bf16.mxu1 %v5177_v46  ;;  %4184 = vxpose.xlu0.c.b16.cont [2/8] (narrow) %v4120_v7, 32  ;;  %v4121_v57 = vpack.c.bf16 %v3755_v0, %v3752_v10  ;;  %v3147_v54 = vpop.f32.mrf.mxu1  ;;  %v8844_v7 = vld [vmem:[#allocation53_spill] sm:$0xff]  ;;  %v8845_v10 = vld [vmem:[#allocation52_spill] sm:$0xff] }
 0x381   : > { %4169 = vxpose.xlu1.c.b16.cont [3/8] (narrow) %v3500_v15, 32  ;;  %v5174_v15 = vcombine.low %v8845_v10, %v8844_v7 }
 0x382   : > { %v5684_v23 = vpop.f32.mrf.mxu1 }
 0x383   : > { %5388 = vmatpush3.bf16.msra.mxu1 %v5169_v53  ;;  %v3503_v1 = vpack.c.bf16 %v5684_v23, %v5683_v3  ;;  %v5166_v53 = vcombine.low %v8847_v34, %v8846_v32 }
 0x384   : > { %5389 = vmatprep.subr.bf16.mxu1 %v5176_v9  ;;  %4185 = vxpose.xlu0.c.b16.cont [3/8] (narrow) %v4121_v57, 32  ;;  %v5783_v37 = vpop.f32.mrf.mxu0  ;;  %v3150_v49 = vpop.f32.mrf.mxu1 }
 0x385   : > { %4170 = vxpose.xlu1.c.b16.cont [4/8] (narrow) %v3501_v11, 32  ;;  %v3502_v8 = vpack.c.bf16 %v3150_v49, %v3147_v54 }
 0x386   : > { %v3768_v5 = vpop.f32.mrf.mxu0  ;;  %v5687_v31 = vpop.f32.mrf.mxu1 }
 0x387   : > { %5390 = vmatpush3.bf16.msra.mxu1 %v5168_v13 }
 0x388   : > { %5391 = vmatprep.subr.bf16.mxu1 %v5175_v17  ;;  %4186 = vxpose.xlu0.c.b16.cont [4/8] (narrow) %v4122_v2, 32  ;;  %v5784_v39 = vpop.f32.mrf.mxu0  ;;  %v3163_v19 = vpop.f32.mrf.mxu1 }
 0x389   : > { %4171 = vxpose.xlu1.c.b16.cont [5/8] (narrow) %v3502_v8, 32  ;;  %v4124_v61 = vpack.c.bf16 %v5784_v39, %v5783_v37 }
 0x38a   : > { %v3771_v60 = vpop.f32.mrf.mxu0  ;;  %v5688_v21 = vpop.f32.mrf.mxu1 }
 0x38b   : > { %5392 = vmatpush3.bf16.msra.mxu1 %v5167_v14  ;;  %v4123_v28 = vpack.c.bf16 %v3771_v60, %v3768_v5  ;;  %v3505_v55 = vpack.c.bf16 %v5688_v21, %v5687_v31 }
 0x38c   : > { %v3166_v48 = vpop.f32.mrf.mxu1  ;;  %5393 = vmatprep.subr.bf16.mxu1 %v5174_v15 }
 0x38d   : > { %4172 = vxpose.xlu1.c.b16.cont [6/8] (narrow) %v3503_v1, 32  ;;  %v5787_v63 = vpop.f32.mrf.mxu0  ;;  %4187 = vxpose.xlu0.c.b16.cont [5/8] (narrow) %v4123_v28, 32  ;;  %v3504_v38 = vpack.c.bf16 %v3166_v48, %v3163_v19 }
 0x38f   : > { %v3784_v25 = vpop.f32.mrf.mxu0  ;;  %5394 = vmatpush3.bf16.msra.mxu1 %v5166_v53 }
 0x390   : > { %v5691_v26 = vpop.f32.mrf.mxu1 }
 0x391   : > { %4173 = vxpose.xlu1.c.b16.cont [7/8] (narrow) %v3504_v38, 32  ;;  %v5788_v18 = vpop.f32.mrf.mxu0  ;;  %4188 = vxpose.xlu0.c.b16.cont [6/8] (narrow) %v4124_v61, 32 }
 0x392   : > { %v3179_v46 = vpop.f32.mrf.mxu1  ;;  %v4126_v4 = vpack.c.bf16 %v5788_v18, %v5787_v63  ;;  %v8849_v18 = vld [vmem:[#allocation50_spill] sm:$0xff] }
 0x393   : > { %v3787_v59 = vpop.f32.mrf.mxu0 }
 0x394   : > { %v4125_v20 = vpack.c.bf16 %v3787_v59, %v3784_v25  ;;  %v5692_v24 = vpop.f32.mrf.mxu1  ;;  %v8848_v25 = vld [vmem:[#allocation51_spill] sm:$0xff]  ;;  %v8851_v59 = vld [vmem:[#allocation34_spill] sm:$0xff] }
 0x395   : > { %4174 = vxpose.xlu1.c.b16.end [8/8] (narrow) %v3505_v55, 32  ;;  %v3507_v12 = vpack.c.bf16 %v5692_v24, %v5691_v26  ;;  %v5173_v26 = vcombine.low %v8849_v18, %v8848_v25  ;;  %v8850_v55 = vld [vmem:[#allocation35_spill] sm:$0xff] }
 0x396   : > { %v5791_v30 = vpop.f32.mrf.mxu0  ;;  %4189 = vxpose.xlu0.c.b16.cont [7/8] (narrow) %v4125_v20, 32  ;;  %v3182_v42 = vpop.f32.mrf.mxu1 }
 0x397   : > { %v3506_v35 = vpack.c.bf16 %v3182_v42, %v3179_v46  ;;  %v5165_v46 = vcombine.low %v8851_v59, %v8850_v55  ;;  %5395 = vmatprep.subr.bf16.mxu1 %v5173_v26 }
 0x398   : > { %v3800_v9 = vpop.f32.mrf.mxu0 }
 0x399   : > { %v5695_v3 = vpop.f32.mrf.mxu1  ;;  %4199 = vxpose.xlu1.c.b16.start [1/8] (narrow) %v3506_v35, 32  ;;  %5396 = vmatpush3.bf16.msra.mxu1 %v5165_v46 }
 0x39a   : > { %v5792_v11 = vpop.f32.mrf.mxu0  ;;  %4190 = vxpose.xlu0.c.b16.end [8/8] (narrow) %v4126_v4, 32 }
 0x39b   : > { %v3195_v0 = vpop.f32.mrf.mxu1  ;;  %v4128_v17 = vpack.c.bf16 %v5792_v11, %v5791_v30 }
 0x39c   : > { %v3803_v62 = vpop.f32.mrf.mxu0 }
 0x39d   : > { %v4127_v13 = vpack.c.bf16 %v3803_v62, %v3800_v9  ;;  %v5696_v57 = vpop.f32.mrf.mxu1  ;;  %4200 = vxpose.xlu1.c.b16.cont [2/8] (narrow) %v3507_v12, 32 }
 0x39e   : > { %v3509_v16 = vpack.c.bf16 %v5696_v57, %v5695_v3 }
 0x39f   : > { %v5795_v54 = vpop.f32.mrf.mxu0  ;;  %4215 = vxpose.xlu0.c.b16.start [1/8] (narrow) %v4127_v13, 32  ;;  %v3198_v6 = vpop.f32.mrf.mxu1 }
 0x3a0   : > { %v3508_v22 = vpack.c.bf16 %v3198_v6, %v3195_v0 }
 0x3a1   : > { %v3816_v23 = vpop.f32.mrf.mxu0 }
 0x3a2   : > { %4201 = vxpose.xlu1.c.b16.cont [3/8] (narrow) %v3508_v22, 32 }
 0x3a3   : > { %v5796_v37 = vpop.f32.mrf.mxu0  ;;  %4216 = vxpose.xlu0.c.b16.cont [2/8] (narrow) %v4128_v17, 32  ;;  %v5699_v40 = vpop.f32.mrf.mxu1 }
 0x3a4   : > { %v4130_v39 = vpack.c.bf16 %v5796_v37, %v5795_v54 }
 0x3a5   : > { %v3819_v14 = vpop.f32.mrf.mxu0  ;;  %v3211_v2 = vpop.f32.mrf.mxu1 }
 0x3a6   : > { %v4129_v49 = vpack.c.bf16 %v3819_v14, %v3816_v23  ;;  %4202 = vxpose.xlu1.c.b16.cont [4/8] (narrow) %v3509_v16, 32 }
 0x3a7   : > { %v5700_v5 = vpop.f32.mrf.mxu1 }
 0x3a8   : > { %v5799_v8 = vpop.f32.mrf.mxu0  ;;  %4217 = vxpose.xlu0.c.b16.cont [3/8] (narrow) %v4129_v49, 32  ;;  %v3511_v63 = vpack.c.bf16 %v5700_v5, %v5699_v40 }
 0x3a9   : > { %v3214_v31 = vpop.f32.mrf.mxu1 }
 0x3aa   : > { %v3832_v19 = vpop.f32.mrf.mxu0  ;;  %v3510_v1 = vpack.c.bf16 %v3214_v31, %v3211_v2 }
 0x3ac   : > { %v5703_v60 = vpop.f32.mrf.mxu1  ;;  %v5800_v28 = vpop.f32.mrf.mxu0  ;;  %4218 = vxpose.xlu0.c.b16.cont [4/8] (narrow) %v4130_v39, 32  ;;  %4203 = vxpose.xlu1.c.b16.cont [5/8] (narrow) %v3510_v1, 32 }
 0x3ad   : > { %v4132_v7 = vpack.c.bf16 %v5800_v28, %v5799_v8 }
 0x3ae   : > { %v3227_v21 = vpop.f32.mrf.mxu1  ;;  %v3835_v48 = vpop.f32.mrf.mxu0 }
 0x3af   : > { %v4131_v38 = vpack.c.bf16 %v3835_v48, %v3832_v19 }
 0x3b0   : > { %v5704_v61 = vpop.f32.mrf.mxu1  ;;  %4204 = vxpose.xlu1.c.b16.cont [6/8] (narrow) %v3511_v63, 32 }
 0x3b1   : > { %4219 = vxpose.xlu0.c.b16.cont [5/8] (narrow) %v4131_v38, 32  ;;  %v3513_v34 = vpack.c.bf16 %v5704_v61, %v5703_v60 }
 0x3b2   : > { %v5803_v20 = vpop.f32.mrf.mxu0  ;;  %v3230_v24 = vpop.f32.mrf.mxu1 }
 0x3b3   : > { %v3512_v30 = vpack.c.bf16 %v3230_v24, %v3227_v21 }
 0x3b4   : > { %v3848_v10 = vpop.f32.mrf.mxu0 }
 0x3b5   : > { %4205 = vxpose.xlu1.c.b16.cont [7/8] (narrow) %v3512_v30, 32  ;;  %4220 = vxpose.xlu0.c.b16.cont [6/8] (narrow) %v4132_v7, 32  ;;  %v5707_v32 = vpop.f32.mrf.mxu1 }
 0x3b6   : > { %v5804_v15 = vpop.f32.mrf.mxu0 }
 0x3b7   : > { %v3243_v42 = vpop.f32.mrf.mxu1  ;;  %v4134_v11 = vpack.c.bf16 %v5804_v15, %v5803_v20 }
 0x3b8   : > { %v3851_v53 = vpop.f32.mrf.mxu0 }
 0x3b9   : > { %v4133_v4 = vpack.c.bf16 %v3851_v53, %v3848_v10  ;;  %4206 = vxpose.xlu1.c.b16.end [8/8] (narrow) %v3513_v34, 32  ;;  %v5708_v9 = vpop.f32.mrf.mxu1 }
 0x3ba   : > { %v3515_v54 = vpack.c.bf16 %v5708_v9, %v5707_v32 }
 0x3bb   : > { %v5807_v35 = vpop.f32.mrf.mxu0  ;;  %4221 = vxpose.xlu0.c.b16.cont [7/8] (narrow) %v4133_v4, 32  ;;  %v3246_v3 = vpop.f32.mrf.mxu1 }
 0x3bc   : > { %v3514_v12 = vpack.c.bf16 %v3246_v3, %v3243_v42 }
 0x3bd   : > { %v3864_v0 = vpop.f32.mrf.mxu0 }
 0x3be   : > { %v5711_v62 = vpop.f32.mrf.mxu1  ;;  %4231 = vxpose.xlu1.c.b16.start [1/8] (narrow) %v3514_v12, 32 }
 0x3bf   : > { %v5808_v13 = vpop.f32.mrf.mxu0  ;;  %4222 = vxpose.xlu0.c.b16.end [8/8] (narrow) %v4134_v11, 32 }
 0x3c0   : > { %v3259_v57 = vpop.f32.mrf.mxu1  ;;  %v4136_v16 = vpack.c.bf16 %v5808_v13, %v5807_v35 }
 0x3c1   : > { %v3867_v6 = vpop.f32.mrf.mxu0 }
 0x3c2   : > { %v4135_v22 = vpack.c.bf16 %v3867_v6, %v3864_v0  ;;  %v5712_v17 = vpop.f32.mrf.mxu1  ;;  %4232 = vxpose.xlu1.c.b16.cont [2/8] (narrow) %v3515_v54, 32 }
 0x3c3   : > { %v3517_v5 = vpack.c.bf16 %v5712_v17, %v5711_v62 }
 0x3c4   : > { %v5811_v23 = vpop.f32.mrf.mxu0  ;;  %4247 = vxpose.xlu0.c.b16.start [1/8] (narrow) %v4135_v22, 32  ;;  %v3262_v37 = vpop.f32.mrf.mxu1 }
 0x3c5   : > { %v3516_v40 = vpack.c.bf16 %v3262_v37, %v3259_v57 }
 0x3c6   : > { %v3880_v14 = vpop.f32.mrf.mxu0 }
 0x3c7   : > { %4233 = vxpose.xlu1.c.b16.cont [3/8] (narrow) %v3516_v40, 32  ;;  %v5715_v49 = vpop.f32.mrf.mxu1 }
 0x3c8   : > { %v5812_v2 = vpop.f32.mrf.mxu0  ;;  %4248 = vxpose.xlu0.c.b16.cont [2/8] (narrow) %v4136_v16, 32 }
 0x3c9   : > { %v3275_v31 = vpop.f32.mrf.mxu1  ;;  %v4138_v28 = vpack.c.bf16 %v5812_v2, %v5811_v23 }
 0x3ca   : > { %v3883_v8 = vpop.f32.mrf.mxu0 }
 0x3cb   : > { %v4137_v39 = vpack.c.bf16 %v3883_v8, %v3880_v14  ;;  %4234 = vxpose.xlu1.c.b16.cont [4/8] (narrow) %v3517_v5, 32  ;;  %v5716_v19 = vpop.f32.mrf.mxu1 }
 0x3cc   : > { %v3519_v25 = vpack.c.bf16 %v5716_v19, %v5715_v49 }
 0x3cd   : > { %v5815_v1 = vpop.f32.mrf.mxu0  ;;  %4249 = vxpose.xlu0.c.b16.cont [3/8] (narrow) %v4137_v39, 32  ;;  %v3278_v60 = vpop.f32.mrf.mxu1 }
 0x3ce   : > { %v3518_v63 = vpack.c.bf16 %v3278_v60, %v3275_v31 }
 0x3cf   : > { %v3896_v21 = vpop.f32.mrf.mxu0 }
 0x3d0   : > { %4235 = vxpose.xlu1.c.b16.cont [5/8] (narrow) %v3518_v63, 32 }
 0x3d1   : > { %v5719_v48 = vpop.f32.mrf.mxu1  ;;  %v5816_v38 = vpop.f32.mrf.mxu0  ;;  %4250 = vxpose.xlu0.c.b16.cont [4/8] (narrow) %v4138_v28, 32 }
 0x3d2   : > { %v4140_v24 = vpack.c.bf16 %v5816_v38, %v5815_v1 }
 0x3d3   : > { %v3291_v61 = vpop.f32.mrf.mxu1  ;;  %v3899_v18 = vpop.f32.mrf.mxu0 }
 0x3d4   : > { %v4139_v26 = vpack.c.bf16 %v3899_v18, %v3896_v21  ;;  %4236 = vxpose.xlu1.c.b16.cont [6/8] (narrow) %v3519_v25, 32 }
 0x3d5   : > { %v5720_v55 = vpop.f32.mrf.mxu1 }
 0x3d6   : > { %4251 = vxpose.xlu0.c.b16.cont [5/8] (narrow) %v4139_v26, 32  ;;  %v3521_v15 = vpack.c.bf16 %v5720_v55, %v5719_v48 }
 0x3d7   : > { %v5819_v59 = vpop.f32.mrf.mxu0  ;;  %v3294_v46 = vpop.f32.mrf.mxu1 }
 0x3d8   : > { %v3520_v20 = vpack.c.bf16 %v3294_v46, %v3291_v61 }
 0x3d9   : > { %v3912_v30 = vpop.f32.mrf.mxu0 }
 0x3da   : > { %4237 = vxpose.xlu1.c.b16.cont [7/8] (narrow) %v3520_v20, 32  ;;  %4252 = vxpose.xlu0.c.b16.cont [6/8] (narrow) %v4140_v24, 32  ;;  %v5723_v10 = vpop.f32.mrf.mxu1 }
 0x3db   : > { %v5820_v7 = vpop.f32.mrf.mxu0  ;;  %v4175_v35 = vpop.trf.xlu1 }
 0x3dc   : > { %v3307_v34 = vpop.f32.mrf.mxu1  ;;  %v4142_v3 = vpack.c.bf16 %v5820_v7, %v5819_v59 }
 0x3dd   : > { %v3915_v32 = vpop.f32.mrf.mxu0 }
 0x3de   : > { %v4141_v53 = vpack.c.bf16 %v3915_v32, %v3912_v30  ;;  %4238 = vxpose.xlu1.c.b16.end [8/8] (narrow) %v3521_v15, 32  ;;  %v5724_v42 = vpop.f32.mrf.mxu1 }
 0x3df   : > { %v3523_v54 = vpack.c.bf16 %v5724_v42, %v5723_v10  ;;  %v4176_v14 = vpop.trf.xlu1 }
 0x3e0   : > { %v5823_v4 = vpop.f32.mrf.mxu0  ;;  %4253 = vxpose.xlu0.c.b16.cont [7/8] (narrow) %v4141_v53, 32  ;;  %v3310_v9 = vpop.f32.mrf.mxu1 }
 0x3e1   : > { %v3522_v0 = vpack.c.bf16 %v3310_v9, %v3307_v34  ;;  %v4191_v12 = vpop.trf.xlu0 }
 0x3e2   : > { %v3928_v11 = vpop.f32.mrf.mxu0  ;;  %4487 = vmatprep.mubr.bf16.mxu1 %v4191_v12 }
 0x3e3   : > { %v5727_v62 = vpop.f32.mrf.mxu1  ;;  %4263 = vxpose.xlu1.c.b16.start [1/8] (narrow) %v3522_v0, 32  ;;  %4488 = vmatmul.mubr.bf16.vlgmr.msra.gmra.mxu1 %v4175_v35 }
 0x3e4   : > { %v5824_v13 = vpop.f32.mrf.mxu0  ;;  %4254 = vxpose.xlu0.c.b16.end [8/8] (narrow) %v4142_v3, 32 }
 0x3e5   : > { %v3323_v57 = vpop.f32.mrf.mxu1  ;;  %v4192_v22 = vpop.trf.xlu0  ;;  %v4144_v2 = vpack.c.bf16 %v5824_v13, %v5823_v4 }
 0x3e6   : > { %v3931_v6 = vpop.f32.mrf.mxu0  ;;  %4495 = vmatprep.mubr.bf16.mxu1 %v4192_v22 }
 0x3e7   : > { %v4143_v17 = vpack.c.bf16 %v3931_v6, %v3928_v11  ;;  %v5728_v23 = vpop.f32.mrf.mxu1  ;;  %4264 = vxpose.xlu1.c.b16.cont [2/8] (narrow) %v3523_v54, 32 }
 0x3e8   : > { %v3525_v31 = vpack.c.bf16 %v5728_v23, %v5727_v62 }
 0x3e9   : > { %v5827_v37 = vpop.f32.mrf.mxu0  ;;  %4279 = vxpose.xlu0.c.b16.start [1/8] (narrow) %v4143_v17, 32  ;;  %v3326_v40 = vpop.f32.mrf.mxu1 }
 0x3ea   : > { %v3524_v16 = vpack.c.bf16 %v3326_v40, %v3323_v57 }
 0x3eb   : > { %v3944_v49 = vpop.f32.mrf.mxu0  ;;  %4496 = vmatmul.mubr.bf16.gmra.mxu1 %v4176_v14 }
 0x3ec   : > { %4265 = vxpose.xlu1.c.b16.cont [3/8] (narrow) %v3524_v16, 32 }
 0x3ed   : > { %v5828_v5 = vpop.f32.mrf.mxu0  ;;  %4280 = vxpose.xlu0.c.b16.cont [2/8] (narrow) %v4144_v2, 32  ;;  %v5731_v8 = vpop.f32.mrf.mxu1 }
 0x3ee   : > { %v4146_v63 = vpack.c.bf16 %v5828_v5, %v5827_v37 }
 0x3ef   : > { %v3947_v39 = vpop.f32.mrf.mxu0  ;;  %v3339_v19 = vpop.f32.mrf.mxu1 }
 0x3f0   : > { %v4145_v1 = vpack.c.bf16 %v3947_v39, %v3944_v49  ;;  %4266 = vxpose.xlu1.c.b16.cont [4/8] (narrow) %v3525_v31, 32 }
 0x3f1   : > { %v5732_v60 = vpop.f32.mrf.mxu1 }
 0x3f2   : > { %v5831_v28 = vpop.f32.mrf.mxu0  ;;  %4281 = vxpose.xlu0.c.b16.cont [3/8] (narrow) %v4145_v1, 32  ;;  %v3527_v26 = vpack.c.bf16 %v5732_v60, %v5731_v8 }
 0x3f3   : > { %v3342_v21 = vpop.f32.mrf.mxu1 }
 0x3f4   : > { %v3960_v48 = vpop.f32.mrf.mxu0  ;;  %v3526_v38 = vpack.c.bf16 %v3342_v21, %v3339_v19 }
 0x3f5   : > { %v5735_v61 = vpop.f32.mrf.mxu1 }
 0x3f6   : > { %v5832_v25 = vpop.f32.mrf.mxu0  ;;  %4282 = vxpose.xlu0.c.b16.cont [4/8] (narrow) %v4146_v63, 32  ;;  %4267 = vxpose.xlu1.c.b16.cont [5/8] (narrow) %v3526_v38, 32 }
 0x3f7   : > { %v3355_v18 = vpop.f32.mrf.mxu1  ;;  %v4148_v7 = vpack.c.bf16 %v5832_v25, %v5831_v28 }
 0x3f8   : > { %v3963_v55 = vpop.f32.mrf.mxu0 }
 0x3f9   : > { %v4147_v59 = vpack.c.bf16 %v3963_v55, %v3960_v48  ;;  %v5736_v46 = vpop.f32.mrf.mxu1 }
 0x3fa   : > { %4268 = vxpose.xlu1.c.b16.cont [6/8] (narrow) %v3527_v26, 32  ;;  %v3529_v34 = vpack.c.bf16 %v5736_v46, %v5735_v61 }
 0x3fb   : > { %v5835_v20 = vpop.f32.mrf.mxu0  ;;  %4283 = vxpose.xlu0.c.b16.cont [5/8] (narrow) %v4147_v59, 32  ;;  %v3358_v24 = vpop.f32.mrf.mxu1 }
 0x3fc   : > { %v3528_v30 = vpack.c.bf16 %v3358_v24, %v3355_v18 }
 0x3fd   : > { %v3976_v10 = vpop.f32.mrf.mxu0 }
 0x3fe   : > { %4269 = vxpose.xlu1.c.b16.cont [7/8] (narrow) %v3528_v30, 32 }
 0x3ff   : > { %v5836_v15 = vpop.f32.mrf.mxu0  ;;  %4284 = vxpose.xlu0.c.b16.cont [6/8] (narrow) %v4148_v7, 32  ;;  %v5739_v32 = vpop.f32.mrf.mxu1 }
 0x400   : > { %v4207_v11 = vpop.trf.xlu1  ;;  %v4150_v0 = vpack.c.bf16 %v5836_v15, %v5835_v20 }
 0x401   : > { %v3979_v53 = vpop.f32.mrf.mxu0  ;;  %v3371_v42 = vpop.f32.mrf.mxu1 }
 0x402   : > { %v4149_v4 = vpack.c.bf16 %v3979_v53, %v3976_v10  ;;  %4270 = vxpose.xlu1.c.b16.end [8/8] (narrow) %v3529_v34, 32 }
 0x403   : > { %v5740_v9 = vpop.f32.mrf.mxu1 }
 0x404   : > { %v5839_v35 = vpop.f32.mrf.mxu0  ;;  %4285 = vxpose.xlu0.c.b16.cont [7/8] (narrow) %v4149_v4, 32  ;;  %v3531_v22 = vpack.c.bf16 %v5740_v9, %v5739_v32  ;;  %v4208_v49 = vpop.trf.xlu1 }
 0x405   : > { %v3374_v3 = vpop.f32.mrf.mxu1  ;;  %v4223_v13 = vpop.trf.xlu0 }
 0x406   : > { %v3992_v12 = vpop.f32.mrf.mxu0  ;;  %v3530_v62 = vpack.c.bf16 %v3374_v3, %v3371_v42  ;;  %4503 = vmatprep.mubr.bf16.mxu1 %v4223_v13 }
 0x407   : > { %4504 = vmatmul.mubr.bf16.gmra.mxu1 %v4207_v11 }
 0x408   : > { %v5743_v57 = vpop.f32.mrf.mxu1  ;;  %v5840_v54 = vpop.f32.mrf.mxu0  ;;  %4286 = vxpose.xlu0.c.b16.end [8/8] (narrow) %v4150_v0, 32  ;;  %4295 = vxpose.xlu1.c.b16.start [1/8] (narrow) %v3530_v62, 32 }
 0x409   : > { %v4224_v23 = vpop.trf.xlu0  ;;  %v4152_v5 = vpack.c.bf16 %v5840_v54, %v5839_v35 }
 0x40a   : > { %v3387_v6 = vpop.f32.mrf.mxu1  ;;  %v3995_v17 = vpop.f32.mrf.mxu0  ;;  %4511 = vmatprep.mubr.bf16.mxu1 %v4224_v23 }
 0x40b   : > { %v4151_v37 = vpack.c.bf16 %v3995_v17, %v3992_v12 }
 0x40c   : > { %v5744_v40 = vpop.f32.mrf.mxu1  ;;  %4296 = vxpose.xlu1.c.b16.cont [2/8] (narrow) %v3531_v22, 32 }
 0x40d   : > { %4311 = vxpose.xlu0.c.b16.start [1/8] (narrow) %v4151_v37, 32  ;;  %v3533_v19 = vpack.c.bf16 %v5744_v40, %v5743_v57 }
 0x40e   : > { %v5843_v16 = vpop.f32.mrf.mxu0  ;;  %v3390_v14 = vpop.f32.mrf.mxu1 }
 0x40f   : > { %v3532_v2 = vpack.c.bf16 %v3390_v14, %v3387_v6  ;;  %4512 = vmatmul.mubr.bf16.gmra.mxu1 %v4208_v49 }
 0x410   : > { %v4008_v8 = vpop.f32.mrf.mxu0 }
 0x411   : > { %4297 = vxpose.xlu1.c.b16.cont [3/8] (narrow) %v3532_v2, 32  ;;  %4312 = vxpose.xlu0.c.b16.cont [2/8] (narrow) %v4152_v5, 32 }
 0x412   : > { %v5844_v31 = vpop.f32.mrf.mxu0  ;;  %v5747_v39 = vpop.f32.mrf.mxu1 }
 0x413   : > { %v4154_v38 = vpack.c.bf16 %v5844_v31, %v5843_v16 }
 0x414   : > { %v4011_v1 = vpop.f32.mrf.mxu0  ;;  %v3403_v60 = vpop.f32.mrf.mxu1 }
 0x415   : > { %v4153_v28 = vpack.c.bf16 %v4011_v1, %v4008_v8  ;;  %4298 = vxpose.xlu1.c.b16.cont [4/8] (narrow) %v3533_v19, 32 }
 0x416   : > { %v5748_v21 = vpop.f32.mrf.mxu1 }
 0x417   : > { %v5847_v63 = vpop.f32.mrf.mxu0  ;;  %4313 = vxpose.xlu0.c.b16.cont [3/8] (narrow) %v4153_v28, 32  ;;  %v3535_v55 = vpack.c.bf16 %v5748_v21, %v5747_v39 }
 0x418   : > { %v3406_v48 = vpop.f32.mrf.mxu1 }
 0x419   : > { %v4024_v61 = vpop.f32.mrf.mxu0  ;;  %v3534_v25 = vpack.c.bf16 %v3406_v48, %v3403_v60 }
 0x41b   : > { %v5848_v18 = vpop.f32.mrf.mxu0  ;;  %4314 = vxpose.xlu0.c.b16.cont [4/8] (narrow) %v4154_v38, 32  ;;  %v5751_v26 = vpop.f32.mrf.mxu1  ;;  %4299 = vxpose.xlu1.c.b16.cont [5/8] (narrow) %v3534_v25, 32 }
 0x41c   : > { %v4156_v15 = vpack.c.bf16 %v5848_v18, %v5847_v63 }
 0x41d   : > { %v4027_v59 = vpop.f32.mrf.mxu0  ;;  %v3419_v46 = vpop.f32.mrf.mxu1 }
 0x41e   : > { %v4155_v20 = vpack.c.bf16 %v4027_v59, %v4024_v61 }
 0x41f   : > { %v5851_v24 = vpop.f32.mrf.mxu0  ;;  %v5752_v30 = vpop.f32.mrf.mxu1  ;;  %4300 = vxpose.xlu1.c.b16.cont [6/8] (narrow) %v3535_v55, 32 }
 0x420   : > { %4315 = vxpose.xlu0.c.b16.cont [5/8] (narrow) %v4155_v20, 32  ;;  %v3537_v4 = vpack.c.bf16 %v5752_v30, %v5751_v26 }
 0x421   : > { %v4040_v7 = vpop.f32.mrf.mxu0  ;;  %v3422_v10 = vpop.f32.mrf.mxu1 }
 0x422   : > { %v3536_v32 = vpack.c.bf16 %v3422_v10, %v3419_v46 }
 0x423   : > { %v5852_v34 = vpop.f32.mrf.mxu0 }
 0x424   : > { %4316 = vxpose.xlu0.c.b16.cont [6/8] (narrow) %v4156_v15, 32  ;;  %v5755_v53 = vpop.f32.mrf.mxu1  ;;  %4301 = vxpose.xlu1.c.b16.cont [7/8] (narrow) %v3536_v32, 32  ;;  %v4158_v12 = vpack.c.bf16 %v5852_v34, %v5851_v24  ;;  %v4239_v13 = vpop.trf.xlu1 }
 0x425   : > { %v4043_v42 = vpop.f32.mrf.mxu0 }
 0x426   : > { %v4157_v9 = vpack.c.bf16 %v4043_v42, %v4040_v7  ;;  %v3435_v35 = vpop.f32.mrf.mxu1 }
 0x427   : > { %v5855_v3 = vpop.f32.mrf.mxu0 }
 0x428   : > { %4317 = vxpose.xlu0.c.b16.cont [7/8] (narrow) %v4157_v9, 32  ;;  %v5756_v11 = vpop.f32.mrf.mxu1  ;;  %4302 = vxpose.xlu1.c.b16.end [8/8] (narrow) %v3537_v4, 32  ;;  %v4240_v8 = vpop.trf.xlu1 }
 0x429   : > { %v4056_v0 = vpop.f32.mrf.mxu0  ;;  %v3539_v37 = vpack.c.bf16 %v5756_v11, %v5755_v53 }
 0x42a   : > { %v3438_v62 = vpop.f32.mrf.mxu1  ;;  %v4255_v6 = vpop.trf.xlu0 }
 0x42b   : > { %v3538_v57 = vpack.c.bf16 %v3438_v62, %v3435_v35  ;;  %v5856_v54 = vpop.f32.mrf.mxu0  ;;  %4519 = vmatprep.mubr.bf16.mxu1 %v4255_v6 }
 0x42c   : > { %4318 = vxpose.xlu0.c.b16.end [8/8] (narrow) %v4158_v12, 32  ;;  %4520 = vmatmul.mubr.bf16.gmra.mxu1 %v4239_v13  ;;  %v4160_v49 = vpack.c.bf16 %v5856_v54, %v5855_v3 }
 0x42d   : > { %v4059_v22 = vpop.f32.mrf.mxu0  ;;  %4327 = vxpose.xlu1.c.b16.start [1/8] (narrow) %v3538_v57, 32 }
 0x42e   : > { %v5759_v17 = vpop.f32.mrf.mxu1  ;;  %v4159_v23 = vpack.c.bf16 %v4059_v22, %v4056_v0  ;;  %v4256_v16 = vpop.trf.xlu0 }
 0x42f   : > { %v5859_v40 = vpop.f32.mrf.mxu0  ;;  %4527 = vmatprep.mubr.bf16.mxu1 %v4256_v16 }
 0x430   : > { %v3451_v14 = vpop.f32.mrf.mxu1  ;;  %4343 = vxpose.xlu0.c.b16.start [1/8] (narrow) %v4159_v23, 32 }
 0x431   : > { %v4072_v2 = vpop.f32.mrf.mxu0  ;;  %4328 = vxpose.xlu1.c.b16.cont [2/8] (narrow) %v3539_v37, 32 }
 0x432   : > { %v5760_v5 = vpop.f32.mrf.mxu1 }
 0x433   : > { %v5860_v31 = vpop.f32.mrf.mxu0  ;;  %v3541_v48 = vpack.c.bf16 %v5760_v5, %v5759_v17 }
 0x434   : > { %v3454_v39 = vpop.f32.mrf.mxu1  ;;  %4344 = vxpose.xlu0.c.b16.cont [2/8] (narrow) %v4160_v49, 32  ;;  %4528 = vmatmul.mubr.bf16.gmra.mxu1 %v4240_v8  ;;  %v4162_v61 = vpack.c.bf16 %v5860_v31, %v5859_v40  ;;  %v8231_v40 = vstv %s4585_s2 }
 0x435   : > { %v3540_v19 = vpack.c.bf16 %v3454_v39, %v3451_v14  ;;  %v4075_v1 = vpop.f32.mrf.mxu0  ;;  %v8852_v14 = vld [vmem:[#allocation137_spill] sm:$0xff]  ;;  %v8854_v39 = vld [vmem:[#allocation136_spill] sm:$0xff] }
 0x436   : > { %v5763_v60 = vpop.f32.mrf.mxu1  ;;  %v4161_v28 = vpack.c.bf16 %v4075_v1, %v4072_v2  ;;  %v4587_v2 = vmul.f32 %v8852_v14, %v8231_v40  ;;  %v8868_v14 = vld [vmem:[#allocation129_spill] sm:$0xff] }
 0x437   : > { %4329 = vxpose.xlu1.c.b16.cont [3/8] (narrow) %v3540_v19, 32  ;;  %v5863_v21 = vpop.f32.mrf.mxu0  ;;  %v4588_v19 = vmul.f32 %v8854_v39, %v8231_v40 }
 0x438   : > { %v3467_v63 = vpop.f32.mrf.mxu1  ;;  %4345 = vxpose.xlu0.c.b16.cont [3/8] (narrow) %v4161_v28, 32 }
 0x439   : > { %v4088_v38 = vpop.f32.mrf.mxu0 }
 0x43a   : > { %v5764_v25 = vpop.f32.mrf.mxu1 }
 0x43b   : > { %4330 = vxpose.xlu1.c.b16.cont [4/8] (narrow) %v3541_v48, 32  ;;  %v5864_v18 = vpop.f32.mrf.mxu0  ;;  %v3543_v7 = vpack.c.bf16 %v5764_v25, %v5763_v60 }
 0x43c   : > { %v3470_v26 = vpop.f32.mrf.mxu1  ;;  %4346 = vxpose.xlu0.c.b16.cont [4/8] (narrow) %v4162_v61, 32  ;;  %v4164_v15 = vpack.c.bf16 %v5864_v18, %v5863_v21  ;;  %v8856_v21 = vld [vmem:[#allocation135_spill] sm:$0xff]  ;;  %v8858_v18 = vld [vmem:[#allocation134_spill] sm:$0xff] }
 0x43d   : > { %v3542_v55 = vpack.c.bf16 %v3470_v26, %v3467_v63  ;;  %v4091_v59 = vpop.f32.mrf.mxu0  ;;  %v4589_v48 = vmul.f32 %v8856_v21, %v8231_v40  ;;  %v8871_v21 = vld [vmem:[#allocation127_spill] sm:$0xff] }
 0x43e   : > { %v5767_v46 = vpop.f32.mrf.mxu1  ;;  %v4163_v20 = vpack.c.bf16 %v4091_v59, %v4088_v38 }
 0x43f   : > { %4331 = vxpose.xlu1.c.b16.cont [5/8] (narrow) %v3542_v55, 32  ;;  %v5867_v24 = vpop.f32.mrf.mxu0  ;;  %v4590_v55 = vmul.f32 %v8858_v18, %v8231_v40 }
 0x440   : > { %v3483_v30 = vpop.f32.mrf.mxu1  ;;  %4347 = vxpose.xlu0.c.b16.cont [5/8] (narrow) %v4163_v20, 32 }
 0x441   : > { %v4104_v10 = vpop.f32.mrf.mxu0 }
 0x442   : > { %v5768_v32 = vpop.f32.mrf.mxu1 }
 0x443   : > { %4332 = vxpose.xlu1.c.b16.cont [6/8] (narrow) %v3543_v7, 32  ;;  %v5868_v34 = vpop.f32.mrf.mxu0  ;;  %v3545_v35 = vpack.c.bf16 %v5768_v32, %v5767_v46 }
 0x444   : > { %v3486_v53 = vpop.f32.mrf.mxu1  ;;  %4348 = vxpose.xlu0.c.b16.cont [6/8] (narrow) %v4164_v15, 32  ;;  %v4166_v3 = vpack.c.bf16 %v5868_v34, %v5867_v24 }
 0x445   : > { %v3544_v42 = vpack.c.bf16 %v3486_v53, %v3483_v30  ;;  %v4107_v4 = vpop.f32.mrf.mxu0  ;;  %v8860_v30 = vld [vmem:[#allocation133_spill] sm:$0xff]  ;;  %v8862_v53 = vld [vmem:[#allocation132_spill] sm:$0xff] }
 0x446   : > { %v4165_v9 = vpack.c.bf16 %v4107_v4, %v4104_v10  ;;  %v4591_v7 = vmul.f32 %v8860_v30, %v8231_v40 }
 0x447   : > { %4333 = vxpose.xlu1.c.b16.cont [7/8] (narrow) %v3544_v42, 32  ;;  %v4592_v42 = vmul.f32 %v8862_v53, %v8231_v40 }
 0x448   : > { %4349 = vxpose.xlu0.c.b16.cont [7/8] (narrow) %v4165_v9, 32  ;;  %v4271_v11 = vpop.trf.xlu1 }
 0x44b   : > { %4334 = vxpose.xlu1.c.b16.end [8/8] (narrow) %v3545_v35, 32 }
 0x44c   : > { %4350 = vxpose.xlu0.c.b16.end [8/8] (narrow) %v4166_v3, 32  ;;  %v4272_v62 = vpop.trf.xlu1 }
 0x44e   : > { %v4287_v0 = vpop.trf.xlu0 }
 0x44f   : > { %4535 = vmatprep.mubr.bf16.mxu1 %v4287_v0 }
 0x450   : > { %4536 = vmatmul.mubr.bf16.gmra.mxu1 %v4271_v11 }
 0x452   : > { %v4288_v12 = vpop.trf.xlu0 }
 0x453   : > { %4543 = vmatprep.mubr.bf16.mxu1 %v4288_v12 }
 0x458   : > { %4544 = vmatmul.mubr.bf16.gmra.mxu1 %v4272_v62 }
 0x46e   : > { %v4303_v13 = vpop.trf.xlu1 }
 0x472   : > { %v4319_v57 = vpop.trf.xlu0  ;;  %v4304_v6 = vpop.trf.xlu1 }
 0x473   : > { %4551 = vmatprep.mubr.bf16.mxu1 %v4319_v57 }
 0x474   : > { %4552 = vmatmul.mubr.bf16.gmra.mxu1 %v4303_v13 }
 0x476   : > { %v4320_v54 = vpop.trf.xlu0 }
 0x477   : > { %4559 = vmatprep.mubr.bf16.mxu1 %v4320_v54 }
 0x47c   : > { %4560 = vmatmul.mubr.bf16.gmra.mxu1 %v4304_v6 }
 0x491   : > { %v4335_v22 = vpop.trf.xlu1 }
 0x492   : > { %v4351_v17 = vpop.trf.xlu0 }
 0x493   : > { %4567 = vmatprep.mubr.bf16.mxu1 %v4351_v17 }
 0x494   : > { %4568 = vmatmul.mubr.bf16.gmra.mxu1 %v4335_v22  ;;  %v8866_v22 = vld [vmem:[#allocation130_spill] sm:$0xff] }
 0x495   : > { %v4336_v37 = vpop.trf.xlu1  ;;  %v4594_v17 = vmul.f32 %v8866_v22, %v8231_v40 }
 0x496   : > { %v4352_v23 = vpop.trf.xlu0 }
 0x497   : > { %4575 = vmatprep.mubr.bf16.mxu1 %v4352_v23 }
 0x49c   : > { %4576 = vmatmul.mubr.bf16.gmra.mxu1 %v4336_v37 }
 0x4a3   : > { %v5397_v16 = vpop.f32.mrf.mxu1 }
 0x4a5   : > { %v5398_v49 = vpop.f32.mrf.mxu1 }
 0x4a6   : > { %v5399_v5 = vadd.f32 %v5398_v49, %v5397_v16 }
 0x4a7   : > { %v5400_v8 = vpop.f32.mrf.mxu1 }
 0x4a8   : > { %v8235_v0 = vadd.f32 %v5399_v5, %v4587_v2  }
 0x4a9   : > { %v5401_v1 = vpop.f32.mrf.mxu1 }
 0x4aa   : > { %v8853_v31 = vmov %v8235_v0  ;;  %v5402_v60 = vadd.f32 %v5401_v1, %v5400_v8  ;;  %v8864_v0 = vld [vmem:[#allocation131_spill] sm:$0xff] }
 0x4ab   : > { %v5403_v28 = vpop.f32.mrf.mxu1  ;;  %4635 = vst [vmem:[#allocation12] sm:$0xff] (%p8322_p11), %v8853_v31 }
 0x4ac   : > { %v8239_v1 = vadd.f32 %v5402_v60, %v4588_v19   ;;  %v8869_v19 = vld [vmem:[#allocation128_spill] sm:$0xff] }
 0x4ad   : > { %v5404_v38 = vpop.f32.mrf.mxu1 }
 0x4ae   : > { %v8855_v63 = vmov %v8239_v1  ;;  %v5405_v61 = vadd.f32 %v5404_v38, %v5403_v28  ;;  %v4596_v1 = vmul.f32 %v8869_v19, %v8231_v40  ;;  %v4597_v38 = vmul.f32 %v8871_v21, %v8231_v40 }
 0x4af   : > { %v5406_v25 = vpop.f32.mrf.mxu1  ;;  %4636 = vst [vmem:[#allocation12 + $0x8] sm:$0xff] (%p8322_p11), %v8855_v63 }
 0x4b0   : > { %v8243_v2 = vadd.f32 %v5405_v61, %v4589_v48  }
 0x4b1   : > { %v5407_v59 = vpop.f32.mrf.mxu1 }
 0x4b2   : > { %v8857_v26 = vmov %v8243_v2  ;;  %v5408_v46 = vadd.f32 %v5407_v59, %v5406_v25  ;;  %v4595_v2 = vmul.f32 %v8868_v14, %v8231_v40  ;;  %v8873_v59 = vld [vmem:[#allocation126_spill] sm:$0xff] }
 0x4b3   :  { %4637 = vst [vmem:[#allocation12 + $0x10] sm:$0xff] (%p8322_p11), %v8857_v26 }
 0x4b4   : > { %v8247_v3 = vadd.f32 %v5408_v46, %v4590_v55   ;;  %v4598_v46 = vmul.f32 %v8873_v59, %v8231_v40 }
 0x4b6   : > { %v8859_v24 = vmov %v8247_v3  ;;  %v4593_v3 = vmul.f32 %v8864_v0, %v8231_v40  ;;  %v8877_v0 = vld [vmem:[#allocation124_spill] sm:$0xff] }
 0x4b7   :  { %4638 = vst [vmem:[#allocation12 + $0x18] sm:$0xff] (%p8322_p11), %v8859_v24 }
 0x4c7   : > { %v5409_v20 = vpop.f32.mrf.mxu1 }
 0x4c9   : > { %v5410_v10 = vpop.f32.mrf.mxu1 }
 0x4ca   : > { %v5411_v15 = vadd.f32 %v5410_v10, %v5409_v20 }
 0x4cb   : > { %v5412_v32 = vpop.f32.mrf.mxu1 }
 0x4cc   : > { %v8251_v4 = vadd.f32 %v5411_v15, %v4591_v7   ;;  %v8875_v15 = vld [vmem:[#allocation125_spill] sm:$0xff] }
 0x4cd   : > { %v5413_v9 = vpop.f32.mrf.mxu1  ;;  %v4599_v53 = vmul.f32 %v8875_v15, %v8231_v40 }
 0x4ce   : > { %v8861_v34 = vmov %v8251_v4  ;;  %v5414_v35 = vadd.f32 %v5413_v9, %v5412_v32 }
 0x4cf   : > { %v5415_v11 = vpop.f32.mrf.mxu1  ;;  %4639 = vst [vmem:[#allocation12 + $0x20] sm:$0xff] (%p8322_p11), %v8861_v34 }
 0x4d0   : > { %v8255_v5 = vadd.f32 %v5414_v35, %v4592_v42  }
 0x4d1   : > { %v5416_v12 = vpop.f32.mrf.mxu1 }
 0x4d2   : > { %v8863_v62 = vmov %v8255_v5  ;;  %v5417_v13 = vadd.f32 %v5416_v12, %v5415_v11 }
 0x4d3   : > { %v5418_v57 = vpop.f32.mrf.mxu1  ;;  %4640 = vst [vmem:[#allocation12 + $0x28] sm:$0xff] (%p8322_p11), %v8863_v62 }
 0x4d4   : > { %v8259_v6 = vadd.f32 %v5417_v13, %v4593_v3   ;;  %v4600_v3 = vmul.f32 %v8877_v0, %v8231_v40  ;;  %v8889_v0 = vld [vmem:[#allocation118_spill] sm:$0xff] }
 0x4d5   : > { %v5419_v4 = vpop.f32.mrf.mxu1 }
 0x4d6   : > { %v8865_v54 = vmov %v8259_v6  ;;  %v5420_v23 = vadd.f32 %v5419_v4, %v5418_v57 }
 0x4d7   :  { %4641 = vst [vmem:[#allocation12 + $0x30] sm:$0xff] (%p8322_p11), %v8865_v54 }
 0x4d8   : > { %v8263_v7 = vadd.f32 %v5420_v23, %v4594_v17   ;;  %v8879_v17 = vld [vmem:[#allocation123_spill] sm:$0xff] }
 0x4da   : > { %v8867_v37 = vmov %v8263_v7 }
 0x4db   :  { %4642 = vst [vmem:[#allocation12 + $0x38] sm:$0xff] (%p8322_p11), %v8867_v37 }
 0x4ec   : > { %v5421_v16 = vpop.f32.mrf.mxu1 }
 0x4ee   : > { %v5422_v49 = vpop.f32.mrf.mxu1 }
 0x4ef   : > { %v5423_v5 = vadd.f32 %v5422_v49, %v5421_v16 }
 0x4f0   : > { %v5424_v8 = vpop.f32.mrf.mxu1 }
 0x4f1   : > { %v8267_v39 = vadd.f32 %v5423_v5, %v4595_v2   ;;  %v8881_v2 = vld [vmem:[#allocation122_spill] sm:$0xff] }
 0x4f2   : > { %v5425_v6 = vpop.f32.mrf.mxu1  ;;  %v4602_v5 = vmul.f32 %v8881_v2, %v8231_v40  ;;  %v8892_v2 = vld [vmem:[#allocation116_spill] sm:$0xff] }
 0x4f3   : > { %v5426_v60 = vadd.f32 %v5425_v6, %v5424_v8  ;;  %4643 = vst [vmem:[#allocation12 + $0x40] sm:$0xff] (%p8322_p11), %v8267_v39 }
 0x4f4   : > { %v5427_v28 = vpop.f32.mrf.mxu1 }
 0x4f5   : > { %v8271_v9 = vadd.f32 %v5426_v60, %v4596_v1   ;;  %v8883_v1 = vld [vmem:[#allocation121_spill] sm:$0xff] }
 0x4f6   : > { %v5428_v61 = vpop.f32.mrf.mxu1  ;;  %v4603_v6 = vmul.f32 %v8883_v1, %v8231_v40 }
 0x4f7   : > { %v8870_v48 = vmov %v8271_v9  ;;  %v5429_v25 = vadd.f32 %v5428_v61, %v5427_v28 }
 0x4f8   : > { %v5430_v18 = vpop.f32.mrf.mxu1  ;;  %4644 = vst [vmem:[#allocation12 + $0x48] sm:$0xff] (%p8322_p11), %v8870_v48 }
 0x4f9   : > { %v8275_v10 = vadd.f32 %v5429_v25, %v4597_v38  }
 0x4fa   : > { %v5431_v20 = vpop.f32.mrf.mxu1 }
 0x4fb   : > { %v8872_v55 = vmov %v8275_v10  ;;  %v5432_v30 = vadd.f32 %v5431_v20, %v5430_v18  ;;  %v8885_v18 = vld [vmem:[#allocation120_spill] sm:$0xff] }
 0x4fc   : > { %v4604_v59 = vmul.f32 %v8885_v18, %v8231_v40  ;;  %4645 = vst [vmem:[#allocation12 + $0x50] sm:$0xff] (%p8322_p11), %v8872_v55 }
 0x4fd   : > { %v8279_v11 = vadd.f32 %v5432_v30, %v4598_v46  }
 0x4ff   : > { %v8874_v32 = vmov %v8279_v11  ;;  %v4601_v11 = vmul.f32 %v8879_v17, %v8231_v40 }
 0x500   :  { %4646 = vst [vmem:[#allocation12 + $0x58] sm:$0xff] (%p8322_p11), %v8874_v32 }
 0x510   : > { %v5433_v7 = vpop.f32.mrf.mxu1 }
 0x512   : > { %v5434_v42 = vpop.f32.mrf.mxu1 }
 0x513   : > { %v5435_v9 = vadd.f32 %v5434_v42, %v5433_v7  ;;  %v8887_v7 = vld [vmem:[#allocation119_spill] sm:$0xff] }
 0x514   : > { %v5436_v35 = vpop.f32.mrf.mxu1 }
 0x515   : > { %v8283_v12 = vadd.f32 %v5435_v9, %v4599_v53  }
 0x516   : > { %v5437_v10 = vpop.f32.mrf.mxu1 }
 0x517   : > { %v8876_v57 = vmov %v8283_v12  ;;  %v5438_v13 = vadd.f32 %v5437_v10, %v5436_v35 }
 0x518   : > { %v5439_v22 = vpop.f32.mrf.mxu1  ;;  %4647 = vst [vmem:[#allocation12 + $0x60] sm:$0xff] (%p8322_p11), %v8876_v57 }
 0x519   : > { %v8287_v13 = vadd.f32 %v5438_v13, %v4600_v3   ;;  %v4606_v3 = vmul.f32 %v8889_v0, %v8231_v40  ;;  %v8919_v0 = vmov %v8853_v31 }
 0x51a   : > { %v5440_v4 = vpop.f32.mrf.mxu1 }
 0x51b   : > { %v8878_v49 = vmov %v8287_v13  ;;  %v5441_v23 = vadd.f32 %v5440_v4, %v5439_v22 }
 0x51c   : > { %v5442_v16 = vpop.f32.mrf.mxu1  ;;  %4648 = vst [vmem:[#allocation12 + $0x68] sm:$0xff] (%p8322_p11), %v8878_v49 }
 0x51d   : > { %v8291_v14 = vadd.f32 %v5441_v23, %v4601_v11   ;;  %v8891_v11 = vld [vmem:[#allocation117_spill] sm:$0xff] }
 0x51e   : > { %v5443_v12 = vpop.f32.mrf.mxu1  ;;  %v4607_v4 = vmul.f32 %v8891_v11, %v8231_v40  ;;  %v8908_v11 = vmov %v8874_v32 }
 0x51f   : > { %v8880_v60 = vmov %v8291_v14  ;;  %v5444_v8 = vadd.f32 %v5443_v12, %v5442_v16 }
 0x520   :  { %4649 = vst [vmem:[#allocation12 + $0x70] sm:$0xff] (%p8322_p11), %v8880_v60 }
 0x521   : > { %v8295_v15 = vadd.f32 %v5444_v8, %v4602_v5   ;;  %v4608_v5 = vmul.f32 %v8892_v2, %v8231_v40  ;;  %v8917_v2 = vmov %v8857_v26 }
 0x523   : > { %v8882_v28 = vmov %v8295_v15  ;;  %v4605_v15 = vmul.f32 %v8887_v7, %v8231_v40 }
 0x524   :  { %4650 = vst [vmem:[#allocation12 + $0x78] sm:$0xff] (%p8322_p11), %v8882_v28 }
 0x534   : > { %v5445_v19 = vpop.f32.mrf.mxu1 }
 0x536   : > { %v5446_v21 = vpop.f32.mrf.mxu1 }
 0x537   : > { %v5447_v38 = vadd.f32 %v5446_v21, %v5445_v19 }
 0x538   : > { %v5448_v61 = vpop.f32.mrf.mxu1 }
 0x539   : > { %v8299_v16 = vadd.f32 %v5447_v38, %v4603_v6   ;;  %v8893_v6 = vld [vmem:[#allocation115_spill] sm:$0xff] }
 0x53a   : > { %v5449_v14 = vpop.f32.mrf.mxu1  ;;  %v4609_v21 = vmul.f32 %v8893_v6, %v8231_v40  ;;  %v8913_v6 = vmov %v8865_v54 }
 0x53b   : > { %v8884_v25 = vmov %v8299_v16  ;;  %v5450_v46 = vadd.f32 %v5449_v14, %v5448_v61 }
 0x53c   : > { %v5451_v20 = vpop.f32.mrf.mxu1  ;;  %4651 = vst [vmem:[#allocation12 + $0x80] sm:$0xff] (%p8322_p11), %v8884_v25 }
 0x53d   : > { %v8303_v17 = vadd.f32 %v5450_v46, %v4604_v59  }
 0x53e   : > { %v5452_v53 = vpop.f32.mrf.mxu1 }
 0x53f   : > { %v8886_v30 = vmov %v8303_v17  ;;  %v5453_v42 = vadd.f32 %v5452_v53, %v5451_v20  ;;  %v8894_v20 = vld [vmem:[#allocation114_spill] sm:$0xff] }
 0x540   : > { %v5454_v9 = vpop.f32.mrf.mxu1  ;;  %v4610_v7 = vmul.f32 %v8894_v20, %v8231_v40  ;;  %4652 = vst [vmem:[#allocation12 + $0x88] sm:$0xff] (%p8322_p11), %v8886_v30 }
 0x541   : > { %v8307_v18 = vadd.f32 %v5453_v42, %v4605_v15  }
 0x542   : > { %v5455_v10 = vpop.f32.mrf.mxu1 }
 0x543   : > { %v8888_v35 = vmov %v8307_v18  ;;  %v5456_v13 = vadd.f32 %v5455_v10, %v5454_v9  ;;  %v8909_v10 = vmov %v8872_v55  ;;  %v8910_v9 = vmov %v8870_v48 }
 0x544   :  { %4653 = vst [vmem:[#allocation12 + $0x90] sm:$0xff] (%p8322_p11), %v8888_v35 }
 0x545   : > { %v8311_v19 = vadd.f32 %v5456_v13, %v4606_v3   ;;  %v8906_v13 = vmov %v8878_v49  ;;  %v8916_v3 = vmov %v8859_v24 }
 0x547   : > { %v8890_v38 = vmov %v8311_v19 }
 0x548   :  { %4654 = vst [vmem:[#allocation12 + $0x98] sm:$0xff] (%p8322_p11), %v8890_v38 }
 0x554   : > { %v5457_v22 = vpop.f32.mrf.mxu1 }
 0x556   : > { %v5458_v17 = vpop.f32.mrf.mxu1 }
 0x557   : > { %v5459_v23 = vadd.f32 %v5458_v17, %v5457_v22  ;;  %v8902_v17 = vmov %v8886_v30 }
 0x558   : > { %v5460_v16 = vpop.f32.mrf.mxu1 }
 0x559   : > { %v4631_v61 = vadd.f32 %v5459_v23, %v4607_v4   ;;  %v8915_v4 = vmov %v8861_v34 }
 0x55a   : > { %v5461_v12 = vpop.f32.mrf.mxu1 }
 0x55b   : > { %v5462_v8 = vadd.f32 %v5461_v12, %v5460_v16  ;;  %v8899_v20 = vmov %v4631_v61  ;;  %v8903_v16 = vmov %v8884_v25  ;;  %v8907_v12 = vmov %v8876_v57  ;;  %4655 = vst [vmem:[#allocation12 + $0xa0] sm:$0xff] (%p8322_p11), %v4631_v61 }
 0x55c   : > { %v5463_v1 = vpop.f32.mrf.mxu1 }
 0x55d   : > { %v4632_v59 = vadd.f32 %v5462_v8, %v4608_v5   ;;  %v8911_v8 = vmov %v8267_v39  ;;  %v8914_v5 = vmov %v8863_v62 }
 0x55e   : > { %v5464_v18 = vpop.f32.mrf.mxu1 }
 0x55f   : > { %v5465_v19 = vadd.f32 %v5464_v18, %v5463_v1  ;;  %v8901_v18 = vmov %v8888_v35  ;;  %v8918_v1 = vmov %v8855_v63  ;;  %4656 = vst [vmem:[#allocation12 + $0xa8] sm:$0xff] (%p8322_p11), %v4632_v59 }
 0x560   : > { %v5466_v14 = vpop.f32.mrf.mxu1 }
 0x561   : > { %v4633_v46 = vadd.f32 %v5465_v19, %v4609_v21   ;;  %v8898_v21 = vmov %v4632_v59  ;;  %v8900_v19 = vmov %v8890_v38 }
 0x562   : > { %v5467_v15 = vpop.f32.mrf.mxu1 }
 0x563   : > { %v5468_v53 = vadd.f32 %v5467_v15, %v5466_v14  ;;  %v8897_v22 = vmov %v4633_v46  ;;  %v8904_v15 = vmov %v8882_v28  ;;  %v8905_v14 = vmov %v8880_v60  ;;  %229 = sbr.rel (!%p8322_p11) target bundleno = 123 (0x7b), region = 87  ;;  %4657 = vst [vmem:[#allocation12 + $0xb0] sm:$0xff] (%p8322_p11), %v4633_v46 }
 0x565   : > { %v4634_v42 = vadd.f32 %v5468_v53, %v4610_v7   ;;  %v8912_v7 = vmov %v8867_v37 }
 0x567   : > { %v8896_v23 = vmov %v4634_v42  ;;  %4658 = vst [vmem:[#allocation12 + $0xb8] sm:$0xff] (%p8322_p11), %v4634_v42 }
 0x568   :  { %6187 = shalt.err (!%p6184_p2)
}
 0x569   :  { %s6415_s8 = smov 128   ;;  %s6416_s17 = smov 8  }
 0x56a   :  { %4670 = dma.vmem_to_hbm [thread:$0]  %s4665_s5, 3072, %s8431_s10, [#allocation4], %s6415_s8, %s6415_s8, %s6416_s17  }
 0x56b   :  { %6304 = dma.done.wait [#allocation4], 3072  }
 0x56c   :  { %6305 = vsyncadd [#allocation4], 4294964224 }
 0x56d   :  { %4674 = vsyncpa [#allocation3], 1 }
 0x56e   :  { %4675 = vsyncpa [#allocation8], 1 }
 0x56f   :  { %4676 = vsyncpa [#allocation11], 1 }
 0x570   :  { %4677 = vsyncpa [#allocation4], 1 }
 0x571   :  { %4678 = vsyncpa [#allocation5], 1 }

</bundles_post_ra>
